<compile_context>
chip_gen: v7x
topology: tpu7x:2x2x1
jax: 0.10.0
libtpu: 0.0.40
codegen_flags: <defaults>
</compile_context>

<pallas_src>
import jax
import jax.numpy as jnp
from jax.experimental import pallas as pl
from jax.experimental.pallas import tpu as pltpu

INPUT_SIZE = 784          # 28 * 28
ENC_HIDDEN = 512
LATENT = 16               # hidden_size (class default)
OUT_PAD = 896             # 784 padded to 7*128 for lane-dense output stores
MAX_TB = 2048             # keep double-buffered tiles well inside v7x VMEM


def _round_up(x, m):
    return (x + m - 1) // m * m


def _default_tb():
    """Per-generation batch tile: fill the MXU M dimension.
    v5e MXU is 128-row -> 128; v6e/v7x MXU is 256-row -> 256."""
    tb = 256
    try:
        kind = jax.devices()[0].device_kind.lower()
        if "v5 lite" in kind or "v5e" in kind or "v5litepod" in kind:
            tb = 128
    except Exception:
        pass
    return tb


def _vae_kernel(x_ref, w1_ref, b1_ref, wmv_ref, bmv_ref, eps_ref,
                wd1_ref, bd1_ref, wd2_ref, bd2_ref,
                stats_ref, out_ref):
    # ---- encoder: h = relu(x @ W1 + b1)   (bf16 x & W1, f32 MXU accumulation)
    h = jnp.dot(x_ref[...], w1_ref[...], preferred_element_type=jnp.float32)
    h = jnp.maximum(h + b1_ref[...], 0.0)

    # ---- fused mu / log_var heads: single (512, 32) matmul
    stats = jnp.dot(h, wmv_ref[...],
                    preferred_element_type=jnp.float32) + bmv_ref[...]
    stats_ref[...] = stats
    mu = stats[:, :LATENT]
    log_var = stats[:, LATENT:]

    # ---- reparameterize: latent = exp(0.5*log_var) * eps + mu
    latent = jnp.exp(0.5 * log_var) * eps_ref[...] + mu

    # ---- decoder
    d1 = jnp.dot(latent, wd1_ref[...], preferred_element_type=jnp.float32)
    d1 = jnp.maximum(d1 + bd1_ref[...], 0.0)

    logits = jnp.dot(d1.astype(jnp.bfloat16), wd2_ref[...],
                     preferred_element_type=jnp.float32) + bd2_ref[...]
    # sigmoid via tanh: 1 EUP op per element (vs exp + reciprocal = 2), exact.
    out_ref[...] = (0.5 * (jnp.tanh(0.5 * logits) + 1.0)).astype(out_ref.dtype)


def vae_forward(x_img, params, eps, *, tb=None, out_dtype=jnp.float32):
    """x_img: (B, 1, 28, 28) NCHW.  Returns (mu, log_var, out_img)."""
    B = x_img.shape[0]
    # bf16 x across the pallas_call boundary (fuses with the reshape/pad).
    x = x_img.reshape(B, INPUT_SIZE).astype(jnp.bfloat16)
    eps = eps.astype(jnp.float32)

    (w1, b1, wmv, bmv, wd1, bd1, wd2, bd2) = params

    # ---- batch tile selection (hardened): multiple of 8, <= padded batch,
    #      capped so tiles stay inside every generation's VMEM budget.
    if tb is None:
        tb = _default_tb()
    tb = _round_up(max(8, int(tb)), 8)
    tb = min(tb, _round_up(B, 8), MAX_TB)

    b_pad = _round_up(B, tb)
    if b_pad != B:
        x = jnp.pad(x, ((0, b_pad - B), (0, 0)))
        eps = jnp.pad(eps, ((0, b_pad - B), (0, 0)))
    grid = (b_pad // tb,)

    row_map = lambda i: (i, 0)                # streamed per batch tile
    fix_map = lambda i: (0, 0)                # VMEM-resident across the grid

    out_bytes = 2 if out_dtype == jnp.bfloat16 else 4
    flops = 2 * b_pad * (INPUT_SIZE * ENC_HIDDEN
                         + ENC_HIDDEN * 2 * LATENT
                         + LATENT * ENC_HIDDEN
                         + ENC_HIDDEN * OUT_PAD)
    transcendentals = b_pad * (LATENT + OUT_PAD)      # exp (latent) + tanh (out)
    bytes_accessed = int(
        w1.size * 2 + wd2.size * 2
        + (b1.size + wmv.size + bmv.size + wd1.size + bd1.size + bd2.size) * 4
        + x.size * 2 + eps.size * 4
        + b_pad * (2 * LATENT * 4 + OUT_PAD * out_bytes))

    stats, out = pl.pallas_call(
        _vae_kernel,
        out_shape=(
            jax.ShapeDtypeStruct((b_pad, 2 * LATENT), jnp.float32),
            jax.ShapeDtypeStruct((b_pad, OUT_PAD), out_dtype),
        ),
        grid=grid,
        in_specs=[
            pl.BlockSpec((tb, INPUT_SIZE), row_map),           # x (bf16, streamed)
            pl.BlockSpec((INPUT_SIZE, ENC_HIDDEN), fix_map),   # w1 (bf16)
            pl.BlockSpec((1, ENC_HIDDEN), fix_map),            # b1
            pl.BlockSpec((ENC_HIDDEN, 2 * LATENT), fix_map),   # wmv (fused heads)
            pl.BlockSpec((1, 2 * LATENT), fix_map),            # bmv
            pl.BlockSpec((tb, LATENT), row_map),               # eps (streamed)
            pl.BlockSpec((LATENT, ENC_HIDDEN), fix_map),       # wd1
            pl.BlockSpec((1, ENC_HIDDEN), fix_map),            # bd1
            pl.BlockSpec((ENC_HIDDEN, OUT_PAD), fix_map),      # wd2 (bf16, padded)
            pl.BlockSpec((1, OUT_PAD), fix_map),               # bd2 (padded)
        ],
        out_specs=(
            pl.BlockSpec((tb, 2 * LATENT), row_map),           # [mu | log_var]
            pl.BlockSpec((tb, OUT_PAD), row_map),              # sigmoid output
        ),
        compiler_params=pltpu.CompilerParams(
            dimension_semantics=("parallel",)),
        cost_estimate=pl.CostEstimate(
            flops=flops, transcendentals=transcendentals,
            bytes_accessed=bytes_accessed),
    )(x, w1, b1, wmv, bmv, eps, wd1, bd1, wd2, bd2)

    mu = stats[:B, :LATENT]
    log_var = stats[:B, LATENT:]
    out_img = out[:B, :INPUT_SIZE].reshape(B, 1, 28, 28)
    return mu, log_var, out_img


def init_params(key):
    """Synthetic parameters matching the PyTorch module's layer shapes.
    Big weights in bf16, heads fused, decoder output padded to 896 lanes."""
    ks = jax.random.split(key, 10)

    def lin(kw, kb, fan_in, fan_out):
        scale = 1.0 / jnp.sqrt(jnp.float32(fan_in))
        w = jax.random.uniform(kw, (fan_in, fan_out), jnp.float32, -scale, scale)
        b = jax.random.uniform(kb, (1, fan_out), jnp.float32, -scale, scale)
        return w, b

    w1, b1 = lin(ks[0], ks[1], INPUT_SIZE, ENC_HIDDEN)       # encodernet
    wmu, bmu = lin(ks[2], ks[3], ENC_HIDDEN, LATENT)         # mu_encoder
    wvar, bvar = lin(ks[4], ks[5], ENC_HIDDEN, LATENT)       # var_encoder
    wd1, bd1 = lin(ks[6], ks[7], LATENT, ENC_HIDDEN)         # decoder_1
    wd2, bd2 = lin(ks[8], ks[9], ENC_HIDDEN, INPUT_SIZE)     # decoder_2

    wmv = jnp.concatenate([wmu, wvar], axis=1)               # (512, 32)
    bmv = jnp.concatenate([bmu, bvar], axis=1)               # (1, 32)

    wd2p = jnp.pad(wd2, ((0, 0), (0, OUT_PAD - INPUT_SIZE))) # (512, 896)
    bd2p = jnp.pad(bd2, ((0, 0), (0, OUT_PAD - INPUT_SIZE))) # (1, 896)

    return (w1.astype(jnp.bfloat16), b1, wmv, bmv,
            wd1, bd1, wd2p.astype(jnp.bfloat16), bd2p)


def _reference(x_img, params, eps):
    """Plain-JAX reference (same bf16 weights / f32 accumulation)."""
    (w1, b1, wmv, bmv, wd1, bd1, wd2, bd2) = params
    B = x_img.shape[0]
    x = x_img.reshape(B, INPUT_SIZE).astype(jnp.bfloat16)
    h = jnp.maximum(
        jnp.dot(x, w1, preferred_element_type=jnp.float32) + b1, 0.0)
    stats = jnp.dot(h, wmv, preferred_element_type=jnp.float32) + bmv
    mu, log_var = stats[:, :LATENT], stats[:, LATENT:]
    latent = jnp.exp(0.5 * log_var) * eps + mu
    d1 = jnp.maximum(
        jnp.dot(latent, wd1, preferred_element_type=jnp.float32) + bd1, 0.0)
    logits = jnp.dot(d1.astype(jnp.bfloat16), wd2,
                     preferred_element_type=jnp.float32) + bd2
    out = jax.nn.sigmoid(logits)[:, :INPUT_SIZE]
    return mu, log_var, out.reshape(B, 1, 28, 28)


if __name__ == "__main__":
    BATCH = 64   # module-level batch_size in the PyTorch file
    key = jax.random.PRNGKey(0)
    k_x, k_eps, k_p = jax.random.split(key, 3)

    x_img = jax.random.normal(k_x, (BATCH, 1, 28, 28), jnp.float32)
    eps = jax.random.normal(k_eps, (BATCH, LATENT), jnp.float32)  # N(0,1) noise
    params = init_params(k_p)

    # tb auto-selects per generation and clamps to the padded batch (64 here),
    # so the example runs as a single MXU-friendly grid step.
    mu, log_var, out = vae_forward(x_img, params, eps)
    jax.block_until_ready((mu, log_var, out))

    mu_r, lv_r, out_r = _reference(x_img, params, eps)
    assert mu.shape == (BATCH, LATENT)
    assert log_var.shape == (BATCH, LATENT)
    assert out.shape == (BATCH, 1, 28, 28)
    assert jnp.allclose(mu, mu_r, atol=2e-2, rtol=2e-2)
    assert jnp.allclose(log_var, lv_r, atol=2e-2, rtol=2e-2)
    assert jnp.allclose(out, out_r, atol=2e-2, rtol=2e-2)

    print("KERNEL_OK")
</pallas_src>

<mosaic_0001>
module attributes {stable_mosaic.version = 11 : i64} {
  func.func @_vae_kernel(%arg0: i32, %arg1: memref<64x784xbf16, #tpu.memory_space<vmem>>, %arg2: memref<784x512xbf16, #tpu.memory_space<vmem>>, %arg3: memref<1x512xf32, #tpu.memory_space<vmem>>, %arg4: memref<512x32xf32, #tpu.memory_space<vmem>>, %arg5: memref<1x32xf32, #tpu.memory_space<vmem>>, %arg6: memref<64x16xf32, #tpu.memory_space<vmem>>, %arg7: memref<16x512xf32, #tpu.memory_space<vmem>>, %arg8: memref<1x512xf32, #tpu.memory_space<vmem>>, %arg9: memref<512x896xbf16, #tpu.memory_space<vmem>>, %arg10: memref<1x896xf32, #tpu.memory_space<vmem>>, %arg11: memref<64x32xf32, #tpu.memory_space<vmem>>, %arg12: memref<64x896xf32, #tpu.memory_space<vmem>>) attributes {dimension_semantics = [#tpu.dimension_semantics<parallel>], iteration_bounds = array<i64: 1>, scalar_prefetch = 0 : i64, scratch_operands = 0 : i64, tpu.core_type = #tpu.core_type<tc>, window_params = [{transform_indices = @transform_0, window_bounds = array<i64: 64, 784>}, {pipeline_mode = #tpu.pipeline_mode<synchronous>, transform_indices = @transform_1, window_bounds = array<i64: 784, 512>}, {pipeline_mode = #tpu.pipeline_mode<synchronous>, transform_indices = @transform_2, window_bounds = array<i64: 1, 512>}, {pipeline_mode = #tpu.pipeline_mode<synchronous>, transform_indices = @transform_3, window_bounds = array<i64: 512, 32>}, {pipeline_mode = #tpu.pipeline_mode<synchronous>, transform_indices = @transform_4, window_bounds = array<i64: 1, 32>}, {transform_indices = @transform_5, window_bounds = array<i64: 64, 16>}, {pipeline_mode = #tpu.pipeline_mode<synchronous>, transform_indices = @transform_6, window_bounds = array<i64: 16, 512>}, {pipeline_mode = #tpu.pipeline_mode<synchronous>, transform_indices = @transform_7, window_bounds = array<i64: 1, 512>}, {pipeline_mode = #tpu.pipeline_mode<synchronous>, transform_indices = @transform_8, window_bounds = array<i64: 512, 896>}, {pipeline_mode = #tpu.pipeline_mode<synchronous>, transform_indices = @transform_9, window_bounds = array<i64: 1, 896>}, {transform_indices = @transform_10, window_bounds = array<i64: 64, 32>}, {transform_indices = @transform_11, window_bounds = array<i64: 64, 896>}]} {
    %c0 = arith.constant 0 : index
    %c0_0 = arith.constant 0 : index
    %0 = vector.load %arg1[%c0, %c0_0] : memref<64x784xbf16, #tpu.memory_space<vmem>>, vector<64x784xbf16>
    %c0_1 = arith.constant 0 : index
    %c0_2 = arith.constant 0 : index
    %1 = vector.load %arg2[%c0_1, %c0_2] : memref<784x512xbf16, #tpu.memory_space<vmem>>, vector<784x512xbf16>
    %cst = arith.constant dense<0.000000e+00> : vector<64x512xf32>
    %2 = tpu.matmul %0, %1, %cst {dimension_numbers = #tpu.dot_dimension_numbers<[1], [0], [0], [1], [0, 0, 1, 1], [], []>} : vector<64x784xbf16>, vector<784x512xbf16>, vector<64x512xf32> -> vector<64x512xf32>
    %c0_3 = arith.constant 0 : index
    %c0_4 = arith.constant 0 : index
    %3 = vector.load %arg3[%c0_3, %c0_4] : memref<1x512xf32, #tpu.memory_space<vmem>>, vector<1x512xf32>
    %4 = vector.broadcast %3 : vector<1x512xf32> to vector<64x512xf32>
    %5 = arith.addf %2, %4 : vector<64x512xf32>
    %cst_5 = arith.constant 0.000000e+00 : f32
    %6 = vector.broadcast %cst_5 : f32 to vector<64x512xf32>
    %7 = arith.maximumf %5, %6 : vector<64x512xf32>
    %c0_6 = arith.constant 0 : index
    %c0_7 = arith.constant 0 : index
    %8 = vector.load %arg4[%c0_6, %c0_7] : memref<512x32xf32, #tpu.memory_space<vmem>>, vector<512x32xf32>
    %cst_8 = arith.constant dense<0.000000e+00> : vector<64x32xf32>
    %9 = tpu.matmul %7, %8, %cst_8 {dimension_numbers = #tpu.dot_dimension_numbers<[1], [0], [0], [1], [0, 0, 1, 1], [], []>} : vector<64x512xf32>, vector<512x32xf32>, vector<64x32xf32> -> vector<64x32xf32>
    %c0_9 = arith.constant 0 : index
    %c0_10 = arith.constant 0 : index
    %10 = vector.load %arg5[%c0_9, %c0_10] : memref<1x32xf32, #tpu.memory_space<vmem>>, vector<1x32xf32>
    %11 = vector.broadcast %10 : vector<1x32xf32> to vector<64x32xf32>
    %12 = arith.addf %9, %11 : vector<64x32xf32>
    %c0_11 = arith.constant 0 : index
    %c0_12 = arith.constant 0 : index
    %13 = vector.load %arg11[%c0_11, %c0_12] : memref<64x32xf32, #tpu.memory_space<vmem>>, vector<64x32xf32>
    tpu.vector_store %arg11[%c0_11, %c0_12], %12 {strides = array<i32>} : memref<64x32xf32, #tpu.memory_space<vmem>>, vector<64x32xf32>,
    %14 = vector.extract_strided_slice %12 {offsets = [0, 0], sizes = [64, 16], strides = [1, 1]} : vector<64x32xf32> to vector<64x16xf32>
    %15 = vector.extract_strided_slice %12 {offsets = [0, 16], sizes = [64, 16], strides = [1, 1]} : vector<64x32xf32> to vector<64x16xf32>
    %cst_13 = arith.constant 5.000000e-01 : f32
    %16 = vector.broadcast %cst_13 : f32 to vector<64x16xf32>
    %17 = arith.mulf %16, %15 : vector<64x16xf32>
    %18 = math.exp %17 : vector<64x16xf32>
    %c0_14 = arith.constant 0 : index
    %c0_15 = arith.constant 0 : index
    %19 = vector.load %arg6[%c0_14, %c0_15] : memref<64x16xf32, #tpu.memory_space<vmem>>, vector<64x16xf32>
    %20 = arith.mulf %18, %19 : vector<64x16xf32>
    %21 = arith.addf %20, %14 : vector<64x16xf32>
    %c0_16 = arith.constant 0 : index
    %c0_17 = arith.constant 0 : index
    %22 = vector.load %arg7[%c0_16, %c0_17] : memref<16x512xf32, #tpu.memory_space<vmem>>, vector<16x512xf32>
    %cst_18 = arith.constant dense<0.000000e+00> : vector<64x512xf32>
    %23 = tpu.matmul %21, %22, %cst_18 {dimension_numbers = #tpu.dot_dimension_numbers<[1], [0], [0], [1], [0, 0, 1, 1], [], []>} : vector<64x16xf32>, vector<16x512xf32>, vector<64x512xf32> -> vector<64x512xf32>
    %c0_19 = arith.constant 0 : index
    %c0_20 = arith.constant 0 : index
    %24 = vector.load %arg8[%c0_19, %c0_20] : memref<1x512xf32, #tpu.memory_space<vmem>>, vector<1x512xf32>
    %25 = vector.broadcast %24 : vector<1x512xf32> to vector<64x512xf32>
    %26 = arith.addf %23, %25 : vector<64x512xf32>
    %cst_21 = arith.constant 0.000000e+00 : f32
    %27 = vector.broadcast %cst_21 : f32 to vector<64x512xf32>
    %28 = arith.maximumf %26, %27 : vector<64x512xf32>
    %29 = arith.truncf %28 : vector<64x512xf32> to vector<64x512xbf16>
    %c0_22 = arith.constant 0 : index
    %c0_23 = arith.constant 0 : index
    %30 = vector.load %arg9[%c0_22, %c0_23] : memref<512x896xbf16, #tpu.memory_space<vmem>>, vector<512x896xbf16>
    %cst_24 = arith.constant dense<0.000000e+00> : vector<64x896xf32>
    %31 = tpu.matmul %29, %30, %cst_24 {dimension_numbers = #tpu.dot_dimension_numbers<[1], [0], [0], [1], [0, 0, 1, 1], [], []>} : vector<64x512xbf16>, vector<512x896xbf16>, vector<64x896xf32> -> vector<64x896xf32>
    %c0_25 = arith.constant 0 : index
    %c0_26 = arith.constant 0 : index
    %32 = vector.load %arg10[%c0_25, %c0_26] : memref<1x896xf32, #tpu.memory_space<vmem>>, vector<1x896xf32>
    %33 = vector.broadcast %32 : vector<1x896xf32> to vector<64x896xf32>
    %34 = arith.addf %31, %33 : vector<64x896xf32>
    %cst_27 = arith.constant 5.000000e-01 : f32
    %35 = vector.broadcast %cst_27 : f32 to vector<64x896xf32>
    %36 = arith.mulf %35, %34 : vector<64x896xf32>
    %37 = math.tanh %36 : vector<64x896xf32>
    %cst_28 = arith.constant 1.000000e+00 : f32
    %38 = vector.broadcast %cst_28 : f32 to vector<64x896xf32>
    %39 = arith.addf %37, %38 : vector<64x896xf32>
    %cst_29 = arith.constant 5.000000e-01 : f32
    %40 = vector.broadcast %cst_29 : f32 to vector<64x896xf32>
    %41 = arith.mulf %40, %39 : vector<64x896xf32>
    %c0_30 = arith.constant 0 : index
    %c0_31 = arith.constant 0 : index
    %42 = vector.load %arg12[%c0_30, %c0_31] : memref<64x896xf32, #tpu.memory_space<vmem>>, vector<64x896xf32>
    tpu.vector_store %arg12[%c0_30, %c0_31], %41 {strides = array<i32>} : memref<64x896xf32, #tpu.memory_space<vmem>>, vector<64x896xf32>,
    return
  }
  func.func @transform_0(%arg0: i32) -> (i32, i32) {
    %c0_i32 = arith.constant 0 : i32
    %c0_i32_0 = arith.constant 0 : i32
    return %arg0, %c0_i32 : i32, i32
  }
  func.func @transform_1(%arg0: i32) -> (i32, i32) {
    %c0_i32 = arith.constant 0 : i32
    %c0_i32_0 = arith.constant 0 : i32
    %c0_i32_1 = arith.constant 0 : i32
    return %c0_i32, %c0_i32_0 : i32, i32
  }
  func.func @transform_2(%arg0: i32) -> (i32, i32) {
    %c0_i32 = arith.constant 0 : i32
    %c0_i32_0 = arith.constant 0 : i32
    %c0_i32_1 = arith.constant 0 : i32
    return %c0_i32, %c0_i32_0 : i32, i32
  }
  func.func @transform_3(%arg0: i32) -> (i32, i32) {
    %c0_i32 = arith.constant 0 : i32
    %c0_i32_0 = arith.constant 0 : i32
    %c0_i32_1 = arith.constant 0 : i32
    return %c0_i32, %c0_i32_0 : i32, i32
  }
  func.func @transform_4(%arg0: i32) -> (i32, i32) {
    %c0_i32 = arith.constant 0 : i32
    %c0_i32_0 = arith.constant 0 : i32
    %c0_i32_1 = arith.constant 0 : i32
    return %c0_i32, %c0_i32_0 : i32, i32
  }
  func.func @transform_5(%arg0: i32) -> (i32, i32) {
    %c0_i32 = arith.constant 0 : i32
    %c0_i32_0 = arith.constant 0 : i32
    return %arg0, %c0_i32 : i32, i32
  }
  func.func @transform_6(%arg0: i32) -> (i32, i32) {
    %c0_i32 = arith.constant 0 : i32
    %c0_i32_0 = arith.constant 0 : i32
    %c0_i32_1 = arith.constant 0 : i32
    return %c0_i32, %c0_i32_0 : i32, i32
  }
  func.func @transform_7(%arg0: i32) -> (i32, i32) {
    %c0_i32 = arith.constant 0 : i32
    %c0_i32_0 = arith.constant 0 : i32
    %c0_i32_1 = arith.constant 0 : i32
    return %c0_i32, %c0_i32_0 : i32, i32
  }
  func.func @transform_8(%arg0: i32) -> (i32, i32) {
    %c0_i32 = arith.constant 0 : i32
    %c0_i32_0 = arith.constant 0 : i32
    %c0_i32_1 = arith.constant 0 : i32
    return %c0_i32, %c0_i32_0 : i32, i32
  }
  func.func @transform_9(%arg0: i32) -> (i32, i32) {
    %c0_i32 = arith.constant 0 : i32
    %c0_i32_0 = arith.constant 0 : i32
    %c0_i32_1 = arith.constant 0 : i32
    return %c0_i32, %c0_i32_0 : i32, i32
  }
  func.func @transform_10(%arg0: i32) -> (i32, i32) {
    %c0_i32 = arith.constant 0 : i32
    %c0_i32_0 = arith.constant 0 : i32
    return %arg0, %c0_i32 : i32, i32
  }
  func.func @transform_11(%arg0: i32) -> (i32, i32) {
    %c0_i32 = arith.constant 0 : i32
    %c0_i32_0 = arith.constant 0 : i32
    return %arg0, %c0_i32 : i32, i32
  }
}

</mosaic_0001>

<bundles_post_ra>
// kernel: tpu_custom_call.1
= control target key start
LH: loop header
LB: loop body
LE: loop exit
PB: predicated region body
PF: predicated region fallthrough
CT: control target
= control target key end

     0   :  { %17 = vsyncpa [#allocation3], 0  ;;  %s7875_s0 = inlined_call_operand.vmem [shape: bf16[64,784], index: 0, kind: input, shape index: {}]   ;;  %s7876_s1 = inlined_call_operand.hbm [shape: bf16[784,512], index: 1, kind: input, shape index: {}]   ;;  %s7877_s2 = inlined_call_operand.vmem [shape: f32[1,512], index: 2, kind: input, shape index: {}]   ;;  %s7878_s3 = inlined_call_operand.vmem [shape: f32[512,32], index: 3, kind: input, shape index: {}]   ;;  %s7879_s4 = inlined_call_operand.vmem [shape: f32[1,32], index: 4, kind: input, shape index: {}]   ;;  %s7880_s5 = inlined_call_operand.vmem [shape: f32[64,16], index: 5, kind: input, shape index: {}]   ;;  %s7881_s6 = inlined_call_operand.vmem [shape: f32[16,512], index: 6, kind: input, shape index: {}]   ;;  %s7882_s7 = inlined_call_operand.vmem [shape: f32[1,512], index: 7, kind: input, shape index: {}]   ;;  %s7883_s8 = inlined_call_operand.hbm [shape: bf16[512,896], index: 8, kind: input, shape index: {}]   ;;  %s7884_s9 = inlined_call_operand.vmem [shape: f32[1,896], index: 9, kind: input, shape index: {}]   ;;  %s7885_s10 = inlined_call_operand.vmem [shape: f32[64,32], index: 10, kind: output, shape index: {0}]   ;;  %s7886_s11 = inlined_call_operand.hbm [shape: f32[64,896], index: 11, kind: output, shape index: {1}]  }
   0x1   :  { %18 = vsyncpa [#allocation6], 0 }
   0x2   :  { %19 = vsyncpa [#allocation4], 0  ;;  %s6958_s17 = smov [#allocation2]   ;;  %s6886_s21 = scalar_lea.hbm %s7876_s1, 25088 }
   0x3   :  { %s27_s18 = sshll.u32 %s6958_s17, 4  ;;  %p6887_p0 = scmp.ne.s32.totalorder %s7876_s1, %s6886_s21  ;;  %s28_s18 = int_to_ptr.vmem [resolvable:$true] %s27_s18 }
   0x4   :  { %p6890_p1 = scmp.lt.u32.totalorder %s6886_s21, %s7876_s1 }
   0x6   :  { %p6892_p2 = pnand %p6890_p1, %p6887_p0 }
   0x8   :  { %6895 = shalt.err (!%p6892_p2)
}
   0x9   :  { %s6896_s26 = scalar_lea.vmem %s28_s18, 25088  ;;  %p6901_p4 = scmp.lt.s32.totalorder %s28_s18, %s28_s18 }
   0xa   :  { %p6897_p3 = scmp.ne.s32.totalorder %s28_s18, %s6896_s26  ;;  %p6902_p5 = scmp.lt.s32.totalorder %s6896_s26, %s6896_s26 }
   0xc   :  { %p6903_p6 = por %p6902_p5, %p6901_p4 }
   0xe   :  { %p6904_p7 = pnand %p6903_p6, %p6897_p3 }
  0x10   :  { %6907 = shalt.err (!%p6904_p7)
}
  0x11   :  { %s6959_s27 = smov 256   ;;  %s6960_s28 = smov 16  }
  0x12   :  { %33 = dma.hbm_to_vmem [thread:$0]  %s7876_s1, 25088, %s28_s18, [#allocation3], %s6959_s27, %s6959_s27, %s6960_s28  }
  0x13   :  { %s6961_s12 = smov [#allocation5]   ;;  %s6908_s16 = scalar_lea.hbm %s7883_s8, 28672 }
  0x14   :  { %s51_s13 = sshll.u32 %s6961_s12, 4  ;;  %p6909_p8 = scmp.ne.s32.totalorder %s7883_s8, %s6908_s16  ;;  %s52_s13 = int_to_ptr.vmem [resolvable:$true] %s51_s13 }
  0x15   :  { %p6912_p9 = scmp.lt.u32.totalorder %s6908_s16, %s7883_s8 }
  0x17   :  { %p6914_p10 = pnand %p6912_p9, %p6909_p8 }
  0x19   :  { %6917 = shalt.err (!%p6914_p10)
}
  0x1a   :  { %s6918_s22 = scalar_lea.vmem %s52_s13, 28672  ;;  %p6923_p12 = scmp.lt.s32.totalorder %s52_s13, %s52_s13 }
  0x1b   :  { %p6919_p11 = scmp.ne.s32.totalorder %s52_s13, %s6918_s22  ;;  %p6924_p13 = scmp.lt.s32.totalorder %s6918_s22, %s6918_s22 }
  0x1d   :  { %p6925_p0 = por %p6924_p13, %p6923_p12 }
  0x1f   :  { %p6926_p1 = pnand %p6925_p0, %p6919_p11 }
  0x21   :  { %6929 = shalt.err (!%p6926_p1)
}
  0x22   :  { %s6962_s1 = smov 448   ;;  %s6963_s18 = smov 28  }
  0x23   :  { %57 = dma.hbm_to_vmem [thread:$0]  %s7883_s8, 28672, %s52_s13, [#allocation6], %s6962_s1, %s6962_s1, %s6963_s18  }
  0x24   :  { %6952 = dma.done.wait [#allocation3], 25088  }
  0x25   :  { %6953 = vsyncadd [#allocation3], 4294942208 }
  0x26   :  { %6954 = dma.done.wait [#allocation6], 28672  }
  0x27   :  { %6955 = vsyncadd [#allocation6], 4294938624  ;;  %v6964_v0 = vmov 0   ;;  %v6100_v1 = vld [vmem:[#allocation2 + $0x4] ss:$16 sps:$4 sm:$0xff]   ;;  %vm1437_vm0 = vcmask 130048  }
  0x28   :  { %1701 = vmatprep.mubr.bf16.mxu1 %v6964_v0  ;;  %v6102_v2 = vld [vmem:[#allocation2 + $0x604] ss:$16 sps:$4 sm:$0xff]   ;;  %1450 = vmatprep.subr.bf16.mxu0 %v6100_v1  ;;  %v6104_v3 = vld [vmem:[#allocation2] ss:$16 sps:$4 sm:$0xff]   ;;  %v6109_v7 = vld [vmem:[#allocation2 + $0x8] ss:$16 sps:$4 sm:$0xff]  }
  0x29   :  { %v6105_v4 = vld [vmem:[#allocation2 + $0x600] ss:$16 sps:$4 sm:$0xff]   ;;  %1669 = vmatprep.subr.bf16.mxu1 %v6102_v2  ;;  %v6106_v5 = vld [vmem:[#allocation2 + $0x24] ss:$16 sps:$4 sm:$0xff]   ;;  %1451 = vmatpush1.bf16.msra.mxu0 %v6104_v3  ;;  %v6111_v8 = vld [vmem:[#allocation2 + $0xc] ss:$16 sps:$4 sm:$0xff]  }
  0x2a   :  { %1670 = vmatpush1.bf16.msra.mxu1 %v6105_v4  ;;  %v6108_v6 = vld [vmem:[%s7875_s0 + $0x18] ss:$28 sps:$4 sm:$0xff]   ;;  %1452 = vmatprep.subr.bf16.mxu0 %v6106_v5  ;;  %v6112_v9 = vld [vmem:[#allocation2 + $0x20] ss:$16 sps:$4 sm:$0xff]   ;;  %v6117_v12 = vld [vmem:[#allocation2 + $0x2c] ss:$16 sps:$4 sm:$0xff]  }
  0x2b   :  { %1742 = vmatprep.subr.bf16.mxu1 %v6111_v8  ;;  %v6113_v10 = vld [vmem:[#allocation2 + $0x44] ss:$16 sps:$4 sm:$0xff]   ;;  %v6115_v11 = vld [vmem:[#allocation2 + $0x28] ss:$16 sps:$4 sm:$0xff]   ;;  %v6118_v13 = vld [vmem:[#allocation2 + $0x40] ss:$16 sps:$4 sm:$0xff]  }
  0x2c   :  { %v6119_v14 = vld [vmem:[#allocation2 + $0x64] ss:$16 sps:$4 sm:$0xff]   ;;  %v6121_v15 = vld [vmem:[#allocation2 + $0x48] ss:$16 sps:$4 sm:$0xff]   ;;  %v6123_v16 = vld [vmem:[#allocation2 + $0x4c] ss:$16 sps:$4 sm:$0xff]  }
  0x2d   :  { %5351 = vmatmul.mubr.msk.bf16.vlgmr.msra.gmra.mrb[0].mxu1 %vm1437_vm0, %v6108_v6  ;;  %1453 = vmatpush1.bf16.msra.mxu0 %v6112_v9  ;;  %v6124_v17 = vld [vmem:[#allocation2 + $0x60] ss:$16 sps:$4 sm:$0xff]   ;;  %v6125_v18 = vld [vmem:[#allocation2 + $0x84] ss:$16 sps:$4 sm:$0xff]   ;;  %v6129_v19 = vld [vmem:[#allocation2 + $0x6c] ss:$16 sps:$4 sm:$0xff]  }
  0x2e   :  { %1743 = vmatpush1.bf16.msra.mxu1 %v6109_v7  ;;  %1454 = vmatprep.subr.bf16.mxu0 %v6113_v10  ;;  %v6127_v20 = vld [vmem:[#allocation2 + $0x68] ss:$16 sps:$4 sm:$0xff]   ;;  %v6130_v21 = vld [vmem:[#allocation2 + $0x80] ss:$16 sps:$4 sm:$0xff]   ;;  %v6131_v22 = vld [vmem:[#allocation2 + $0xa4] ss:$16 sps:$4 sm:$0xff]  }
  0x2f   :  { %1711 = vmatprep.mubr.bf16.mxu1 %v6964_v0  ;;  %1744 = vmatprep.subr.bf16.mxu1 %v6117_v12  ;;  %v6135_v23 = vld [vmem:[#allocation2 + $0x8c] ss:$16 sps:$4 sm:$0xff]   ;;  %v6133_v24 = vld [vmem:[#allocation2 + $0x88] ss:$16 sps:$4 sm:$0xff]   ;;  %v6136_v25 = vld [vmem:[#allocation2 + $0xa0] ss:$16 sps:$4 sm:$0xff]  }
  0x30   :  { %v6137_v26 = vld [vmem:[#allocation2 + $0xc4] ss:$16 sps:$4 sm:$0xff]   ;;  %v6141_v27 = vld [vmem:[#allocation2 + $0xac] ss:$16 sps:$4 sm:$0xff]   ;;  %v6139_v28 = vld [vmem:[#allocation2 + $0xa8] ss:$16 sps:$4 sm:$0xff]  }
  0x31   :  { %1455 = vmatpush1.bf16.msra.mxu0 %v6118_v13  ;;  %v6142_v29 = vld [vmem:[#allocation2 + $0xc0] ss:$16 sps:$4 sm:$0xff]   ;;  %v6143_v30 = vld [vmem:[#allocation2 + $0xe4] ss:$16 sps:$4 sm:$0xff]   ;;  %v6147_v31 = vld [vmem:[#allocation2 + $0xcc] ss:$16 sps:$4 sm:$0xff]  }
  0x32   :  { %1745 = vmatpush1.bf16.msra.mxu1 %v6115_v11  ;;  %1456 = vmatprep.subr.bf16.mxu0 %v6119_v14  ;;  %v6145_v32 = vld [vmem:[#allocation2 + $0xc8] ss:$16 sps:$4 sm:$0xff]   ;;  %v6148_v33 = vld [vmem:[#allocation2 + $0xe0] ss:$16 sps:$4 sm:$0xff]   ;;  %v6149_v34 = vld [vmem:[#allocation2 + $0x104] ss:$16 sps:$4 sm:$0xff]  }
  0x33   :  { %1746 = vmatprep.subr.bf16.mxu1 %v6123_v16  ;;  %v6153_v35 = vld [vmem:[#allocation2 + $0xec] ss:$16 sps:$4 sm:$0xff]   ;;  %v6151_v36 = vld [vmem:[#allocation2 + $0xe8] ss:$16 sps:$4 sm:$0xff]   ;;  %v6154_v38 = vld [vmem:[#allocation2 + $0x100] ss:$16 sps:$4 sm:$0xff]  }
  0x34   :  { %v6167_v37 = vld [vmem:[%s7875_s0 + $0x50] ss:$28 sps:$4 sm:$0xff]   ;;  %v6155_v39 = vld [vmem:[#allocation2 + $0x124] ss:$16 sps:$4 sm:$0xff]   ;;  %v6157_v41 = vld [vmem:[#allocation2 + $0x108] ss:$16 sps:$4 sm:$0xff]  }
  0x35   :  { %1457 = vmatpush1.bf16.msra.mxu0 %v6124_v17  ;;  %v6159_v40 = vld [vmem:[#allocation2 + $0x10c] ss:$16 sps:$4 sm:$0xff]   ;;  %5352 = vmatmul.mubr.msk.bf16.gmra.mrb[4].mxu1 %vm1437_vm0, %v6167_v37  ;;  %v6160_v42 = vld [vmem:[#allocation2 + $0x120] ss:$16 sps:$4 sm:$0xff]   ;;  %v6161_v43 = vld [vmem:[#allocation2 + $0x144] ss:$16 sps:$4 sm:$0xff]  }
  0x36   :  { %1747 = vmatpush1.bf16.msra.mxu1 %v6121_v15  ;;  %1458 = vmatprep.subr.bf16.mxu0 %v6125_v18  ;;  %v6165_v44 = vld [vmem:[#allocation2 + $0x12c] ss:$16 sps:$4 sm:$0xff]   ;;  %v6180_v45 = vld [vmem:[%s7875_s0 + $0x88] ss:$28 sps:$4 sm:$0xff]   ;;  %v6166_v47 = vld [vmem:[#allocation2 + $0x140] ss:$16 sps:$4 sm:$0xff]  }
  0x37   :  { %1748 = vmatprep.subr.bf16.mxu1 %v6129_v19  ;;  %1721 = vmatprep.mubr.bf16.mxu1 %v6964_v0  ;;  %v6163_v46 = vld [vmem:[#allocation2 + $0x128] ss:$16 sps:$4 sm:$0xff]   ;;  %v6168_v48 = vld [vmem:[#allocation2 + $0x164] ss:$16 sps:$4 sm:$0xff]   ;;  %v6172_v49 = vld [vmem:[#allocation2 + $0x14c] ss:$16 sps:$4 sm:$0xff]  }
  0x38   :  { %v6170_v50 = vld [vmem:[#allocation2 + $0x148] ss:$16 sps:$4 sm:$0xff]   ;;  %v6173_v51 = vld [vmem:[#allocation2 + $0x160] ss:$16 sps:$4 sm:$0xff]   ;;  %v6174_v52 = vld [vmem:[#allocation2 + $0x184] ss:$16 sps:$4 sm:$0xff]  }
  0x39   :  { %1459 = vmatpush1.bf16.msra.mxu0 %v6130_v21  ;;  %v6178_v53 = vld [vmem:[#allocation2 + $0x16c] ss:$16 sps:$4 sm:$0xff]   ;;  %v6176_v54 = vld [vmem:[#allocation2 + $0x168] ss:$16 sps:$4 sm:$0xff]   ;;  %v6179_v56 = vld [vmem:[#allocation2 + $0x180] ss:$16 sps:$4 sm:$0xff]  }
  0x3a   :  { %1749 = vmatpush1.bf16.msra.mxu1 %v6127_v20  ;;  %1460 = vmatprep.subr.bf16.mxu0 %v6131_v22  ;;  %v6193_v55 = vld [vmem:[%s7875_s0 + $0xc0] ss:$28 sps:$4 sm:$0xff]   ;;  %v6181_v58 = vld [vmem:[#allocation2 + $0x1a4] ss:$16 sps:$4 sm:$0xff]   ;;  %v6183_v60 = vld [vmem:[#allocation2 + $0x188] ss:$16 sps:$4 sm:$0xff]  }
  0x3b   :  { %1750 = vmatprep.subr.bf16.mxu1 %v6135_v23  ;;  %v6202_v57 = vld [vmem:[%s7875_s0 + $0x4] ss:$28 sps:$4 sm:$0xff]   ;;  %v6185_v59 = vld [vmem:[#allocation2 + $0x18c] ss:$16 sps:$4 sm:$0xff]   ;;  %v6189_v1 = vld [vmem:[#allocation2 + $0x1a8] ss:$16 sps:$4 sm:$0xff]  }
  0x3c   :  { %1482 = vmatprep.mubr.bf16.mxu0 %v6202_v57  ;;  %v6186_v61 = vld [vmem:[#allocation2 + $0x1a0] ss:$16 sps:$4 sm:$0xff]   ;;  %v6187_v62 = vld [vmem:[#allocation2 + $0x1c4] ss:$16 sps:$4 sm:$0xff]   ;;  %v6191_v63 = vld [vmem:[#allocation2 + $0x1ac] ss:$16 sps:$4 sm:$0xff]  }
  0x3d   :  { %1461 = vmatpush1.bf16.msra.mxu0 %v6136_v25  ;;  %5353 = vmatmul.mubr.msk.bf16.gmra.mrb[8].mxu1 %vm1437_vm0, %v6180_v45  ;;  %v6192_v2 = vld [vmem:[#allocation2 + $0x1c0] ss:$16 sps:$4 sm:$0xff]   ;;  %v6194_v3 = vld [vmem:[#allocation2 + $0x1e4] ss:$16 sps:$4 sm:$0xff]   ;;  %v6198_v4 = vld [vmem:[#allocation2 + $0x1cc] ss:$16 sps:$4 sm:$0xff]  }
  0x3e   :  { %1751 = vmatpush1.bf16.msra.mxu1 %v6133_v24  ;;  %1462 = vmatprep.subr.bf16.mxu0 %v6137_v26  ;;  %v6196_v5 = vld [vmem:[#allocation2 + $0x1c8] ss:$16 sps:$4 sm:$0xff]   ;;  %v6199_v6 = vld [vmem:[#allocation2 + $0x1e0] ss:$16 sps:$4 sm:$0xff]   ;;  %v6205_v7 = vld [vmem:[#allocation2 + $0x204] ss:$16 sps:$4 sm:$0xff]  }
  0x3f   :  { %1752 = vmatprep.subr.bf16.mxu1 %v6141_v27  ;;  %1731 = vmatprep.mubr.bf16.mxu1 %v6964_v0  ;;  %v6208_v8 = vld [vmem:[#allocation2 + $0x1ec] ss:$16 sps:$4 sm:$0xff]   ;;  %v6203_v10 = vld [vmem:[#allocation2 + $0x200] ss:$16 sps:$4 sm:$0xff]   ;;  %v6206_v11 = vld [vmem:[#allocation2 + $0x1e8] ss:$16 sps:$4 sm:$0xff]  }
  0x40   :  { %v6200_v9 = vld [vmem:[%s7875_s0] ss:$28 sps:$4 sm:$0xff]   ;;  %v6211_v12 = vld [vmem:[#allocation2 + $0x224] ss:$16 sps:$4 sm:$0xff]   ;;  %v6212_v15 = vld [vmem:[#allocation2 + $0x208] ss:$16 sps:$4 sm:$0xff]  }
  0x41   :  { %1463 = vmatpush1.bf16.msra.mxu0 %v6142_v29  ;;  %v6214_v13 = vld [vmem:[#allocation2 + $0x20c] ss:$16 sps:$4 sm:$0xff]   ;;  %v6209_v14 = vld [vmem:[#allocation2 + $0x220] ss:$16 sps:$4 sm:$0xff]   ;;  %v6217_v16 = vld [vmem:[#allocation2 + $0x244] ss:$16 sps:$4 sm:$0xff]  }
  0x42   :  { %1753 = vmatpush1.bf16.msra.mxu1 %v6139_v28  ;;  %1464 = vmatprep.subr.bf16.mxu0 %v6143_v30  ;;  %v6220_v17 = vld [vmem:[#allocation2 + $0x22c] ss:$16 sps:$4 sm:$0xff]   ;;  %v6215_v18 = vld [vmem:[#allocation2 + $0x240] ss:$16 sps:$4 sm:$0xff]   ;;  %v6218_v19 = vld [vmem:[#allocation2 + $0x228] ss:$16 sps:$4 sm:$0xff]  }
  0x43   :  { %1754 = vmatprep.subr.bf16.mxu1 %v6147_v31  ;;  %v6223_v20 = vld [vmem:[#allocation2 + $0x264] ss:$16 sps:$4 sm:$0xff]   ;;  %v6226_v21 = vld [vmem:[#allocation2 + $0x24c] ss:$16 sps:$4 sm:$0xff]   ;;  %v6221_v22 = vld [vmem:[#allocation2 + $0x260] ss:$16 sps:$4 sm:$0xff]  }
  0x44   :  { %v6263_v23 = vld [vmem:[%s7875_s0 + $0x3c] ss:$28 sps:$4 sm:$0xff]   ;;  %v6229_v25 = vld [vmem:[#allocation2 + $0x284] ss:$16 sps:$4 sm:$0xff]   ;;  %v6227_v28 = vld [vmem:[#allocation2 + $0x280] ss:$16 sps:$4 sm:$0xff]  }
  0x45   :  { %1465 = vmatpush1.bf16.msra.mxu0 %v6148_v33  ;;  %5354 = vmatmul.mubr.msk.bf16.gmra.mrb[12].mxu1 %vm1437_vm0, %v6193_v55  ;;  %v6224_v24 = vld [vmem:[#allocation2 + $0x248] ss:$16 sps:$4 sm:$0xff]   ;;  %v6232_v26 = vld [vmem:[#allocation2 + $0x26c] ss:$16 sps:$4 sm:$0xff]   ;;  %v6235_v30 = vld [vmem:[#allocation2 + $0x2a4] ss:$16 sps:$4 sm:$0xff]  }
  0x46   :  { %1755 = vmatpush1.bf16.msra.mxu1 %v6145_v32  ;;  %1466 = vmatprep.subr.bf16.mxu0 %v6149_v34  ;;  %v6271_v27 = vld [vmem:[%s7875_s0 + $0x38] ss:$28 sps:$4 sm:$0xff]   ;;  %v6238_v31 = vld [vmem:[#allocation2 + $0x28c] ss:$16 sps:$4 sm:$0xff]   ;;  %v6233_v33 = vld [vmem:[#allocation2 + $0x2a0] ss:$16 sps:$4 sm:$0xff]  }
  0x47   :  { %1756 = vmatprep.subr.bf16.mxu1 %v6153_v35  ;;  %1774 = vmatprep.mubr.bf16.mxu1 %v6202_v57  ;;  %v6230_v29 = vld [vmem:[#allocation2 + $0x268] ss:$16 sps:$4 sm:$0xff]   ;;  %v6278_v32 = vld [vmem:[%s7875_s0 + $0x74] ss:$28 sps:$4 sm:$0xff]   ;;  %vm2347_vm1 = vcmask 261120  }
  0x48   :  { %v6236_v34 = vld [vmem:[#allocation2 + $0x288] ss:$16 sps:$4 sm:$0xff]   ;;  %v6241_v35 = vld [vmem:[#allocation2 + $0x2c4] ss:$16 sps:$4 sm:$0xff]   ;;  %v6239_v37 = vld [vmem:[#allocation2 + $0x2c0] ss:$16 sps:$4 sm:$0xff]  }
  0x49   :  { %1467 = vmatpush1.bf16.msra.mxu0 %v6154_v38  ;;  %v6286_v38 = vld [vmem:[%s7875_s0 + $0x70] ss:$28 sps:$4 sm:$0xff]   ;;  %v6253_v45 = vld [vmem:[#allocation2 + $0x304] ss:$16 sps:$4 sm:$0xff]  }
  0x4a   :  { %1757 = vmatpush1.bf16.msra.mxu1 %v6151_v36  ;;  %1468 = vmatprep.subr.bf16.mxu0 %v6155_v39  ;;  %v6244_v36 = vld [vmem:[#allocation2 + $0x2ac] ss:$16 sps:$4 sm:$0xff]   ;;  %v6242_v39 = vld [vmem:[#allocation2 + $0x2a8] ss:$16 sps:$4 sm:$0xff]   ;;  %v6267_v55 = vld [vmem:[#allocation2 + $0x344] ss:$16 sps:$4 sm:$0xff]  }
  0x4b   :  { %1758 = vmatprep.subr.bf16.mxu1 %v6159_v40  ;;  %v6247_v40 = vld [vmem:[#allocation2 + $0x2e4] ss:$16 sps:$4 sm:$0xff]   ;;  %v6265_v57 = vld [vmem:[#allocation2 + $0x340] ss:$16 sps:$4 sm:$0xff]  }
  0x4d   :  { %1469 = vmatpush1.bf16.msra.mxu0 %v6160_v42  ;;  %v6250_v42 = vld [vmem:[#allocation2 + $0x2cc] ss:$16 sps:$4 sm:$0xff]  }
  0x4e   :  { %1759 = vmatpush1.bf16.msra.mxu1 %v6157_v41  ;;  %1470 = vmatprep.subr.bf16.mxu0 %v6161_v43  ;;  %v6293_v41 = vld [vmem:[%s7875_s0 + $0xac] ss:$28 sps:$4 sm:$0xff]   ;;  %v6245_v43 = vld [vmem:[#allocation2 + $0x2e0] ss:$16 sps:$4 sm:$0xff]  }
  0x4f   :  { %1760 = vmatprep.subr.bf16.mxu1 %v6165_v44  ;;  %v6248_v44 = vld [vmem:[#allocation2 + $0x2c8] ss:$16 sps:$4 sm:$0xff]  }
  0x51   :  { %1471 = vmatpush1.bf16.msra.mxu0 %v6166_v47  ;;  %v6251_v47 = vld [vmem:[#allocation2 + $0x300] ss:$16 sps:$4 sm:$0xff]  }
  0x52   :  { %1761 = vmatpush1.bf16.msra.mxu1 %v6163_v46  ;;  %1472 = vmatprep.subr.bf16.mxu0 %v6168_v48  ;;  %v6256_v46 = vld [vmem:[#allocation2 + $0x2ec] ss:$16 sps:$4 sm:$0xff]   ;;  %v6301_v48 = vld [vmem:[%s7875_s0 + $0xa8] ss:$28 sps:$4 sm:$0xff]  }
  0x53   :  { %1762 = vmatprep.subr.bf16.mxu1 %v6172_v49  ;;  %v6254_v49 = vld [vmem:[#allocation2 + $0x2e8] ss:$16 sps:$4 sm:$0xff]  }
  0x55   :  { %1473 = vmatpush1.bf16.msra.mxu0 %v6173_v51  ;;  %v6259_v51 = vld [vmem:[#allocation2 + $0x324] ss:$16 sps:$4 sm:$0xff]  }
  0x56   :  { %1763 = vmatpush1.bf16.msra.mxu1 %v6170_v50  ;;  %1474 = vmatprep.subr.bf16.mxu0 %v6174_v52  ;;  %v6310_v50 = vld [vmem:[%s7875_s0 + $0xc] ss:$28 sps:$4 sm:$0xff]  }
  0x57   :  { %1764 = vmatprep.subr.bf16.mxu1 %v6178_v53  ;;  %v6262_v52 = vld [vmem:[#allocation2 + $0x30c] ss:$16 sps:$4 sm:$0xff]   ;;  %v6257_v53 = vld [vmem:[#allocation2 + $0x320] ss:$16 sps:$4 sm:$0xff]  }
  0x59   :  { %1475 = vmatpush1.bf16.msra.mxu0 %v6179_v56  ;;  %v6270_v56 = vld [vmem:[#allocation2 + $0x32c] ss:$16 sps:$4 sm:$0xff]  }
  0x5a   :  { %1765 = vmatpush1.bf16.msra.mxu1 %v6176_v54  ;;  %1476 = vmatprep.subr.bf16.mxu0 %v6181_v58  ;;  %v6260_v54 = vld [vmem:[#allocation2 + $0x308] ss:$16 sps:$4 sm:$0xff]  }
  0x5b   :  { %1766 = vmatprep.subr.bf16.mxu1 %v6185_v59  ;;  %v6268_v58 = vld [vmem:[#allocation2 + $0x328] ss:$16 sps:$4 sm:$0xff]   ;;  %v6274_v59 = vld [vmem:[#allocation2 + $0x364] ss:$16 sps:$4 sm:$0xff]  }
  0x5d   :  { %1477 = vmatpush1.bf16.msra.mxu0 %v6186_v61  ;;  %v6272_v61 = vld [vmem:[#allocation2 + $0x360] ss:$16 sps:$4 sm:$0xff]  }
  0x5e   :  { %1767 = vmatpush1.bf16.msra.mxu1 %v6183_v60  ;;  %1478 = vmatprep.subr.bf16.mxu0 %v6187_v62  ;;  %v6277_v60 = vld [vmem:[#allocation2 + $0x34c] ss:$16 sps:$4 sm:$0xff]   ;;  %v6275_v62 = vld [vmem:[#allocation2 + $0x348] ss:$16 sps:$4 sm:$0xff]  }
  0x5f   :  { %1768 = vmatprep.subr.bf16.mxu1 %v6191_v63  ;;  %v6282_v63 = vld [vmem:[#allocation2 + $0x384] ss:$16 sps:$4 sm:$0xff]  }
  0x61   :  { %1479 = vmatpush1.bf16.msra.mxu0 %v6192_v2  ;;  %v6280_v2 = vld [vmem:[#allocation2 + $0x380] ss:$16 sps:$4 sm:$0xff]  }
  0x62   :  { %1769 = vmatpush1.bf16.msra.mxu1 %v6189_v1  ;;  %1480 = vmatprep.subr.bf16.mxu0 %v6194_v3  ;;  %v6285_v1 = vld [vmem:[#allocation2 + $0x36c] ss:$16 sps:$4 sm:$0xff]   ;;  %v6283_v3 = vld [vmem:[#allocation2 + $0x368] ss:$16 sps:$4 sm:$0xff]  }
  0x63   :  { %1770 = vmatprep.subr.bf16.mxu1 %v6198_v4  ;;  %v6289_v4 = vld [vmem:[#allocation2 + $0x3a4] ss:$16 sps:$4 sm:$0xff]  }
  0x65   :  { %1481 = vmatpush1.bf16.msra.mxu0 %v6199_v6  ;;  %v6287_v6 = vld [vmem:[#allocation2 + $0x3a0] ss:$16 sps:$4 sm:$0xff]  }
  0x66   :  { %1771 = vmatpush1.bf16.msra.mxu1 %v6196_v5  ;;  %1523 = vmatprep.subr.bf16.mxu0 %v6205_v7  ;;  %v6292_v5 = vld [vmem:[#allocation2 + $0x38c] ss:$16 sps:$4 sm:$0xff]   ;;  %v6290_v7 = vld [vmem:[#allocation2 + $0x388] ss:$16 sps:$4 sm:$0xff]  }
  0x67   :  { %1772 = vmatprep.subr.bf16.mxu1 %v6208_v8  ;;  %v6297_v8 = vld [vmem:[#allocation2 + $0x3c4] ss:$16 sps:$4 sm:$0xff]  }
  0x68   :  { %1483 = vmatmul.mubr.bf16.vlgmr.msra.gmra.mrb[0].mxu0 %v6200_v9 }
  0x69   :  { %1524 = vmatpush1.bf16.msra.mxu0 %v6203_v10  ;;  %1492 = vmatprep.mubr.bf16.mxu0 %v6263_v23  ;;  %v6295_v10 = vld [vmem:[#allocation2 + $0x3c0] ss:$16 sps:$4 sm:$0xff]  }
  0x6a   :  { %1773 = vmatpush1.bf16.msra.mxu1 %v6206_v11  ;;  %1525 = vmatprep.subr.bf16.mxu0 %v6211_v12  ;;  %v6298_v11 = vld [vmem:[#allocation2 + $0x3a8] ss:$16 sps:$4 sm:$0xff]   ;;  %v6304_v12 = vld [vmem:[#allocation2 + $0x3e4] ss:$16 sps:$4 sm:$0xff]  }
  0x6b   :  { %1815 = vmatprep.subr.bf16.mxu1 %v6214_v13  ;;  %v6307_v13 = vld [vmem:[#allocation2 + $0x3cc] ss:$16 sps:$4 sm:$0xff]  }
  0x6d   :  { %1775 = vmatmul.mubr.bf16.vlgmr.msra.gmra.mrb[16].mxu1 %v6200_v9  ;;  %1526 = vmatpush1.bf16.msra.mxu0 %v6209_v14  ;;  %v6300_v9 = vld [vmem:[#allocation2 + $0x3ac] ss:$16 sps:$4 sm:$0xff]   ;;  %v6302_v14 = vld [vmem:[#allocation2 + $0x3e0] ss:$16 sps:$4 sm:$0xff]  }
  0x6e   :  { %1816 = vmatpush1.bf16.msra.mxu1 %v6212_v15  ;;  %1527 = vmatprep.subr.bf16.mxu0 %v6217_v16  ;;  %v6305_v15 = vld [vmem:[#allocation2 + $0x3c8] ss:$16 sps:$4 sm:$0xff]   ;;  %v6313_v16 = vld [vmem:[#allocation2 + $0x404] ss:$16 sps:$4 sm:$0xff]  }
  0x6f   :  { %1817 = vmatprep.subr.bf16.mxu1 %v6220_v17  ;;  %1784 = vmatprep.mubr.bf16.mxu1 %v6263_v23  ;;  %v6316_v17 = vld [vmem:[#allocation2 + $0x3ec] ss:$16 sps:$4 sm:$0xff]   ;;  %v6371_v23 = vld [vmem:[%s7875_s0 + $0x44] ss:$28 sps:$4 sm:$0xff]  }
  0x70   :  { %1493 = vmatmul.mubr.bf16.gmra.mrb[4].mxu0 %v6271_v27 }
  0x71   :  { %1528 = vmatpush1.bf16.msra.mxu0 %v6215_v18  ;;  %1502 = vmatprep.mubr.bf16.mxu0 %v6278_v32  ;;  %v6308_v18 = vld [vmem:[%s7875_s0 + $0x8] ss:$28 sps:$4 sm:$0xff]  }
  0x72   :  { %1818 = vmatpush1.bf16.msra.mxu1 %v6218_v19  ;;  %1529 = vmatprep.subr.bf16.mxu0 %v6223_v20  ;;  %v6311_v19 = vld [vmem:[#allocation2 + $0x400] ss:$16 sps:$4 sm:$0xff]   ;;  %v6314_v20 = vld [vmem:[#allocation2 + $0x3e8] ss:$16 sps:$4 sm:$0xff]  }
  0x73   :  { %1819 = vmatprep.subr.bf16.mxu1 %v6226_v21  ;;  %v6319_v21 = vld [vmem:[#allocation2 + $0x424] ss:$16 sps:$4 sm:$0xff]  }
  0x75   :  { %1530 = vmatpush1.bf16.msra.mxu0 %v6221_v22  ;;  %1785 = vmatmul.mubr.bf16.gmra.mrb[20].mxu1 %v6271_v27  ;;  %v6322_v22 = vld [vmem:[#allocation2 + $0x40c] ss:$16 sps:$4 sm:$0xff]  }
  0x76   :  { %1820 = vmatpush1.bf16.msra.mxu1 %v6224_v24  ;;  %1531 = vmatprep.subr.bf16.mxu0 %v6229_v25  ;;  %v6317_v24 = vld [vmem:[#allocation2 + $0x420] ss:$16 sps:$4 sm:$0xff]   ;;  %v6320_v25 = vld [vmem:[#allocation2 + $0x408] ss:$16 sps:$4 sm:$0xff]   ;;  %v6328_v27 = vld [vmem:[#allocation2 + $0x42c] ss:$16 sps:$4 sm:$0xff]  }
  0x77   :  { %1821 = vmatprep.subr.bf16.mxu1 %v6232_v26  ;;  %1794 = vmatprep.mubr.bf16.mxu1 %v6278_v32  ;;  %v6325_v26 = vld [vmem:[#allocation2 + $0x444] ss:$16 sps:$4 sm:$0xff]   ;;  %v6334_v32 = vld [vmem:[#allocation2 + $0x44c] ss:$16 sps:$4 sm:$0xff]  }
  0x78   :  { %1503 = vmatmul.mubr.bf16.gmra.mrb[8].mxu0 %v6286_v38 }
  0x79   :  { %1532 = vmatpush1.bf16.msra.mxu0 %v6227_v28  ;;  %1512 = vmatprep.mubr.bf16.mxu0 %v6293_v41  ;;  %v6323_v28 = vld [vmem:[#allocation2 + $0x440] ss:$16 sps:$4 sm:$0xff]  }
  0x7a   :  { %1822 = vmatpush1.bf16.msra.mxu1 %v6230_v29  ;;  %1533 = vmatprep.subr.bf16.mxu0 %v6235_v30  ;;  %v6326_v29 = vld [vmem:[#allocation2 + $0x428] ss:$16 sps:$4 sm:$0xff]   ;;  %v6373_v30 = vld [vmem:[%s7875_s0 + $0x40] ss:$28 sps:$4 sm:$0xff]  }
  0x7b   :  { %1823 = vmatprep.subr.bf16.mxu1 %v6238_v31  ;;  %v6331_v31 = vld [vmem:[#allocation2 + $0x464] ss:$16 sps:$4 sm:$0xff]  }
  0x7d   :  { %1534 = vmatpush1.bf16.msra.mxu0 %v6233_v33  ;;  %1795 = vmatmul.mubr.bf16.gmra.mrb[24].mxu1 %v6286_v38  ;;  %v6386_v33 = vld [vmem:[%s7875_s0 + $0x7c] ss:$28 sps:$4 sm:$0xff]   ;;  %v6335_v38 = vld [vmem:[#allocation2 + $0x480] ss:$16 sps:$4 sm:$0xff]  }
  0x7e   :  { %1824 = vmatpush1.bf16.msra.mxu1 %v6236_v34  ;;  %1535 = vmatprep.subr.bf16.mxu0 %v6241_v35  ;;  %v6329_v34 = vld [vmem:[#allocation2 + $0x460] ss:$16 sps:$4 sm:$0xff]   ;;  %v6332_v35 = vld [vmem:[#allocation2 + $0x448] ss:$16 sps:$4 sm:$0xff]  }
  0x7f   :  { %1825 = vmatprep.subr.bf16.mxu1 %v6244_v36  ;;  %1804 = vmatprep.mubr.bf16.mxu1 %v6293_v41  ;;  %v6337_v36 = vld [vmem:[#allocation2 + $0x484] ss:$16 sps:$4 sm:$0xff]  }
  0x80   :  { %1513 = vmatmul.mubr.bf16.gmra.mrb[12].mxu0 %v6301_v48  ;;  %v6343_v41 = vld [vmem:[#allocation2 + $0x4a4] ss:$16 sps:$4 sm:$0xff]  }
  0x81   :  { %1536 = vmatpush1.bf16.msra.mxu0 %v6239_v37  ;;  %1555 = vmatprep.mubr.bf16.mxu0 %v6310_v50  ;;  %v6340_v37 = vld [vmem:[#allocation2 + $0x46c] ss:$16 sps:$4 sm:$0xff]  }
  0x82   :  { %1826 = vmatpush1.bf16.msra.mxu1 %v6242_v39  ;;  %1537 = vmatprep.subr.bf16.mxu0 %v6247_v40  ;;  %v6338_v39 = vld [vmem:[#allocation2 + $0x468] ss:$16 sps:$4 sm:$0xff]  }
  0x83   :  { %1827 = vmatprep.subr.bf16.mxu1 %v6250_v42  ;;  %v6388_v40 = vld [vmem:[%s7875_s0 + $0x78] ss:$28 sps:$4 sm:$0xff]   ;;  %v6346_v42 = vld [vmem:[#allocation2 + $0x48c] ss:$16 sps:$4 sm:$0xff]  }
  0x85   :  { %1538 = vmatpush1.bf16.msra.mxu0 %v6245_v43  ;;  %1805 = vmatmul.mubr.bf16.gmra.mrb[28].mxu1 %v6301_v48  ;;  %v6401_v43 = vld [vmem:[%s7875_s0 + $0xb4] ss:$28 sps:$4 sm:$0xff]  }
  0x86   :  { %1828 = vmatpush1.bf16.msra.mxu1 %v6248_v44  ;;  %1539 = vmatprep.subr.bf16.mxu0 %v6253_v45  ;;  %v6341_v44 = vld [vmem:[#allocation2 + $0x4a0] ss:$16 sps:$4 sm:$0xff]   ;;  %v6344_v45 = vld [vmem:[#allocation2 + $0x488] ss:$16 sps:$4 sm:$0xff]  }
  0x87   :  { %1829 = vmatprep.subr.bf16.mxu1 %v6256_v46  ;;  %1847 = vmatprep.mubr.bf16.mxu1 %v6310_v50  ;;  %v6349_v46 = vld [vmem:[#allocation2 + $0x4c4] ss:$16 sps:$4 sm:$0xff]   ;;  %v6403_v48 = vld [vmem:[%s7875_s0 + $0xb0] ss:$28 sps:$4 sm:$0xff]   ;;  %v6350_v50 = vld [vmem:[#allocation2 + $0x4a8] ss:$16 sps:$4 sm:$0xff]  }
  0x89   :  { %1540 = vmatpush1.bf16.msra.mxu0 %v6251_v47  ;;  %v6352_v47 = vld [vmem:[#allocation2 + $0x4ac] ss:$16 sps:$4 sm:$0xff]  }
  0x8a   :  { %1830 = vmatpush1.bf16.msra.mxu1 %v6254_v49  ;;  %1541 = vmatprep.subr.bf16.mxu0 %v6259_v51  ;;  %v6347_v49 = vld [vmem:[#allocation2 + $0x4c0] ss:$16 sps:$4 sm:$0xff]   ;;  %v6355_v51 = vld [vmem:[#allocation2 + $0x4e4] ss:$16 sps:$4 sm:$0xff]  }
  0x8b   :  { %1831 = vmatprep.subr.bf16.mxu1 %v6262_v52  ;;  %v6358_v52 = vld [vmem:[#allocation2 + $0x4cc] ss:$16 sps:$4 sm:$0xff]  }
  0x8d   :  { %1542 = vmatpush1.bf16.msra.mxu0 %v6257_v53  ;;  %v6418_v53 = vld [vmem:[%s7875_s0 + $0x14] ss:$28 sps:$4 sm:$0xff]  }
  0x8e   :  { %1832 = vmatpush1.bf16.msra.mxu1 %v6260_v54  ;;  %1543 = vmatprep.subr.bf16.mxu0 %v6267_v55  ;;  %v6353_v54 = vld [vmem:[#allocation2 + $0x4e0] ss:$16 sps:$4 sm:$0xff]   ;;  %v6356_v55 = vld [vmem:[#allocation2 + $0x4c8] ss:$16 sps:$4 sm:$0xff]  }
  0x8f   :  { %1833 = vmatprep.subr.bf16.mxu1 %v6270_v56  ;;  %v6361_v56 = vld [vmem:[#allocation2 + $0x504] ss:$16 sps:$4 sm:$0xff]  }
  0x91   :  { %1544 = vmatpush1.bf16.msra.mxu0 %v6265_v57  ;;  %v6364_v57 = vld [vmem:[#allocation2 + $0x4ec] ss:$16 sps:$4 sm:$0xff]  }
  0x92   :  { %1834 = vmatpush1.bf16.msra.mxu1 %v6268_v58  ;;  %1545 = vmatprep.subr.bf16.mxu0 %v6274_v59  ;;  %v6359_v58 = vld [vmem:[#allocation2 + $0x500] ss:$16 sps:$4 sm:$0xff]   ;;  %v6362_v59 = vld [vmem:[#allocation2 + $0x4e8] ss:$16 sps:$4 sm:$0xff]  }
  0x93   :  { %1835 = vmatprep.subr.bf16.mxu1 %v6277_v60  ;;  %v6367_v60 = vld [vmem:[#allocation2 + $0x524] ss:$16 sps:$4 sm:$0xff]  }
  0x95   :  { %1546 = vmatpush1.bf16.msra.mxu0 %v6272_v61  ;;  %v6370_v61 = vld [vmem:[#allocation2 + $0x50c] ss:$16 sps:$4 sm:$0xff]  }
  0x96   :  { %1836 = vmatpush1.bf16.msra.mxu1 %v6275_v62  ;;  %1547 = vmatprep.subr.bf16.mxu0 %v6282_v63  ;;  %v6365_v62 = vld [vmem:[#allocation2 + $0x520] ss:$16 sps:$4 sm:$0xff]   ;;  %v6368_v63 = vld [vmem:[#allocation2 + $0x508] ss:$16 sps:$4 sm:$0xff]  }
  0x97   :  { %1837 = vmatprep.subr.bf16.mxu1 %v6285_v1  ;;  %v6376_v1 = vld [vmem:[#allocation2 + $0x544] ss:$16 sps:$4 sm:$0xff]  }
  0x99   :  { %1548 = vmatpush1.bf16.msra.mxu0 %v6280_v2  ;;  %v6379_v2 = vld [vmem:[#allocation2 + $0x52c] ss:$16 sps:$4 sm:$0xff]  }
  0x9a   :  { %1838 = vmatpush1.bf16.msra.mxu1 %v6283_v3  ;;  %1549 = vmatprep.subr.bf16.mxu0 %v6289_v4  ;;  %v6374_v3 = vld [vmem:[#allocation2 + $0x540] ss:$16 sps:$4 sm:$0xff]   ;;  %v6377_v4 = vld [vmem:[#allocation2 + $0x528] ss:$16 sps:$4 sm:$0xff]  }
  0x9b   :  { %1839 = vmatprep.subr.bf16.mxu1 %v6292_v5  ;;  %v6382_v5 = vld [vmem:[#allocation2 + $0x564] ss:$16 sps:$4 sm:$0xff]  }
  0x9d   :  { %1550 = vmatpush1.bf16.msra.mxu0 %v6287_v6  ;;  %v6385_v6 = vld [vmem:[#allocation2 + $0x54c] ss:$16 sps:$4 sm:$0xff]  }
  0x9e   :  { %1840 = vmatpush1.bf16.msra.mxu1 %v6290_v7  ;;  %1551 = vmatprep.subr.bf16.mxu0 %v6297_v8  ;;  %v6380_v7 = vld [vmem:[#allocation2 + $0x560] ss:$16 sps:$4 sm:$0xff]   ;;  %v6383_v8 = vld [vmem:[#allocation2 + $0x548] ss:$16 sps:$4 sm:$0xff]  }
  0x9f   :  { %1841 = vmatprep.subr.bf16.mxu1 %v6300_v9  ;;  %v6391_v9 = vld [vmem:[#allocation2 + $0x584] ss:$16 sps:$4 sm:$0xff]  }
  0xa1   :  { %1552 = vmatpush1.bf16.msra.mxu0 %v6295_v10  ;;  %v6394_v10 = vld [vmem:[#allocation2 + $0x56c] ss:$16 sps:$4 sm:$0xff]  }
  0xa2   :  { %1842 = vmatpush1.bf16.msra.mxu1 %v6298_v11  ;;  %1553 = vmatprep.subr.bf16.mxu0 %v6304_v12  ;;  %v6389_v11 = vld [vmem:[#allocation2 + $0x580] ss:$16 sps:$4 sm:$0xff]   ;;  %v6392_v12 = vld [vmem:[#allocation2 + $0x568] ss:$16 sps:$4 sm:$0xff]  }
  0xa3   :  { %1843 = vmatprep.subr.bf16.mxu1 %v6307_v13  ;;  %v6397_v13 = vld [vmem:[#allocation2 + $0x5a4] ss:$16 sps:$4 sm:$0xff]  }
  0xa5   :  { %1554 = vmatpush1.bf16.msra.mxu0 %v6302_v14  ;;  %v6400_v14 = vld [vmem:[#allocation2 + $0x58c] ss:$16 sps:$4 sm:$0xff]  }
  0xa6   :  { %1844 = vmatpush1.bf16.msra.mxu1 %v6305_v15  ;;  %1596 = vmatprep.subr.bf16.mxu0 %v6313_v16  ;;  %v6395_v15 = vld [vmem:[#allocation2 + $0x5a0] ss:$16 sps:$4 sm:$0xff]   ;;  %v6398_v16 = vld [vmem:[#allocation2 + $0x588] ss:$16 sps:$4 sm:$0xff]  }
  0xa7   :  { %1845 = vmatprep.subr.bf16.mxu1 %v6316_v17  ;;  %v6406_v17 = vld [vmem:[#allocation2 + $0x5c4] ss:$16 sps:$4 sm:$0xff]  }
  0xa8   :  { %1556 = vmatmul.mubr.bf16.vlgmr.msra.gmra.mrb[0].mxu0 %v6308_v18 }
  0xa9   :  { %1597 = vmatpush1.bf16.msra.mxu0 %v6311_v19  ;;  %1565 = vmatprep.mubr.bf16.mxu0 %v6371_v23  ;;  %v6404_v19 = vld [vmem:[#allocation2 + $0x5c0] ss:$16 sps:$4 sm:$0xff]  }
  0xaa   :  { %1846 = vmatpush1.bf16.msra.mxu1 %v6314_v20  ;;  %1598 = vmatprep.subr.bf16.mxu0 %v6319_v21  ;;  %v6407_v20 = vld [vmem:[#allocation2 + $0x5a8] ss:$16 sps:$4 sm:$0xff]   ;;  %v6412_v21 = vld [vmem:[#allocation2 + $0x5e4] ss:$16 sps:$4 sm:$0xff]  }
  0xab   :  { %1888 = vmatprep.subr.bf16.mxu1 %v6322_v22  ;;  %v6415_v22 = vld [vmem:[#allocation2 + $0x5cc] ss:$16 sps:$4 sm:$0xff]  }
  0xad   :  { %1848 = vmatmul.mubr.bf16.vlgmr.msra.gmra.mrb[16].mxu1 %v6308_v18  ;;  %1599 = vmatpush1.bf16.msra.mxu0 %v6317_v24  ;;  %v6409_v18 = vld [vmem:[#allocation2 + $0x5ac] ss:$16 sps:$4 sm:$0xff]  }
  0xae   :  { %1889 = vmatpush1.bf16.msra.mxu1 %v6320_v25  ;;  %1600 = vmatprep.subr.bf16.mxu0 %v6325_v26  ;;  %v2083_v24 = vld [vmem:[%s7878_s3 + $0x88] sm:$0xff]  ;;  %v6410_v25 = vld [vmem:[#allocation2 + $0x5e0] ss:$16 sps:$4 sm:$0xff]  }
  0xaf   :  { %1890 = vmatprep.subr.bf16.mxu1 %v6328_v27  ;;  %1857 = vmatprep.mubr.bf16.mxu1 %v6371_v23  ;;  %v2082_v23 = vld [vmem:[%s7878_s3 + $0x80] sm:$0xff]  ;;  %v6413_v26 = vld [vmem:[#allocation2 + $0x5c8] ss:$16 sps:$4 sm:$0xff]   ;;  %v6421_v27 = vld [vmem:[#allocation2 + $0x5ec] ss:$16 sps:$4 sm:$0xff]  }
  0xb0   :  { %1566 = vmatmul.mubr.bf16.gmra.mrb[4].mxu0 %v6373_v30 }
  0xb1   :  { %1601 = vmatpush1.bf16.msra.mxu0 %v6323_v28  ;;  %1575 = vmatprep.mubr.bf16.mxu0 %v6386_v33  ;;  %v2066_v28 = vld [vmem:[%s7878_s3] sm:$0xff] }
  0xb2   :  { %1891 = vmatpush1.bf16.msra.mxu1 %v6326_v29  ;;  %1602 = vmatprep.subr.bf16.mxu0 %v6331_v31  ;;  %v2067_v29 = vld [vmem:[%s7878_s3 + $0x8] sm:$0xff]  ;;  %v5792_v31 = vpack.c.bf16 %v2083_v24, %v2082_v23 }
  0xb3   :  { %1892 = vmatprep.subr.bf16.mxu1 %v6334_v32  ;;  %v2084_v32 = vld [vmem:[%s7878_s3 + $0x90] sm:$0xff] }
  0xb5   :  { %1858 = vmatmul.mubr.bf16.gmra.mrb[20].mxu1 %v6373_v30  ;;  %1603 = vmatpush1.bf16.msra.mxu0 %v6329_v34  ;;  %v6416_v30 = vld [vmem:[%s7875_s0 + $0x10] ss:$28 sps:$4 sm:$0xff]   ;;  %v6419_v34 = vld [vmem:[#allocation2 + $0x5e8] ss:$16 sps:$4 sm:$0xff]  }
  0xb6   :  { %1893 = vmatpush1.bf16.msra.mxu1 %v6332_v35  ;;  %1604 = vmatprep.subr.bf16.mxu0 %v6337_v36  ;;  %v6425_v35 = vld [vmem:[%s7875_s0 + $0x4c] ss:$28 sps:$4 sm:$0xff]  }
  0xb7   :  { %1894 = vmatprep.subr.bf16.mxu1 %v6340_v37  ;;  %1867 = vmatprep.mubr.bf16.mxu1 %v6386_v33  ;;  %v2085_v33 = vld [vmem:[%s7878_s3 + $0x98] sm:$0xff]  ;;  %v2068_v37 = vld [vmem:[%s7878_s3 + $0x10] sm:$0xff] }
  0xb8   :  { %1576 = vmatmul.mubr.bf16.gmra.mrb[8].mxu0 %v6388_v40  ;;  %v6424_v36 = vld [vmem:[#allocation2 + $0x60c] ss:$16 sps:$4 sm:$0xff]  }
  0xb9   :  { %1605 = vmatpush1.bf16.msra.mxu0 %v6335_v38  ;;  %1585 = vmatprep.mubr.bf16.mxu0 %v6401_v43  ;;  %v2069_v38 = vld [vmem:[%s7878_s3 + $0x18] sm:$0xff] }
  0xba   :  { %1895 = vmatpush1.bf16.msra.mxu1 %v6338_v39  ;;  %1606 = vmatprep.subr.bf16.mxu0 %v6343_v41  ;;  %v5794_v39 = vpack.c.bf16 %v2067_v29, %v2066_v28  ;;  %v2087_v41 = vld [vmem:[%s7878_s3 + $0xa8] sm:$0xff]  ;;  %v2094_v28 = vld [vmem:[%s7878_s3 + $0xe0] sm:$0xff] }
  0xbb   :  { %1896 = vmatprep.subr.bf16.mxu1 %v6346_v42  ;;  %v6422_v42 = vld [vmem:[#allocation2 + $0x608] ss:$16 sps:$4 sm:$0xff]  }
  0xbc   :  { %v2095_v29 = vld [vmem:[%s7878_s3 + $0xe8] sm:$0xff] }
  0xbd   :  { %1868 = vmatmul.mubr.bf16.gmra.mrb[24].mxu1 %v6388_v40  ;;  %1607 = vmatpush1.bf16.msra.mxu0 %v6341_v44  ;;  %v2086_v40 = vld [vmem:[%s7878_s3 + $0xa0] sm:$0xff] }
  0xbe   :  { %1897 = vmatpush1.bf16.msra.mxu1 %v6344_v45  ;;  %1608 = vmatprep.subr.bf16.mxu0 %v6349_v46  ;;  %v2070_v44 = vld [vmem:[%s7878_s3 + $0x20] sm:$0xff]  ;;  %v2071_v45 = vld [vmem:[%s7878_s3 + $0x28] sm:$0xff] }
  0xbf   :  { %1898 = vmatprep.subr.bf16.mxu1 %v6352_v47  ;;  %1877 = vmatprep.mubr.bf16.mxu1 %v6401_v43  ;;  %v5796_v43 = vpack.c.bf16 %v2085_v33, %v2084_v32  ;;  %v6427_v46 = vld [vmem:[%s7875_s0 + $0x48] ss:$28 sps:$4 sm:$0xff]   ;;  %v5798_v47 = vpack.c.bf16 %v2069_v38, %v2068_v37  ;;  %v2080_v37 = vld [vmem:[%s7878_s3 + $0x70] sm:$0xff]  ;;  %v2081_v38 = vld [vmem:[%s7878_s3 + $0x78] sm:$0xff] }
  0xc0   :  { %1586 = vmatmul.mubr.bf16.gmra.mrb[12].mxu0 %v6403_v48  ;;  %v2079_v32 = vld [vmem:[%s7878_s3 + $0x68] sm:$0xff] }
  0xc1   :  { %1609 = vmatpush1.bf16.msra.mxu0 %v6347_v49  ;;  %1628 = vmatprep.mubr.bf16.mxu0 %v6418_v53  ;;  %v2089_v49 = vld [vmem:[%s7878_s3 + $0xb8] sm:$0xff] }
  0xc2   :  { %1899 = vmatpush1.bf16.msra.mxu1 %v6350_v50  ;;  %1610 = vmatprep.subr.bf16.mxu0 %v6355_v51  ;;  %v6428_v50 = vld [vmem:[%s7875_s0 + $0x84] ss:$28 sps:$4 sm:$0xff]   ;;  %v5800_v51 = vpack.c.bf16 %v2087_v41, %v2086_v40  ;;  %v2115_v41 = vld [vmem:[%s7878_s3 + $0x188] sm:$0xff] }
  0xc3   :  { %1900 = vmatprep.subr.bf16.mxu1 %v6358_v52  ;;  %v2072_v52 = vld [vmem:[%s7878_s3 + $0x30] sm:$0xff]  ;;  %v2114_v40 = vld [vmem:[%s7878_s3 + $0x180] sm:$0xff] }
  0xc5   :  { %1878 = vmatmul.mubr.bf16.gmra.mrb[28].mxu1 %v6403_v48  ;;  %1611 = vmatpush1.bf16.msra.mxu0 %v6353_v54  ;;  %v2088_v48 = vld [vmem:[%s7878_s3 + $0xb0] sm:$0xff]  ;;  %v5802_v54 = vpack.c.bf16 %v2071_v45, %v2070_v44  ;;  %v2099_v44 = vld [vmem:[%s7878_s3 + $0x108] sm:$0xff] }
  0xc6   :  { %1901 = vmatpush1.bf16.msra.mxu1 %v6356_v55  ;;  %1612 = vmatprep.subr.bf16.mxu0 %v6361_v56  ;;  %v2090_v55 = vld [vmem:[%s7878_s3 + $0xc0] sm:$0xff]  ;;  %v2091_v56 = vld [vmem:[%s7878_s3 + $0xc8] sm:$0xff] }
  0xc7   :  { %1902 = vmatprep.subr.bf16.mxu1 %v6364_v57  ;;  %1920 = vmatprep.mubr.bf16.mxu1 %v6418_v53  ;;  %v2073_v53 = vld [vmem:[%s7878_s3 + $0x38] sm:$0xff]  ;;  %v5804_v57 = vpack.c.bf16 %v2089_v49, %v2088_v48  ;;  %v2100_v49 = vld [vmem:[%s7878_s3 + $0x110] sm:$0xff] }
  0xc9   :  { %1613 = vmatpush1.bf16.msra.mxu0 %v6359_v58  ;;  %v2074_v58 = vld [vmem:[%s7878_s3 + $0x40] sm:$0xff] }
  0xca   :  { %1903 = vmatpush1.bf16.msra.mxu1 %v6362_v59  ;;  %1614 = vmatprep.subr.bf16.mxu0 %v6367_v60  ;;  %v2075_v59 = vld [vmem:[%s7878_s3 + $0x48] sm:$0xff]  ;;  %v6430_v60 = vld [vmem:[%s7875_s0 + $0x80] ss:$28 sps:$4 sm:$0xff]  }
  0xcb   :  { %1904 = vmatprep.subr.bf16.mxu1 %v6370_v61  ;;  %v5806_v61 = vpack.c.bf16 %v2073_v53, %v2072_v52  ;;  %v2118_v52 = vld [vmem:[%s7878_s3 + $0x1a0] sm:$0xff]  ;;  %v2119_v53 = vld [vmem:[%s7878_s3 + $0x1a8] sm:$0xff] }
  0xcd   :  { %1615 = vmatpush1.bf16.msra.mxu0 %v6365_v62  ;;  %v2092_v62 = vld [vmem:[%s7878_s3 + $0xd0] sm:$0xff] }
  0xce   :  { %1905 = vmatpush1.bf16.msra.mxu1 %v6368_v63  ;;  %1616 = vmatprep.subr.bf16.mxu0 %v6376_v1  ;;  %v2093_v63 = vld [vmem:[%s7878_s3 + $0xd8] sm:$0xff] }
  0xcf   :  { %1906 = vmatprep.subr.bf16.mxu1 %v6379_v2  ;;  %v6431_v1 = vld [vmem:[%s7875_s0 + $0xbc] ss:$28 sps:$4 sm:$0xff]   ;;  %v5808_v2 = vpack.c.bf16 %v2091_v56, %v2090_v55  ;;  %v2102_v55 = vld [vmem:[%s7878_s3 + $0x120] sm:$0xff]  ;;  %v2103_v56 = vld [vmem:[%s7878_s3 + $0x128] sm:$0xff] }
  0xd1   :  { %1617 = vmatpush1.bf16.msra.mxu0 %v6374_v3  ;;  %v2076_v3 = vld [vmem:[%s7878_s3 + $0x50] sm:$0xff] }
  0xd2   :  { %1907 = vmatpush1.bf16.msra.mxu1 %v6377_v4  ;;  %1618 = vmatprep.subr.bf16.mxu0 %v6382_v5  ;;  %v2077_v4 = vld [vmem:[%s7878_s3 + $0x58] sm:$0xff]  ;;  %v5810_v5 = vpack.c.bf16 %v2075_v59, %v2074_v58  ;;  %v2120_v58 = vld [vmem:[%s7878_s3 + $0x1b0] sm:$0xff] }
  0xd3   :  { %1908 = vmatprep.subr.bf16.mxu1 %v6385_v6  ;;  %v5812_v6 = vpack.c.bf16 %v2093_v63, %v2092_v62  ;;  %v2121_v59 = vld [vmem:[%s7878_s3 + $0x1b8] sm:$0xff] }
  0xd4   :  { %v2105_v62 = vld [vmem:[%s7878_s3 + $0x138] sm:$0xff] }
  0xd5   :  { %1619 = vmatpush1.bf16.msra.mxu0 %v6380_v7  ;;  %v6433_v7 = vld [vmem:[%s7875_s0 + $0xb8] ss:$28 sps:$4 sm:$0xff]  }
  0xd6   :  { %1909 = vmatpush1.bf16.msra.mxu1 %v6383_v8  ;;  %1620 = vmatprep.subr.bf16.mxu0 %v6391_v9  ;;  %v5814_v8 = vpack.c.bf16 %v2077_v4, %v2076_v3  ;;  %v2106_v4 = vld [vmem:[%s7878_s3 + $0x140] sm:$0xff] }
  0xd7   :  { %1910 = vmatprep.subr.bf16.mxu1 %v6394_v10 }
  0xd9   :  { %1621 = vmatpush1.bf16.msra.mxu0 %v6389_v11 }
  0xda   :  { %1911 = vmatpush1.bf16.msra.mxu1 %v6392_v12  ;;  %1622 = vmatprep.subr.bf16.mxu0 %v6397_v13  ;;  %v6882_v13 = vld [vmem:[%s7875_s0 + $0x18] ss:$28 sps:$4 sm:$0xff]  }
  0xdb   :  { %1912 = vmatprep.subr.bf16.mxu1 %v6400_v14  ;;  %v6883_v14 = vld [vmem:[%s7875_s0 + $0x50] ss:$28 sps:$4 sm:$0xff]  }
  0xdd   :  { %1623 = vmatpush1.bf16.msra.mxu0 %v6395_v15 }
  0xde   :  { %1913 = vmatpush1.bf16.msra.mxu1 %v6398_v16  ;;  %1624 = vmatprep.subr.bf16.mxu0 %v6406_v17  ;;  %v6884_v17 = vld [vmem:[%s7875_s0 + $0x88] ss:$28 sps:$4 sm:$0xff]  }
  0xdf   :  { %1914 = vmatprep.subr.bf16.mxu1 %v6409_v18 }
  0xe1   :  { %1625 = vmatpush1.bf16.msra.mxu0 %v6404_v19 }
  0xe2   :  { %1915 = vmatpush1.bf16.msra.mxu1 %v6407_v20  ;;  %1626 = vmatprep.subr.bf16.mxu0 %v6412_v21 }
  0xe3   :  { %1916 = vmatprep.subr.bf16.mxu1 %v6415_v22  ;;  %v6885_v22 = vld [vmem:[%s7875_s0 + $0xc0] ss:$28 sps:$4 sm:$0xff]  }
  0xe5   :  { %1627 = vmatpush1.bf16.msra.mxu0 %v6410_v25 }
  0xe6   :  { %1917 = vmatpush1.bf16.msra.mxu1 %v6413_v26  ;;  %5793 = vmatprep.subr.bf16.mxu0 %v5792_v31  ;;  %v2078_v31 = vld [vmem:[%s7878_s3 + $0x60] sm:$0xff] }
  0xe7   :  { %1918 = vmatprep.subr.bf16.mxu1 %v6421_v27  ;;  %v5818_v33 = vpack.c.bf16 %v2079_v32, %v2078_v31  ;;  %v2110_v31 = vld [vmem:[%s7878_s3 + $0x160] sm:$0xff]  ;;  %v2111_v32 = vld [vmem:[%s7878_s3 + $0x168] sm:$0xff] }
  0xe8   :  { %1629 = vmatmul.mubr.bf16.vlgmr.msra.gmra.mrb[0].mxu0 %v6416_v30 }
  0xe9   :  { %1638 = vmatprep.mubr.bf16.mxu0 %v6425_v35  ;;  %5795 = vmatpush3.bf16.msra.mxu0 %v5794_v39  ;;  %v5822_v39 = vpack.c.bf16 %v2081_v38, %v2080_v37  ;;  %v2112_v37 = vld [vmem:[%s7878_s3 + $0x170] sm:$0xff]  ;;  %v2113_v38 = vld [vmem:[%s7878_s3 + $0x178] sm:$0xff] }
  0xea   :  { %1919 = vmatpush1.bf16.msra.mxu1 %v6419_v34  ;;  %5797 = vmatprep.subr.bf16.mxu0 %v5796_v43  ;;  %v2096_v34 = vld [vmem:[%s7878_s3 + $0xf0] sm:$0xff]  ;;  %v2098_v43 = vld [vmem:[%s7878_s3 + $0x100] sm:$0xff] }
  0xeb   :  { %1961 = vmatprep.subr.bf16.mxu1 %v6424_v36  ;;  %v5826_v45 = vpack.c.bf16 %v2099_v44, %v2098_v43 }
  0xed   :  { %1921 = vmatmul.mubr.bf16.vlgmr.msra.gmra.mrb[16].mxu1 %v6416_v30  ;;  %5799 = vmatpush3.bf16.msra.mxu0 %v5798_v47  ;;  %v5816_v30 = vpack.c.bf16 %v2095_v29, %v2094_v28  ;;  %v2117_v47 = vld [vmem:[%s7878_s3 + $0x198] sm:$0xff]  ;;  %v2126_v28 = vld [vmem:[%s7878_s3 + $0x1e0] sm:$0xff]  ;;  %v2127_v29 = vld [vmem:[%s7878_s3 + $0x1e8] sm:$0xff] }
  0xee   :  { %1962 = vmatpush1.bf16.msra.mxu1 %v6422_v42  ;;  %1930 = vmatprep.mubr.bf16.mxu1 %v6425_v35  ;;  %v2097_v35 = vld [vmem:[%s7878_s3 + $0xf8] sm:$0xff]  ;;  %v5824_v42 = vpack.c.bf16 %v2115_v41, %v2114_v40  ;;  %v2380_v40 = vld [vmem:[%s7880_s5] sm:$0xff]  ;;  %v2381_v41 = vld [vmem:[%s7880_s5 + $0x8] sm:$0xff] }
  0xef   :  { %5801 = vmatprep.subr.bf16.mxu0 %v5800_v51  ;;  %v5820_v36 = vpack.c.bf16 %v2097_v35, %v2096_v34  ;;  %v2128_v34 = vld [vmem:[%s7878_s3 + $0x1f0] sm:$0xff]  ;;  %v2129_v35 = vld [vmem:[%s7878_s3 + $0x1f8] sm:$0xff]  ;;  %2396 = vrot.lane.b32.xlu0 %v2380_v40, %s6960_s28 }
  0xf0   :  { %1639 = vmatmul.mubr.bf16.gmra.mrb[4].mxu0 %v6427_v46  ;;  %5825 = vmatprep.subr.bf16.mxu1 %v5824_v42  ;;  %v297_v42 = vlaneseq }
  0xf1   :  { %1648 = vmatprep.mubr.bf16.mxu0 %v6428_v50  ;;  %5803 = vmatpush3.bf16.msra.mxu0 %v5802_v54  ;;  %v5832_v54 = vpack.c.bf16 %v2119_v53, %v2118_v52 }
  0xf2   :  { %5805 = vmatprep.subr.bf16.mxu0 %v5804_v57  ;;  %v5834_v57 = vpack.c.bf16 %v2103_v56, %v2102_v55  ;;  %2398 = vrot.lane.b32.xlu1 %v2381_v41, %s6960_s28  ;;  %v7399_v43 = vshrl.u32 %v297_v42, 7 }
  0xf4   :  { %v7402_v44 = vsub.s32 0, %v7399_v43 }
  0xf5   :  { %1931 = vmatmul.mubr.bf16.gmra.mrb[20].mxu1 %v6427_v46  ;;  %5807 = vmatpush3.bf16.msra.mxu0 %v5806_v61  ;;  %v2116_v46 = vld [vmem:[%s7878_s3 + $0x190] sm:$0xff] }
  0xf6   :  { %1940 = vmatprep.mubr.bf16.mxu1 %v6428_v50  ;;  %5809 = vmatprep.subr.bf16.mxu0 %v5808_v2  ;;  %v5828_v48 = vpack.c.bf16 %v2117_v47, %v2116_v46  ;;  %v2101_v50 = vld [vmem:[%s7878_s3 + $0x118] sm:$0xff]  ;;  %v2104_v61 = vld [vmem:[%s7878_s3 + $0x130] sm:$0xff]  ;;  %v2123_v2 = vld [vmem:[%s7878_s3 + $0x1c8] sm:$0xff]  ;;  %v7410_v46 = vsub.s32 1, %v7399_v43 }
  0xf7   :  { %v5830_v51 = vpack.c.bf16 %v2101_v50, %v2100_v49  ;;  %v5838_v63 = vpack.c.bf16 %v2105_v62, %v2104_v61 }
  0xf8   :  { %1649 = vmatmul.mubr.bf16.gmra.mrb[8].mxu0 %v6430_v60 }
  0xf9   :  { %1658 = vmatprep.mubr.bf16.mxu0 %v6431_v1  ;;  %5811 = vmatpush3.bf16.msra.mxu0 %v5810_v5  ;;  %v2107_v5 = vld [vmem:[%s7878_s3 + $0x148] sm:$0xff] }
  0xfa   :  { %5813 = vmatprep.subr.bf16.mxu0 %v5812_v6  ;;  %v5842_v6 = vpack.c.bf16 %v2107_v5, %v2106_v4 }
  0xfd   :  { %1941 = vmatmul.mubr.bf16.gmra.mrb[24].mxu1 %v6430_v60  ;;  %5815 = vmatpush3.bf16.msra.mxu0 %v5814_v8  ;;  %v5836_v60 = vpack.c.bf16 %v2121_v59, %v2120_v58  ;;  %v2125_v8 = vld [vmem:[%s7878_s3 + $0x1d8] sm:$0xff] }
  0xfe   :  { %1950 = vmatprep.mubr.bf16.mxu1 %v6431_v1  ;;  %5817 = vmatprep.subr.bf16.mxu0 %v5816_v30  ;;  %v2122_v1 = vld [vmem:[%s7878_s3 + $0x1c0] sm:$0xff]  ;;  %v5848_v30 = vpack.c.bf16 %v2127_v29, %v2126_v28 }
  0xff   :  { %v5840_v3 = vpack.c.bf16 %v2123_v2, %v2122_v1 }
 0x100   :  { %v7219_v9 = vpop.f32.mrb[0].mxu1  ;;  %1659 = vmatmul.mubr.bf16.gmra.mrb[12].mxu0 %v6433_v7 }
 0x101   :  { %v7221_v10 = vpop.f32.mrb[1].mxu1  ;;  %5819 = vmatpush3.bf16.msra.mxu0 %v5818_v33  ;;  %v5850_v33 = vpack.c.bf16 %v2111_v32, %v2110_v31 }
 0x102   :  { %v7223_v11 = vpop.f32.mrb[2].mxu1  ;;  %5821 = vmatprep.subr.bf16.mxu0 %v5820_v36  ;;  %v5852_v36 = vpack.c.bf16 %v2129_v35, %v2128_v34 }
 0x103   :  { %v7225_v12 = vpop.f32.mrb[3].mxu1 }
 0x105   :  { %1951 = vmatmul.mubr.bf16.gmra.mrb[28].mxu1 %v6433_v7  ;;  %5823 = vmatpush3.bf16.msra.mxu0 %v5822_v39  ;;  %v2124_v7 = vld [vmem:[%s7878_s3 + $0x1d0] sm:$0xff]  ;;  %v5854_v39 = vpack.c.bf16 %v2113_v38, %v2112_v37 }
 0x106   :  { %1993 = vmatprep.mubr.bf16.mxu1 %v6964_v0 }
 0x108   :  { %v7238_v15 = vpop.f32.mrb[4].mxu1 }
 0x109   :  { %v7240_v16 = vpop.f32.mrb[5].mxu1 }
 0x10a   :  { %v7246_v18 = vpop.f32.mrb[6].mxu1 }
 0x10b   :  { %v7249_v19 = vpop.f32.mrb[7].mxu1 }
 0x10d   :  { %5355 = vmatmul.mubr.msk.bf16.vlgmr.msra.gmra.mrb[16].mxu1 %vm1437_vm0, %v6882_v13  ;;  %v5844_v13 = vpack.c.bf16 %v2125_v8, %v2124_v7 }
 0x10e   :  { %2003 = vmatprep.mubr.bf16.mxu1 %v6964_v0  ;;  %5827 = vmatpush3.bf16.msra.mxu1 %v5826_v45  ;;  %v7407_v45 = vld [vmem:[%s7877_s2] sm:$0xf] }
 0x10f   :  { %5829 = vmatprep.subr.bf16.mxu1 %v5828_v48  ;;  %v7414_v47 = vrot.slane %v7407_v45, %v7402_v44  ;;  %v7418_v48 = vrot.slane %v7407_v45, %v7410_v46 }
 0x110   :  { %v7251_v20 = vpop.f32.mrb[8].mxu1 }
 0x111   :  { %v7253_v21 = vpop.f32.mrb[9].mxu1 }
 0x112   :  { %v7259_v23 = vpop.f32.mrb[10].mxu1  ;;  %5831 = vmatpush3.bf16.msra.mxu1 %v5830_v51 }
 0x113   :  { %v7261_v24 = vpop.f32.mrb[11].mxu1  ;;  %5833 = vmatprep.subr.bf16.mxu1 %v5832_v54 }
 0x115   :  { %5356 = vmatmul.mubr.msk.bf16.gmra.mrb[20].mxu1 %vm1437_vm0, %v6883_v14  ;;  %v2108_v14 = vld [vmem:[%s7878_s3 + $0x150] sm:$0xff] }
 0x116   :  { %2013 = vmatprep.mubr.bf16.mxu1 %v6964_v0  ;;  %5835 = vmatpush3.bf16.msra.mxu1 %v5834_v57 }
 0x117   :  { %5837 = vmatprep.subr.bf16.mxu1 %v5836_v60 }
 0x118   :  { %v7263_v25 = vpop.f32.mrb[12].mxu1 }
 0x119   :  { %v7265_v26 = vpop.f32.mrb[13].mxu1 }
 0x11a   :  { %5839 = vmatpush3.bf16.msra.mxu1 %v5838_v63 }
 0x11b   :  { %5841 = vmatprep.subr.bf16.mxu1 %v5840_v3 }
 0x11d   :  { %5357 = vmatmul.mubr.msk.bf16.gmra.mrb[24].mxu1 %vm1437_vm0, %v6884_v17  ;;  %v2109_v17 = vld [vmem:[%s7878_s3 + $0x158] sm:$0xff] }
 0x11e   :  { %2023 = vmatprep.mubr.bf16.mxu1 %v6964_v0  ;;  %v7267_v0 = vpop.f32.mrb[14].mxu1  ;;  %5843 = vmatpush3.bf16.msra.mxu1 %v5842_v6 }
 0x11f   :  { %v7269_v27 = vpop.f32.mrb[15].mxu1  ;;  %5845 = vmatprep.subr.bf16.mxu1 %v5844_v13 }
 0x125   :  { %5358 = vmatmul.mubr.msk.bf16.gmra.mrb[28].mxu1 %vm1437_vm0, %v6885_v22  ;;  %v5846_v22 = vpack.c.bf16 %v2109_v17, %v2108_v14 }
 0x127   :  { %5847 = vmatpush3.bf16.msra.mxu1 %v5846_v22 }
 0x128   :  { %5849 = vmatprep.subr.bf16.mxu1 %v5848_v30 }
 0x12b   :  { %5851 = vmatpush3.bf16.msra.mxu1 %v5850_v33 }
 0x12c   :  { %5853 = vmatprep.subr.bf16.mxu1 %v5852_v36 }
 0x12f   :  { %5855 = vmatpush3.bf16.msra.mxu1 %v5854_v39 }
 0x1bb   :  { %v1630_v49 = vpop.f32.mrb[0].mxu0 }
 0x1bc   :  { %v5864_v50 = vadd.f32 %v1630_v49, %v7414_v47  ;;  %v1632_v51 = vpop.f32.mrb[1].mxu0 }
 0x1bd   :  { %v5866_v52 = vadd.f32 %v1632_v51, %v7418_v48  ;;  %v1634_v53 = vpop.f32.mrb[2].mxu0 }
 0x1be   :  { %v5865_v54 = vadd.f32 %v5864_v50, %v7219_v9  ;;  %v5868_v55 = vadd.f32 %v1634_v53, %v7414_v47  ;;  %v1636_v56 = vpop.f32.mrb[3].mxu0 }
 0x1bf   :  { %v5867_v57 = vadd.f32 %v5866_v52, %v7221_v10  ;;  %v5870_v58 = vadd.f32 %v1636_v56, %v7418_v48 }
 0x1c0   :  { %v5869_v59 = vadd.f32 %v5868_v55, %v7223_v11  ;;  %v2034_v62 = vmax.f32 %v5865_v54, 0.0  ;;  %v7452_v54 = vsub.s32 2, %v7399_v43 }
 0x1c1   :  { %v2035_v60 = vmax.f32 %v5867_v57, 0.0  ;;  %v5871_v61 = vadd.f32 %v5870_v58, %v7225_v12  ;;  %v7456_v57 = vsub.s32 3, %v7399_v43 }
 0x1c2   :  { %v2038_v10 = vmax.f32 %v5869_v59, 0.0 }
 0x1c3   :  { %v2039_v63 = vmax.f32 %v5871_v61, 0.0  ;;  %v1640_v1 = vpop.f32.mrb[4].mxu0  ;;  %2201 = vmatprep.mubr.f32.mxu0 %v2035_v60 }
 0x1c4   :  { %v5872_v2 = vadd.f32 %v1640_v1, %v7414_v47  ;;  %v1642_v3 = vpop.f32.mrb[5].mxu0  ;;  %2202 = vmatmul.mubr.f32.vlgmr.msra.gmra.mrb[16].mxu0 %v2034_v62 }
 0x1c5   :  { %v5874_v9 = vadd.f32 %v1642_v3, %v7418_v48  ;;  %v1644_v4 = vpop.f32.mrb[6].mxu0  ;;  %2206 = vmatprep.mubr.f32.mxu0 %v2039_v63 }
 0x1c6   :  { %v5873_v5 = vadd.f32 %v5872_v2, %v7238_v15  ;;  %v5876_v11 = vadd.f32 %v1644_v4, %v7414_v47  ;;  %v1646_v6 = vpop.f32.mrb[7].mxu0 }
 0x1c7   :  { %v5875_v12 = vadd.f32 %v5874_v9, %v7240_v16  ;;  %v5878_v7 = vadd.f32 %v1646_v6, %v7418_v48 }
 0x1c8   :  { %v5877_v8 = vadd.f32 %v5876_v11, %v7246_v18  ;;  %2207 = vmatmul.mubr.f32.gmra.mrb[18].mxu0 %v2038_v10  ;;  %v2042_v17 = vmax.f32 %v5873_v5, 0.0 }
 0x1c9   :  { %v2043_v13 = vmax.f32 %v5875_v12, 0.0  ;;  %v5879_v14 = vadd.f32 %v5878_v7, %v7249_v19 }
 0x1ca   :  { %v2046_v16 = vmax.f32 %v5877_v8, 0.0 }
 0x1cb   :  { %v2047_v22 = vmax.f32 %v5879_v14, 0.0  ;;  %v1650_v28 = vpop.f32.mrb[8].mxu0  ;;  %2211 = vmatprep.mubr.f32.mxu0 %v2043_v13 }
 0x1cc   :  { %v5880_v29 = vadd.f32 %v1650_v28, %v7414_v47  ;;  %v1652_v15 = vpop.f32.mrb[9].mxu0  ;;  %2212 = vmatmul.mubr.f32.gmra.mrb[20].mxu0 %v2042_v17 }
 0x1cd   :  { %v5882_v30 = vadd.f32 %v1652_v15, %v7418_v48  ;;  %v1654_v31 = vpop.f32.mrb[10].mxu0  ;;  %2216 = vmatprep.mubr.f32.mxu0 %v2047_v22 }
 0x1ce   :  { %v5881_v32 = vadd.f32 %v5880_v29, %v7251_v20  ;;  %v5884_v18 = vadd.f32 %v1654_v31, %v7414_v47  ;;  %v1656_v33 = vpop.f32.mrb[11].mxu0 }
 0x1cf   :  { %v5883_v19 = vadd.f32 %v5882_v30, %v7253_v21  ;;  %v5886_v34 = vadd.f32 %v1656_v33, %v7418_v48 }
 0x1d0   :  { %v5885_v35 = vadd.f32 %v5884_v18, %v7259_v23  ;;  %2217 = vmatmul.mubr.f32.gmra.mrb[22].mxu0 %v2046_v16  ;;  %v2050_v38 = vmax.f32 %v5881_v32, 0.0 }
 0x1d1   :  { %v2051_v36 = vmax.f32 %v5883_v19, 0.0  ;;  %v5887_v37 = vadd.f32 %v5886_v34, %v7261_v24 }
 0x1d2   :  { %v2054_v21 = vmax.f32 %v5885_v35, 0.0 }
 0x1d3   :  { %v2055_v39 = vmax.f32 %v5887_v37, 0.0  ;;  %v1660_v40 = vpop.f32.mrb[12].mxu0  ;;  %2221 = vmatprep.mubr.f32.mxu0 %v2051_v36 }
 0x1d4   :  { %v5888_v41 = vadd.f32 %v1660_v40, %v7414_v47  ;;  %v1662_v20 = vpop.f32.mrb[13].mxu0  ;;  %2222 = vmatmul.mubr.f32.gmra.mrb[24].mxu0 %v2050_v38 }
 0x1d5   :  { %v5890_v42 = vadd.f32 %v1662_v20, %v7418_v48  ;;  %v1664_v49 = vpop.f32.mrb[14].mxu0  ;;  %2226 = vmatprep.mubr.f32.mxu0 %v2055_v39 }
 0x1d6   :  { %v5889_v50 = vadd.f32 %v5888_v41, %v7263_v25  ;;  %v5892_v23 = vadd.f32 %v1664_v49, %v7414_v47  ;;  %v1666_v51 = vpop.f32.mrb[15].mxu0 }
 0x1d7   :  { %v5891_v24 = vadd.f32 %v5890_v42, %v7265_v26  ;;  %v5894_v52 = vadd.f32 %v1666_v51, %v7418_v48  ;;  %v308_v26 = vrot.slane %v7407_v45, %v7452_v54 }
 0x1d8   :  { %v5893_v53 = vadd.f32 %v5892_v23, %v7267_v0  ;;  %2227 = vmatmul.mubr.f32.gmra.mrb[26].mxu0 %v2054_v21  ;;  %v2058_v25 = vmax.f32 %v5889_v50, 0.0  ;;  %v312_v0 = vrot.slane %v7407_v45, %v7456_v57 }
 0x1d9   :  { %v2059_v55 = vmax.f32 %v5891_v24, 0.0  ;;  %v5895_v56 = vadd.f32 %v5894_v52, %v7269_v27 }
 0x1da   :  { %v2062_v47 = vmax.f32 %v5893_v53, 0.0 }
 0x1db   :  { %v2063_v58 = vmax.f32 %v5895_v56, 0.0  ;;  %2231 = vmatprep.mubr.f32.mxu0 %v2059_v55 }
 0x1dc   :  { %2232 = vmatmul.mubr.f32.gmra.mrb[28].mxu0 %v2058_v25 }
 0x1dd   :  { %2236 = vmatprep.mubr.f32.mxu0 %v2063_v58 }
 0x1e0   :  { %v1995_v48 = vpop.f32.mrb[16].mxu1  ;;  %2237 = vmatmul.mubr.f32.gmra.mrb[30].mxu0 %v2062_v47 }
 0x1e1   :  { %v5896_v59 = vadd.f32 %v1995_v48, %v308_v26  ;;  %v1997_v60 = vpop.f32.mrb[17].mxu1 }
 0x1e2   :  { %v5897_v27 = vadd.f32 %v1997_v60, %v312_v0  ;;  %v1999_v61 = vpop.f32.mrb[18].mxu1 }
 0x1e3   :  { %v2001_v62 = vpop.f32.mrb[19].mxu1  ;;  %v2036_v2 = vmax.f32 %v5896_v59, 0.0  ;;  %v5898_v3 = vadd.f32 %v1999_v61, %v308_v26 }
 0x1e4   :  { %v2037_v63 = vmax.f32 %v5897_v27, 0.0  ;;  %v5899_v1 = vadd.f32 %v2001_v62, %v312_v0 }
 0x1e5   :  { %v2040_v10 = vmax.f32 %v5898_v3, 0.0 }
 0x1e6   :  { %v2041_v9 = vmax.f32 %v5899_v1, 0.0  ;;  %2306 = vmatprep.mubr.f32.mxu1 %v2037_v63 }
 0x1e7   :  { %2307 = vmatmul.mubr.f32.vlgmr.msra.gmra.mrb[32].mxu1 %v2036_v2 }
 0x1e8   :  { %v2005_v4 = vpop.f32.mrb[20].mxu1  ;;  %2311 = vmatprep.mubr.f32.mxu1 %v2041_v9 }
 0x1e9   :  { %v5900_v5 = vadd.f32 %v2005_v4, %v308_v26  ;;  %v2007_v45 = vpop.f32.mrb[21].mxu1 }
 0x1ea   :  { %v5901_v11 = vadd.f32 %v2007_v45, %v312_v0  ;;  %v2009_v6 = vpop.f32.mrb[22].mxu1 }
 0x1eb   :  { %v2011_v12 = vpop.f32.mrb[23].mxu1  ;;  %2312 = vmatmul.mubr.f32.gmra.mrb[34].mxu1 %v2040_v10  ;;  %v2044_v13 = vmax.f32 %v5900_v5, 0.0  ;;  %v5902_v14 = vadd.f32 %v2009_v6, %v308_v26  ;;  %v7469_v5 = vld [vmem:[%s7879_s4] ss:$0 sm:$0xff] }
 0x1ec   :  { %v2045_v7 = vmax.f32 %v5901_v11, 0.0  ;;  %v5903_v8 = vadd.f32 %v2011_v12, %v312_v0 }
 0x1ed   :  { %v2048_v28 = vmax.f32 %v5902_v14, 0.0 }
 0x1ee   :  { %v2049_v17 = vmax.f32 %v5903_v8, 0.0  ;;  %2316 = vmatprep.mubr.f32.mxu1 %v2045_v7 }
 0x1ef   :  { %2317 = vmatmul.mubr.f32.gmra.mrb[36].mxu1 %v2044_v13 }
 0x1f0   :  { %v2015_v22 = vpop.f32.mrb[24].mxu1  ;;  %2321 = vmatprep.mubr.f32.mxu1 %v2049_v17 }
 0x1f1   :  { %v5904_v29 = vadd.f32 %v2015_v22, %v308_v26  ;;  %v2017_v15 = vpop.f32.mrb[25].mxu1  ;;  %v2382_v22 = vld [vmem:[%s7880_s5 + $0x10] sm:$0xff] }
 0x1f2   :  { %v5905_v30 = vadd.f32 %v2017_v15, %v312_v0  ;;  %v2019_v31 = vpop.f32.mrb[26].mxu1 }
 0x1f3   :  { %v2021_v16 = vpop.f32.mrb[27].mxu1  ;;  %2322 = vmatmul.mubr.f32.gmra.mrb[38].mxu1 %v2048_v28  ;;  %v2052_v33 = vmax.f32 %v5904_v29, 0.0  ;;  %v5906_v19 = vadd.f32 %v2019_v31, %v308_v26 }
 0x1f4   :  { %v2053_v32 = vmax.f32 %v5905_v30, 0.0  ;;  %v5907_v18 = vadd.f32 %v2021_v16, %v312_v0  ;;  %v2383_v16 = vld [vmem:[%s7880_s5 + $0x18] sm:$0xff] }
 0x1f5   :  { %v2056_v36 = vmax.f32 %v5906_v19, 0.0 }
 0x1f6   :  { %v2057_v34 = vmax.f32 %v5907_v18, 0.0  ;;  %2326 = vmatprep.mubr.f32.mxu1 %v2053_v32 }
 0x1f7   :  { %2327 = vmatmul.mubr.f32.gmra.mrb[40].mxu1 %v2052_v33 }
 0x1f8   :  { %v2025_v35 = vpop.f32.mrb[28].mxu1  ;;  %2331 = vmatprep.mubr.f32.mxu1 %v2057_v34 }
 0x1f9   :  { %v5908_v37 = vadd.f32 %v2025_v35, %v308_v26  ;;  %v2027_v38 = vpop.f32.mrb[29].mxu1  ;;  %v2384_v35 = vld [vmem:[%s7880_s5 + $0x20] sm:$0xff] }
 0x1fa   :  { %v5909_v39 = vadd.f32 %v2027_v38, %v312_v0  ;;  %v2029_v40 = vpop.f32.mrb[30].mxu1 }
 0x1fb   :  { %v2031_v41 = vpop.f32.mrb[31].mxu1  ;;  %2332 = vmatmul.mubr.f32.gmra.mrb[42].mxu1 %v2056_v36  ;;  %v2060_v49 = vmax.f32 %v5908_v37, 0.0  ;;  %v5910_v21 = vadd.f32 %v2029_v40, %v308_v26 }
 0x1fc   :  { %v2061_v20 = vmax.f32 %v5909_v39, 0.0  ;;  %v5911_v42 = vadd.f32 %v2031_v41, %v312_v0  ;;  %v2385_v41 = vld [vmem:[%s7880_s5 + $0x28] sm:$0xff] }
 0x1fd   :  { %v2064_v23 = vmax.f32 %v5910_v21, 0.0 }
 0x1fe   :  { %v2065_v50 = vmax.f32 %v5911_v42, 0.0  ;;  %2336 = vmatprep.mubr.f32.mxu1 %v2061_v20 }
 0x1ff   :  { %2337 = vmatmul.mubr.f32.gmra.mrb[44].mxu1 %v2060_v49 }
 0x200   :  { %2341 = vmatprep.mubr.f32.mxu1 %v2065_v50 }
 0x203   :  { %2342 = vmatmul.mubr.f32.gmra.mrb[46].mxu1 %v2064_v23  ;;  %v2386_v23 = vld [vmem:[%s7880_s5 + $0x30] sm:$0xff] }
 0x297   :  { %v5632_v51 = vpop.f32.mrb[16].mxu0 }
 0x298   :  { %v5633_v24 = vpop.f32.mrb[17].mxu0 }
 0x299   :  { %v5634_v52 = vadd.f32 %v5633_v24, %v5632_v51  ;;  %v2469_v51 = vld [vmem:[%s7881_s6 + $0x8] sm:$0xff] }
 0x29a   :  { %v2473_v24 = vld [vmem:[%s7881_s6 + $0x28] sm:$0xff] }
 0x29b   :  { %v5635_v53 = vpop.f32.mrb[18].mxu0  ;;  %v2204_v6 = vadd.f32 %v5634_v52, %v7469_v5  ;;  %v2468_v52 = vld [vmem:[%s7881_s6] sm:$0xff] }
 0x29c   :  { %v5636_v55 = vpop.f32.mrb[19].mxu0 }
 0x29d   :  { %v5637_v56 = vadd.f32 %v5636_v55, %v5635_v53 }
 0x29f   :  { %v5638_v25 = vpop.f32.mrb[20].mxu0  ;;  %v2209_v14 = vadd.f32 %v5637_v56, %v7469_v5  ;;  %v5856_v56 = vpack.c.bf16 %v2473_v24, %v2469_v51 }
 0x2a0   :  { %v5639_v58 = vpop.f32.mrb[21].mxu0 }
 0x2a1   :  { %v5640_v47 = vadd.f32 %v5639_v58, %v5638_v25  ;;  %v2472_v25 = vld [vmem:[%s7881_s6 + $0x20] sm:$0xff]  ;;  %v2471_v58 = vld [vmem:[%s7881_s6 + $0x18] sm:$0xff]  ;;  %5857 = vmatprep.subr.bf16.mxu0 %v5856_v56 }
 0x2a3   :  { %v5641_v48 = vpop.f32.mrb[22].mxu0  ;;  %v2214_v30 = vadd.f32 %v5640_v47, %v7469_v5  ;;  %v2475_v47 = vld [vmem:[%s7881_s6 + $0x38] sm:$0xff] }
 0x2a4   :  { %v5642_v59 = vpop.f32.mrb[23].mxu0 }
 0x2a5   :  { %v5643_v0 = vadd.f32 %v5642_v59, %v5641_v48  ;;  %v6965_v48 = vmov 0.0  }
 0x2a6   :  { %2715 = vmatprep.mubr.f32.mxu1 %v6965_v48  ;;  %2602 = vmatprep.mubr.f32.mxu0 %v6965_v48 }
 0x2a7   :  { %v5644_v60 = vpop.f32.mrb[24].mxu0  ;;  %v2219_v19 = vadd.f32 %v5643_v0, %v7469_v5  ;;  %v5858_v0 = vpack.c.bf16 %v2472_v25, %v2468_v52 }
 0x2a8   :  { %v5645_v26 = vpop.f32.mrb[25].mxu0 }
 0x2a9   :  { %v5646_v27 = vadd.f32 %v5645_v26, %v5644_v60  ;;  %v5860_v60 = vpack.c.bf16 %v2475_v47, %v2471_v58  ;;  %v2470_v26 = vld [vmem:[%s7881_s6 + $0x10] sm:$0xff]  ;;  %5859 = vmatpush1.bf16.msra.mxu0 %v5858_v0 }
 0x2ab   :  { %v5647_v61 = vpop.f32.mrb[26].mxu0  ;;  %v2224_v39 = vadd.f32 %v5646_v27, %v7469_v5  ;;  %v2474_v27 = vld [vmem:[%s7881_s6 + $0x30] sm:$0xff]  ;;  %5861 = vmatprep.subr.bf16.mxu1 %v5860_v60  ;;  %v6439_v60 = vld [vmem:[#allocation5 + $0xc] ss:$28 sps:$4 sm:$0xff]  }
 0x2ac   :  { %v5648_v62 = vpop.f32.mrb[27].mxu0 }
 0x2ad   :  { %v5649_v63 = vadd.f32 %v5648_v62, %v5647_v61 }
 0x2af   :  { %v5650_v1 = vpop.f32.mrb[28].mxu0  ;;  %v2229_v21 = vadd.f32 %v5649_v63, %v7469_v5  ;;  %v5862_v63 = vpack.c.bf16 %v2474_v27, %v2470_v26 }
 0x2b0   :  { %v5651_v2 = vpop.f32.mrb[29].mxu0 }
 0x2b1   :  { %v7462_v3 = vadd.f32 %v5651_v2, %v5650_v1  ;;  %v2387_v1 = vld [vmem:[%s7880_s5 + $0x38] sm:$0xff]  ;;  %5863 = vmatpush1.bf16.msra.mxu1 %v5862_v63 }
 0x2b2   :  { %4403 = vmatprep.subr.bf16.mxu1 %v6439_v60  ;;  %v6496_v60 = vld [vmem:[#allocation5 + $0x234] ss:$28 sps:$4 sm:$0xff]  }
 0x2b3   :  { %v5653_v9 = vpop.f32.mrb[30].mxu0  ;;  %v2234_v61 = vadd.f32 %v7462_v3, %v7469_v5 }
 0x2b4   :  { %v5654_v4 = vpop.f32.mrb[31].mxu0 }
 0x2b5   :  { %v7464_v10 = vadd.f32 %v5654_v4, %v5653_v9 }
 0x2b7   :  { %v2239_v4 = vadd.f32 %v7464_v10, %v7469_v5 }
 0x2ba   :  { %v5688_v45 = vpop.f32.mrb[32].mxu1 }
 0x2bb   :  { %v5689_v11 = vpop.f32.mrb[33].mxu1 }
 0x2bc   :  { %v5690_v12 = vadd.f32 %v5689_v11, %v5688_v45 }
 0x2be   :  { %v7472_v7 = vadd.f32 %v5690_v12, %v2204_v6  ;;  %v5691_v8 = vpop.f32.mrb[34].mxu1 }
 0x2bf   :  { %v5692_v13 = vpop.f32.mrb[35].mxu1 }
 0x2c0   :  { %2348 = vst.msk [vmem:[%s7885_s10] sm:$0xff] %vm2347_vm1, %v7472_v7  ;;  %v5693_v17 = vadd.f32 %v5692_v13, %v5691_v8  ;;  %2436 = vrot.lane.b32.xlu0 %v7472_v7, %s6960_s28  ;;  %v2356_v10 = vmul.f32 0.5, %v7472_v7 }
 0x2c2   :  { %v7485_v28 = vadd.f32 %v5693_v17, %v2209_v14  ;;  %v5694_v29 = vpop.f32.mrb[36].mxu1  ;;  %v2364_v5 = vmul.f32 1.442695, %v2356_v10  ;;  %v6434_v10 = vld [vmem:[#allocation5] ss:$28 sps:$4 sm:$0xff]  }
 0x2c3   :  { %v5695_v15 = vpop.f32.mrb[37].mxu1 }
 0x2c4   :  { %2349 = vst.msk [vmem:[%s7885_s10 + $0x8] sm:$0xff] %vm2347_vm1, %v7485_v28  ;;  %v5696_v31 = vadd.f32 %v5695_v15, %v5694_v29  ;;  %2438 = vrot.lane.b32.xlu1 %v7485_v28, %s6960_s28  ;;  %2400 = vrot.lane.b32.xlu0 %v2382_v22, %s6960_s28  ;;  %v2357_v6 = vmul.f32 0.5, %v7485_v28  ;;  %6754 = vpow2.f32 %v2364_v5  ;;  %v2397_v15 = vpop.permute.xlu0 %2396  ;;  %v6437_v5 = vld [vmem:[#allocation5 + $0x8] ss:$28 sps:$4 sm:$0xff]  }
 0x2c6   :  { %v7499_v32 = vadd.f32 %v5696_v31, %v2214_v30  ;;  %v5697_v18 = vpop.f32.mrb[38].mxu1  ;;  %v2366_v12 = vmul.f32 1.442695, %v2357_v6 }
 0x2c7   :  { %v5698_v33 = vpop.f32.mrb[39].mxu1 }
 0x2c8   :  { %2350 = vst.msk [vmem:[%s7885_s10 + $0x10] sm:$0xff] %vm2347_vm1, %v7499_v32  ;;  %v5699_v34 = vadd.f32 %v5698_v33, %v5697_v18  ;;  %2440 = vrot.lane.b32.xlu1 %v7499_v32, %s6960_s28  ;;  %2402 = vrot.lane.b32.xlu0 %v2383_v16, %s6960_s28  ;;  %v2358_v8 = vmul.f32 0.5, %v7499_v32  ;;  %6756 = vpow2.f32 %v2366_v12  ;;  %v2399_v18 = vpop.permute.xlu1 %2398  ;;  %v6442_v12 = vld [vmem:[#allocation5 + $0x3c] ss:$28 sps:$4 sm:$0xff]  }
 0x2ca   :  { %v7513_v36 = vadd.f32 %v5699_v34, %v2219_v19  ;;  %v5700_v37 = vpop.f32.mrb[40].mxu1  ;;  %v2368_v13 = vmul.f32 1.442695, %v2358_v8  ;;  %v6445_v8 = vld [vmem:[#allocation5 + $0x44] ss:$28 sps:$4 sm:$0xff]  }
 0x2cb   :  { %v5701_v38 = vpop.f32.mrb[41].mxu1 }
 0x2cc   :  { %2351 = vst.msk [vmem:[%s7885_s10 + $0x18] sm:$0xff] %vm2347_vm1, %v7513_v36  ;;  %v5702_v40 = vadd.f32 %v5701_v38, %v5700_v37  ;;  %2442 = vrot.lane.b32.xlu1 %v7513_v36, %s6960_s28  ;;  %2404 = vrot.lane.b32.xlu0 %v2384_v35, %s6960_s28  ;;  %v2359_v14 = vmul.f32 0.5, %v7513_v36  ;;  %6758 = vpow2.f32 %v2368_v13  ;;  %v6440_v13 = vld [vmem:[#allocation5 + $0x38] ss:$28 sps:$4 sm:$0xff]  }
 0x2ce   :  { %v2329_v20 = vadd.f32 %v5702_v40, %v2224_v39  ;;  %v5703_v42 = vpop.f32.mrb[42].mxu1  ;;  %v6755_v17 = vpop.eup %6754  ;;  %v2370_v22 = vmul.f32 1.442695, %v2359_v14  ;;  %v6443_v14 = vld [vmem:[#allocation5 + $0x40] ss:$28 sps:$4 sm:$0xff]  }
 0x2cf   :  { %v5704_v49 = vpop.f32.mrb[43].mxu1  ;;  %v2420_v30 = vmul.f32 %v6755_v17, %v2397_v15  ;;  %v6446_v15 = vld [vmem:[#allocation5 + $0x70] ss:$28 sps:$4 sm:$0xff]  }
 0x2d0   :  { %2352 = vst.msk [vmem:[%s7885_s10 + $0x20] sm:$0xff] %vm2347_vm1, %v2329_v20  ;;  %v5705_v50 = vadd.f32 %v5704_v49, %v5703_v42  ;;  %2444 = vrot.lane.b32.xlu1 %v2329_v20, %s6960_s28  ;;  %2406 = vrot.lane.b32.xlu0 %v2385_v41, %s6960_s28  ;;  %v2360_v29 = vmul.f32 0.5, %v2329_v20  ;;  %6760 = vpow2.f32 %v2370_v22  ;;  %v6448_v22 = vld [vmem:[#allocation5 + $0x74] ss:$28 sps:$4 sm:$0xff]  }
 0x2d2   :  { %v2334_v53 = vadd.f32 %v5705_v50, %v2229_v21  ;;  %v5706_v55 = vpop.f32.mrb[44].mxu1  ;;  %v6757_v31 = vpop.eup %6756  ;;  %v2372_v7 = vmul.f32 1.442695, %v2360_v29  ;;  %v6451_v29 = vld [vmem:[#allocation5 + $0x7c] ss:$28 sps:$4 sm:$0xff]  }
 0x2d3   :  { %v5707_v59 = vpop.f32.mrb[45].mxu1  ;;  %v2421_v19 = vmul.f32 %v6757_v31, %v2399_v18  ;;  %v6452_v18 = vld [vmem:[#allocation5 + $0xa8] ss:$28 sps:$4 sm:$0xff]  }
 0x2d4   :  { %2353 = vst.msk [vmem:[%s7885_s10 + $0x28] sm:$0xff] %vm2347_vm1, %v2334_v53  ;;  %v5708_v62 = vadd.f32 %v5707_v59, %v5706_v55  ;;  %2446 = vrot.lane.b32.xlu1 %v2334_v53, %s6960_s28  ;;  %2408 = vrot.lane.b32.xlu0 %v2386_v23, %s6960_s28  ;;  %v2361_v16 = vmul.f32 0.5, %v2334_v53  ;;  %6762 = vpow2.f32 %v2372_v7  ;;  %v6436_v59 = vld [vmem:[#allocation5 + $0x4] ss:$28 sps:$4 sm:$0xff]   ;;  %v6454_v7 = vld [vmem:[#allocation5 + $0xac] ss:$28 sps:$4 sm:$0xff]  }
 0x2d5   :  { %4257 = vmatprep.subr.bf16.mxu0 %v6436_v59  ;;  %v6488_v59 = vld [vmem:[#allocation5 + $0x1f8] ss:$28 sps:$4 sm:$0xff]  }
 0x2d6   :  { %v2339_v2 = vadd.f32 %v5708_v62, %v2234_v61  ;;  %v5709_v9 = vpop.f32.mrb[46].mxu1  ;;  %v2374_v32 = vmul.f32 1.442695, %v2361_v16  ;;  %v6759_v38 = vpop.eup %6758  ;;  %v6457_v16 = vld [vmem:[#allocation5 + $0xb4] ss:$28 sps:$4 sm:$0xff]  }
 0x2d7   :  { %v5710_v3 = vpop.f32.mrb[47].mxu1 }
 0x2d8   :  { %2354 = vst.msk [vmem:[%s7885_s10 + $0x30] sm:$0xff] %vm2347_vm1, %v2339_v2  ;;  %v5711_v45 = vadd.f32 %v5710_v3, %v5709_v9  ;;  %2448 = vrot.lane.b32.xlu1 %v2339_v2, %s6960_s28  ;;  %2410 = vrot.lane.b32.xlu0 %v2387_v1, %s6960_s28  ;;  %v2362_v34 = vmul.f32 0.5, %v2339_v2  ;;  %6764 = vpow2.f32 %v2374_v32  ;;  %v6463_v32 = vld [vmem:[#allocation5 + $0xec] ss:$28 sps:$4 sm:$0xff]  }
 0x2da   :  { %v2344_v11 = vadd.f32 %v5711_v45, %v2239_v4  ;;  %v2376_v40 = vmul.f32 1.442695, %v2362_v34  ;;  %v6761_v21 = vpop.eup %6760  ;;  %v6458_v34 = vld [vmem:[#allocation5 + $0xe0] ss:$28 sps:$4 sm:$0xff]  }
 0x2dc   :  { %2355 = vst.msk [vmem:[%s7885_s10 + $0x38] sm:$0xff] %vm2347_vm1, %v2344_v11  ;;  %2450 = vrot.lane.b32.xlu1 %v2344_v11, %s6960_s28  ;;  %s6966_s10 = smov 112   ;;  %v2363_v41 = vmul.f32 0.5, %v2344_v11  ;;  %6766 = vpow2.f32 %v2376_v40  ;;  %v6467_v40 = vld [vmem:[#allocation5 + $0x120] ss:$28 sps:$4 sm:$0xff]  }
 0x2de   :  { %v2378_v23 = vmul.f32 1.442695, %v2363_v41  ;;  %v6763_v53 = vpop.eup %6762 }
 0x2e0   :  { %6768 = vpow2.f32 %v2378_v23  ;;  %v6478_v23 = vld [vmem:[#allocation5 + $0x18c] ss:$28 sps:$4 sm:$0xff]  }
 0x2e2   :  { %v6765_v47 = vpop.eup %6764 }
 0x2e6   :  { %v6767_v62 = vpop.eup %6766 }
 0x2ea   :  { %v6769_v3 = vpop.eup %6768 }
 0x332   :  { %v2437_v28 = vpop.permute.xlu0 %2436 }
 0x333   :  { %v2460_v33 = vadd.f32 %v2437_v28, %v2420_v30  ;;  %v6449_v30 = vld [vmem:[#allocation5 + $0x78] ss:$28 sps:$4 sm:$0xff]   ;;  %v6455_v28 = vld [vmem:[#allocation5 + $0xb0] ss:$28 sps:$4 sm:$0xff]  }
 0x335   :  { %2506 = vrot.lane.b32.xlu0 %v2460_v33, %s6966_s10 }
 0x336   :  { %v2439_v35 = vpop.permute.xlu1 %2438  ;;  %v2401_v36 = vpop.permute.xlu0 %2400 }
 0x337   :  { %v2461_v37 = vadd.f32 %v2439_v35, %v2421_v19  ;;  %v2422_v39 = vmul.f32 %v6759_v38, %v2401_v36  ;;  %v6460_v19 = vld [vmem:[#allocation5 + $0xe4] ss:$28 sps:$4 sm:$0xff]  }
 0x338   :  { %v6461_v35 = vld [vmem:[#allocation5 + $0xe8] ss:$28 sps:$4 sm:$0xff]  }
 0x339   :  { %2508 = vrot.lane.b32.xlu1 %v2461_v37, %s6966_s10  ;;  %v6466_v37 = vld [vmem:[#allocation5 + $0x11c] ss:$28 sps:$4 sm:$0xff]   ;;  %v6469_v38 = vld [vmem:[#allocation5 + $0x124] ss:$28 sps:$4 sm:$0xff]  }
 0x33a   :  { %v2441_v20 = vpop.permute.xlu1 %2440  ;;  %v2403_v42 = vpop.permute.xlu0 %2402 }
 0x33b   :  { %v2462_v49 = vadd.f32 %v2441_v20, %v2422_v39  ;;  %v2423_v50 = vmul.f32 %v6761_v21, %v2403_v42  ;;  %v6464_v39 = vld [vmem:[#allocation5 + $0x118] ss:$28 sps:$4 sm:$0xff]  }
 0x33c   :  { %v6472_v20 = vld [vmem:[#allocation5 + $0x154] ss:$28 sps:$4 sm:$0xff]   ;;  %v6475_v42 = vld [vmem:[#allocation5 + $0x15c] ss:$28 sps:$4 sm:$0xff]  }
 0x33d   :  { %2510 = vrot.lane.b32.xlu0 %v2462_v49, %s6966_s10  ;;  %v6470_v49 = vld [vmem:[#allocation5 + $0x150] ss:$28 sps:$4 sm:$0xff]   ;;  %v6473_v21 = vld [vmem:[#allocation5 + $0x158] ss:$28 sps:$4 sm:$0xff]  }
 0x33e   :  { %v2443_v51 = vpop.permute.xlu1 %2442  ;;  %v2405_v24 = vpop.permute.xlu0 %2404 }
 0x33f   :  { %v2463_v52 = vadd.f32 %v2443_v51, %v2423_v50  ;;  %v2424_v55 = vmul.f32 %v6763_v53, %v2405_v24  ;;  %v6481_v51 = vld [vmem:[#allocation5 + $0x194] ss:$28 sps:$4 sm:$0xff]   ;;  %v6476_v24 = vld [vmem:[#allocation5 + $0x188] ss:$28 sps:$4 sm:$0xff]  }
 0x341   :  { %2512 = vrot.lane.b32.xlu1 %v2463_v52, %s6966_s10  ;;  %v6479_v52 = vld [vmem:[#allocation5 + $0x190] ss:$28 sps:$4 sm:$0xff]  }
 0x342   :  { %v2445_v56 = vpop.permute.xlu1 %2444  ;;  %v2407_v25 = vpop.permute.xlu0 %2406 }
 0x343   :  { %v2464_v58 = vadd.f32 %v2445_v56, %v2424_v55  ;;  %v2425_v0 = vmul.f32 %v6765_v47, %v2407_v25  ;;  %v6484_v55 = vld [vmem:[#allocation5 + $0x1c4] ss:$28 sps:$4 sm:$0xff]   ;;  %v6487_v56 = vld [vmem:[#allocation5 + $0x1cc] ss:$28 sps:$4 sm:$0xff]  }
 0x344   :  { %v6482_v25 = vld [vmem:[#allocation5 + $0x1c0] ss:$28 sps:$4 sm:$0xff]  }
 0x345   :  { %2514 = vrot.lane.b32.xlu0 %v2464_v58, %s6966_s10  ;;  %v6485_v58 = vld [vmem:[#allocation5 + $0x1c8] ss:$28 sps:$4 sm:$0xff]  }
 0x346   :  { %v2447_v26 = vpop.permute.xlu1 %2446  ;;  %v2409_v27 = vpop.permute.xlu0 %2408  ;;  %v6493_v47 = vld [vmem:[#allocation5 + $0x204] ss:$28 sps:$4 sm:$0xff]  }
 0x347   :  { %v2465_v61 = vadd.f32 %v2447_v26, %v2425_v0  ;;  %v2426_v63 = vmul.f32 %v6767_v62, %v2409_v27  ;;  %v6491_v0 = vld [vmem:[#allocation5 + $0x200] ss:$28 sps:$4 sm:$0xff]   ;;  %v6494_v27 = vld [vmem:[#allocation5 + $0x230] ss:$28 sps:$4 sm:$0xff]  }
 0x348   :  { %v6499_v26 = vld [vmem:[#allocation5 + $0x23c] ss:$28 sps:$4 sm:$0xff]   ;;  %v6502_v62 = vld [vmem:[#allocation5 + $0x26c] ss:$28 sps:$4 sm:$0xff]  }
 0x349   :  { %2516 = vrot.lane.b32.xlu1 %v2465_v61, %s6966_s10  ;;  %v6497_v61 = vld [vmem:[#allocation5 + $0x238] ss:$28 sps:$4 sm:$0xff]  }
 0x34a   :  { %v2449_v1 = vpop.permute.xlu1 %2448  ;;  %v2411_v2 = vpop.permute.xlu0 %2410 }
 0x34b   :  { %v2466_v9 = vadd.f32 %v2449_v1, %v2426_v63  ;;  %v2427_v4 = vmul.f32 %v6769_v3, %v2411_v2  ;;  %v6505_v63 = vld [vmem:[#allocation5 + $0x274] ss:$28 sps:$4 sm:$0xff]   ;;  %v6500_v1 = vld [vmem:[#allocation5 + $0x268] ss:$28 sps:$4 sm:$0xff]  }
 0x34c   :  { %v6503_v2 = vld [vmem:[#allocation5 + $0x270] ss:$28 sps:$4 sm:$0xff]  }
 0x34d   :  { %2518 = vrot.lane.b32.xlu0 %v2466_v9, %s6966_s10  ;;  %v6508_v9 = vld [vmem:[#allocation5 + $0x2a4] ss:$28 sps:$4 sm:$0xff]   ;;  %v6511_v3 = vld [vmem:[#allocation5 + $0x2ac] ss:$28 sps:$4 sm:$0xff]  }
 0x34e   :  { %v2451_v45 = vpop.permute.xlu1 %2450 }
 0x34f   :  { %v2467_v11 = vadd.f32 %v2451_v45, %v2427_v4  ;;  %v6506_v4 = vld [vmem:[#allocation5 + $0x2a0] ss:$28 sps:$4 sm:$0xff]   ;;  %v6509_v45 = vld [vmem:[#allocation5 + $0x2a8] ss:$28 sps:$4 sm:$0xff]  }
 0x351   :  { %2520 = vrot.lane.b32.xlu1 %v2467_v11, %s6966_s10  ;;  %v6514_v11 = vld [vmem:[#allocation5 + $0x2dc] ss:$28 sps:$4 sm:$0xff]  }
 0x3a7   :  { %v2507_v6 = vpop.permute.xlu0 %2506 }
 0x3a8   :  { %5360 = vmatmul.mubr.msk.f32.vlgmr.msra.gmra.mrb[32].mxu0 %vm1437_vm0, %v2507_v6  ;;  %5368 = vmatmul.mubr.msk.f32.vlgmr.msra.gmra.mrb[48].mxu1 %vm1437_vm0, %v2507_v6  ;;  %v6515_v6 = vld [vmem:[#allocation5 + $0x2e0] ss:$28 sps:$4 sm:$0xff]  }
 0x3a9   :  { %2608 = vmatprep.mubr.f32.mxu0 %v6965_v48  ;;  %2721 = vmatprep.mubr.f32.mxu1 %v6965_v48 }
 0x3aa   :  { %4258 = vmatpush1.bf16.msra.mxu0 %v6434_v10  ;;  %4404 = vmatpush1.bf16.msra.mxu1 %v6437_v5  ;;  %v6517_v10 = vld [vmem:[#allocation5 + $0x2e4] ss:$28 sps:$4 sm:$0xff]   ;;  %v6512_v5 = vld [vmem:[#allocation5 + $0x2d8] ss:$28 sps:$4 sm:$0xff]  }
 0x3ab   :  { %v2509_v17 = vpop.permute.xlu1 %2508  ;;  %4259 = vmatprep.subr.bf16.mxu0 %v6442_v12  ;;  %4405 = vmatprep.subr.bf16.mxu1 %v6445_v8  ;;  %v6520_v12 = vld [vmem:[#allocation5 + $0x314] ss:$28 sps:$4 sm:$0xff]   ;;  %v6523_v8 = vld [vmem:[#allocation5 + $0x31c] ss:$28 sps:$4 sm:$0xff]  }
 0x3ac   :  { %5361 = vmatmul.mubr.msk.f32.gmra.mrb[34].mxu0 %vm1437_vm0, %v2509_v17  ;;  %5369 = vmatmul.mubr.msk.f32.gmra.mrb[50].mxu1 %vm1437_vm0, %v2509_v17  ;;  %v6526_v17 = vld [vmem:[#allocation5 + $0x34c] ss:$28 sps:$4 sm:$0xff]  }
 0x3ad   :  { %2614 = vmatprep.mubr.f32.mxu0 %v6965_v48  ;;  %2727 = vmatprep.mubr.f32.mxu1 %v6965_v48 }
 0x3ae   :  { %4260 = vmatpush1.bf16.msra.mxu0 %v6440_v13  ;;  %4406 = vmatpush1.bf16.msra.mxu1 %v6443_v14  ;;  %v6518_v13 = vld [vmem:[#allocation5 + $0x310] ss:$28 sps:$4 sm:$0xff]   ;;  %v6521_v14 = vld [vmem:[#allocation5 + $0x318] ss:$28 sps:$4 sm:$0xff]  }
 0x3af   :  { %v2511_v31 = vpop.permute.xlu0 %2510  ;;  %4261 = vmatprep.subr.bf16.mxu0 %v6448_v22  ;;  %4407 = vmatprep.subr.bf16.mxu1 %v6451_v29  ;;  %v6529_v22 = vld [vmem:[#allocation5 + $0x354] ss:$28 sps:$4 sm:$0xff]   ;;  %v6524_v29 = vld [vmem:[#allocation5 + $0x348] ss:$28 sps:$4 sm:$0xff]  }
 0x3b0   :  { %5362 = vmatmul.mubr.msk.f32.gmra.mrb[36].mxu0 %vm1437_vm0, %v2511_v31  ;;  %5370 = vmatmul.mubr.msk.f32.gmra.mrb[52].mxu1 %vm1437_vm0, %v2511_v31  ;;  %v6535_v31 = vld [vmem:[#allocation5 + $0x38c] ss:$28 sps:$4 sm:$0xff]  }
 0x3b1   :  { %2620 = vmatprep.mubr.f32.mxu0 %v6965_v48  ;;  %2733 = vmatprep.mubr.f32.mxu1 %v6965_v48 }
 0x3b2   :  { %4262 = vmatpush1.bf16.msra.mxu0 %v6446_v15  ;;  %4408 = vmatpush1.bf16.msra.mxu1 %v6449_v30  ;;  %v6527_v15 = vld [vmem:[#allocation5 + $0x350] ss:$28 sps:$4 sm:$0xff]   ;;  %v6532_v30 = vld [vmem:[#allocation5 + $0x384] ss:$28 sps:$4 sm:$0xff]  }
 0x3b3   :  { %v2513_v33 = vpop.permute.xlu1 %2512  ;;  %4263 = vmatprep.subr.bf16.mxu0 %v6454_v7  ;;  %4409 = vmatprep.subr.bf16.mxu1 %v6457_v16  ;;  %v2476_v7 = vld [vmem:[%s7882_s7] sm:$0xf] }
 0x3b4   :  { %5363 = vmatmul.mubr.msk.f32.gmra.mrb[38].mxu0 %vm1437_vm0, %v2513_v33  ;;  %5371 = vmatmul.mubr.msk.f32.gmra.mrb[54].mxu1 %vm1437_vm0, %v2513_v33  ;;  %v7633_v16 = vrot.slane %v2476_v7, %v7402_v44 }
 0x3b5   :  { %2626 = vmatprep.mubr.f32.mxu0 %v6965_v48  ;;  %2739 = vmatprep.mubr.f32.mxu1 %v6965_v48 }
 0x3b6   :  { %4264 = vmatpush1.bf16.msra.mxu0 %v6452_v18  ;;  %4410 = vmatpush1.bf16.msra.mxu1 %v6455_v28  ;;  %v7636_v18 = vrot.slane %v2476_v7, %v7452_v54 }
 0x3b7   :  { %v2515_v36 = vpop.permute.xlu0 %2514  ;;  %4265 = vmatprep.subr.bf16.mxu0 %v6460_v19  ;;  %4411 = vmatprep.subr.bf16.mxu1 %v6463_v32  ;;  %v7639_v19 = vrot.slane %v2476_v7, %v7410_v46  ;;  %v7642_v32 = vrot.slane %v2476_v7, %v7456_v57  ;;  %v6544_v7 = vld [vmem:[#allocation5 + $0x3f4] ss:$28 sps:$4 sm:$0xff]  }
 0x3b8   :  { %5364 = vmatmul.mubr.msk.f32.gmra.mrb[40].mxu0 %vm1437_vm0, %v2515_v36  ;;  %5372 = vmatmul.mubr.msk.f32.gmra.mrb[56].mxu1 %vm1437_vm0, %v2515_v36 }
 0x3b9   :  { %2632 = vmatprep.mubr.f32.mxu0 %v6965_v48  ;;  %2745 = vmatprep.mubr.f32.mxu1 %v6965_v48 }
 0x3ba   :  { %4266 = vmatpush1.bf16.msra.mxu0 %v6458_v34  ;;  %4412 = vmatpush1.bf16.msra.mxu1 %v6461_v35 }
 0x3bb   :  { %v2517_v41 = vpop.permute.xlu1 %2516  ;;  %4267 = vmatprep.subr.bf16.mxu0 %v6466_v37  ;;  %4413 = vmatprep.subr.bf16.mxu1 %v6469_v38 }
 0x3bc   :  { %5365 = vmatmul.mubr.msk.f32.gmra.mrb[42].mxu0 %vm1437_vm0, %v2517_v41  ;;  %5373 = vmatmul.mubr.msk.f32.gmra.mrb[58].mxu1 %vm1437_vm0, %v2517_v41 }
 0x3bd   :  { %2638 = vmatprep.mubr.f32.mxu0 %v6965_v48  ;;  %2751 = vmatprep.mubr.f32.mxu1 %v6965_v48 }
 0x3be   :  { %4268 = vmatpush1.bf16.msra.mxu0 %v6464_v39  ;;  %4414 = vmatpush1.bf16.msra.mxu1 %v6467_v40 }
 0x3bf   :  { %v2519_v50 = vpop.permute.xlu0 %2518  ;;  %4269 = vmatprep.subr.bf16.mxu0 %v6472_v20  ;;  %4415 = vmatprep.subr.bf16.mxu1 %v6475_v42 }
 0x3c0   :  { %5366 = vmatmul.mubr.msk.f32.gmra.mrb[44].mxu0 %vm1437_vm0, %v2519_v50  ;;  %5374 = vmatmul.mubr.msk.f32.gmra.mrb[60].mxu1 %vm1437_vm0, %v2519_v50 }
 0x3c1   :  { %2644 = vmatprep.mubr.f32.mxu0 %v6965_v48  ;;  %2757 = vmatprep.mubr.f32.mxu1 %v6965_v48  ;;  %v6490_v48 = vld [vmem:[#allocation5 + $0x1fc] ss:$28 sps:$4 sm:$0xff]  }
 0x3c2   :  { %4270 = vmatpush1.bf16.msra.mxu0 %v6470_v49  ;;  %4416 = vmatpush1.bf16.msra.mxu1 %v6473_v21 }
 0x3c3   :  { %v2521_v53 = vpop.permute.xlu1 %2520  ;;  %4271 = vmatprep.subr.bf16.mxu0 %v6478_v23  ;;  %4417 = vmatprep.subr.bf16.mxu1 %v6481_v51 }
 0x3c4   :  { %5367 = vmatmul.mubr.msk.f32.gmra.mrb[46].mxu0 %vm1437_vm0, %v2521_v53  ;;  %5375 = vmatmul.mubr.msk.f32.gmra.mrb[62].mxu1 %vm1437_vm0, %v2521_v53 }
 0x3c6   :  { %4272 = vmatpush1.bf16.msra.mxu0 %v6476_v24  ;;  %4418 = vmatpush1.bf16.msra.mxu1 %v6479_v52 }
 0x3c7   :  { %4273 = vmatprep.subr.bf16.mxu0 %v6484_v55  ;;  %4419 = vmatprep.subr.bf16.mxu1 %v6487_v56 }
 0x3ca   :  { %4274 = vmatpush1.bf16.msra.mxu0 %v6482_v25  ;;  %4420 = vmatpush1.bf16.msra.mxu1 %v6485_v58 }
 0x3cb   :  { %4275 = vmatprep.subr.bf16.mxu0 %v6490_v48  ;;  %4421 = vmatprep.subr.bf16.mxu1 %v6493_v47 }
 0x3ce   :  { %4276 = vmatpush1.bf16.msra.mxu0 %v6488_v59  ;;  %4422 = vmatpush1.bf16.msra.mxu1 %v6491_v0 }
 0x3cf   :  { %4277 = vmatprep.subr.bf16.mxu0 %v6496_v60  ;;  %4423 = vmatprep.subr.bf16.mxu1 %v6499_v26 }
 0x3d2   :  { %4278 = vmatpush1.bf16.msra.mxu0 %v6494_v27  ;;  %4424 = vmatpush1.bf16.msra.mxu1 %v6497_v61 }
 0x3d3   :  { %4279 = vmatprep.subr.bf16.mxu0 %v6502_v62  ;;  %4425 = vmatprep.subr.bf16.mxu1 %v6505_v63  ;;  %v6530_v62 = vld [vmem:[#allocation5 + $0x380] ss:$28 sps:$4 sm:$0xff]   ;;  %v6533_v63 = vld [vmem:[#allocation5 + $0x388] ss:$28 sps:$4 sm:$0xff]  }
 0x3d6   :  { %4280 = vmatpush1.bf16.msra.mxu0 %v6500_v1  ;;  %4426 = vmatpush1.bf16.msra.mxu1 %v6503_v2 }
 0x3d7   :  { %4281 = vmatprep.subr.bf16.mxu0 %v6508_v9  ;;  %4427 = vmatprep.subr.bf16.mxu1 %v6511_v3  ;;  %v6538_v9 = vld [vmem:[#allocation5 + $0x3bc] ss:$28 sps:$4 sm:$0xff]   ;;  %v6541_v3 = vld [vmem:[#allocation5 + $0x3c4] ss:$28 sps:$4 sm:$0xff]  }
 0x3da   :  { %4282 = vmatpush1.bf16.msra.mxu0 %v6506_v4  ;;  %4428 = vmatpush1.bf16.msra.mxu1 %v6509_v45 }
 0x3db   :  { %4283 = vmatprep.subr.bf16.mxu0 %v6514_v11  ;;  %4429 = vmatprep.subr.bf16.mxu1 %v6517_v10 }
 0x3de   :  { %4284 = vmatpush1.bf16.msra.mxu0 %v6512_v5  ;;  %4430 = vmatpush1.bf16.msra.mxu1 %v6515_v6 }
 0x3df   :  { %4285 = vmatprep.subr.bf16.mxu0 %v6520_v12  ;;  %4431 = vmatprep.subr.bf16.mxu1 %v6523_v8 }
 0x3e2   :  { %4286 = vmatpush1.bf16.msra.mxu0 %v6518_v13  ;;  %4432 = vmatpush1.bf16.msra.mxu1 %v6521_v14 }
 0x3e3   :  { %4287 = vmatprep.subr.bf16.mxu0 %v6526_v17  ;;  %4433 = vmatprep.subr.bf16.mxu1 %v6529_v22  ;;  %v6536_v17 = vld [vmem:[#allocation5 + $0x3b8] ss:$28 sps:$4 sm:$0xff]   ;;  %v6539_v22 = vld [vmem:[#allocation5 + $0x3c0] ss:$28 sps:$4 sm:$0xff]  }
 0x3e6   :  { %4288 = vmatpush1.bf16.msra.mxu0 %v6524_v29  ;;  %4434 = vmatpush1.bf16.msra.mxu1 %v6527_v15 }
 0x3e7   :  { %4330 = vmatprep.subr.bf16.mxu0 %v6532_v30  ;;  %4476 = vmatprep.subr.bf16.mxu1 %v6535_v31 }
 0x47b   :  { %v2604_v28 = vpop.f32.mrb[32].mxu0  ;;  %v2717_v33 = vpop.f32.mrb[48].mxu1 }
 0x47c   :  { %v2606_v34 = vpop.f32.mrb[33].mxu0  ;;  %v2719_v35 = vpop.f32.mrb[49].mxu1  ;;  %v2605_v36 = vadd.f32 %v2604_v28, %v7633_v16  ;;  %v2718_v37 = vadd.f32 %v2717_v33, %v7636_v18 }
 0x47d   :  { %v2607_v38 = vadd.f32 %v2606_v34, %v7639_v19  ;;  %v2720_v39 = vadd.f32 %v2719_v35, %v7642_v32 }
 0x47e   :  { %v2764_v51 = vmax.f32 %v2605_v36, 0.0  ;;  %v2766_v24 = vmax.f32 %v2718_v37, 0.0 }
 0x47f   :  { %v2610_v40 = vpop.f32.mrb[34].mxu0  ;;  %v2723_v41 = vpop.f32.mrb[50].mxu1  ;;  %v2765_v55 = vmax.f32 %v2607_v38, 0.0  ;;  %v2767_v56 = vmax.f32 %v2720_v39, 0.0 }
 0x480   :  { %v2611_v20 = vadd.f32 %v2610_v40, %v7633_v16  ;;  %v2724_v42 = vadd.f32 %v2723_v41, %v7636_v18  ;;  %v2612_v49 = vpop.f32.mrb[35].mxu0  ;;  %v2725_v21 = vpop.f32.mrb[51].mxu1 }
 0x481   :  { %v2613_v50 = vadd.f32 %v2612_v49, %v7639_v19  ;;  %v2726_v23 = vadd.f32 %v2725_v21, %v7642_v32  ;;  %v6542_v21 = vld [vmem:[#allocation5 + $0x3f0] ss:$28 sps:$4 sm:$0xff]  }
 0x482   :  { %v2768_v52 = vmax.f32 %v2611_v20, 0.0  ;;  %v2770_v53 = vmax.f32 %v2724_v42, 0.0  ;;  %v6547_v20 = vld [vmem:[#allocation5 + $0x3fc] ss:$28 sps:$4 sm:$0xff]  }
 0x483   :  { %v2769_v25 = vmax.f32 %v2613_v50, 0.0  ;;  %v2771_v58 = vmax.f32 %v2726_v23, 0.0  ;;  %v2616_v48 = vpop.f32.mrb[36].mxu0  ;;  %v2729_v47 = vpop.f32.mrb[52].mxu1 }
 0x484   :  { %v7652_v59 = vpack.c.bf16 %v2768_v52, %v2764_v51  ;;  %v7654_v0 = vpack.c.bf16 %v2770_v53, %v2766_v24  ;;  %v2618_v60 = vpop.f32.mrb[37].mxu0  ;;  %v2731_v26 = vpop.f32.mrb[53].mxu1  ;;  %v2617_v1 = vadd.f32 %v2616_v48, %v7633_v16  ;;  %v2730_v2 = vadd.f32 %v2729_v47, %v7636_v18  ;;  %v6545_v51 = vld [vmem:[#allocation5 + $0x3f8] ss:$28 sps:$4 sm:$0xff]   ;;  %v6550_v24 = vld [vmem:[#allocation5 + $0x42c] ss:$28 sps:$4 sm:$0xff]  }
 0x485   :  { %v7656_v27 = vpack.c.bf16 %v2769_v25, %v2765_v55  ;;  %v7658_v61 = vpack.c.bf16 %v2771_v58, %v2767_v56  ;;  %v2619_v4 = vadd.f32 %v2618_v60, %v7639_v19  ;;  %v2732_v45 = vadd.f32 %v2731_v26, %v7642_v32  ;;  %v6553_v25 = vld [vmem:[#allocation5 + $0x434] ss:$28 sps:$4 sm:$0xff]  }
 0x486   :  { %v2772_v29 = vmax.f32 %v2617_v1, 0.0  ;;  %v2774_v15 = vmax.f32 %v2730_v2, 0.0  ;;  %v6551_v1 = vld [vmem:[#allocation5 + $0x430] ss:$28 sps:$4 sm:$0xff]  }
 0x487   :  { %v2622_v11 = vpop.f32.mrb[38].mxu0  ;;  %v2735_v10 = vpop.f32.mrb[54].mxu1  ;;  %4289 = vmatprep.mubr.bf16.mxu0 %v7656_v27  ;;  %4435 = vmatprep.mubr.bf16.mxu1 %v7656_v27  ;;  %v2773_v28 = vmax.f32 %v2619_v4, 0.0  ;;  %v2775_v33 = vmax.f32 %v2732_v45, 0.0  ;;  %v6556_v45 = vld [vmem:[#allocation5 + $0x464] ss:$28 sps:$4 sm:$0xff]  }
 0x488   :  { %v2623_v5 = vadd.f32 %v2622_v11, %v7633_v16  ;;  %v2736_v6 = vadd.f32 %v2735_v10, %v7636_v18  ;;  %v2624_v12 = vpop.f32.mrb[39].mxu0  ;;  %v2737_v8 = vpop.f32.mrb[55].mxu1  ;;  %4290 = vmatmul.mubr.bf16.vlgmr.msra.gmra.mrb[48].mxu0 %v7652_v59  ;;  %4436 = vmatmul.mubr.bf16.vlgmr.msra.gmra.mrb[64].mxu1 %v7652_v59 }
 0x489   :  { %v2625_v13 = vadd.f32 %v2624_v12, %v7639_v19  ;;  %v2738_v14 = vadd.f32 %v2737_v8, %v7642_v32  ;;  %4331 = vmatpush1.bf16.msra.mxu0 %v6530_v62  ;;  %4477 = vmatpush1.bf16.msra.mxu1 %v6533_v63  ;;  %v6548_v63 = vld [vmem:[#allocation5 + $0x428] ss:$28 sps:$4 sm:$0xff]  }
 0x48a   :  { %v2776_v30 = vmax.f32 %v2623_v5, 0.0  ;;  %v2778_v31 = vmax.f32 %v2736_v6, 0.0  ;;  %4332 = vmatprep.subr.bf16.mxu0 %v6538_v9  ;;  %4478 = vmatprep.subr.bf16.mxu1 %v6541_v3 }
 0x48b   :  { %v2777_v34 = vmax.f32 %v2625_v13, 0.0  ;;  %v2779_v35 = vmax.f32 %v2738_v14, 0.0  ;;  %v2628_v36 = vpop.f32.mrb[40].mxu0  ;;  %v2741_v37 = vpop.f32.mrb[56].mxu1 }
 0x48c   :  { %v7672_v38 = vpack.c.bf16 %v2776_v30, %v2772_v29  ;;  %v7674_v39 = vpack.c.bf16 %v2778_v31, %v2774_v15  ;;  %v2630_v40 = vpop.f32.mrb[41].mxu0  ;;  %v2743_v41 = vpop.f32.mrb[57].mxu1  ;;  %v2629_v50 = vadd.f32 %v2628_v36, %v7633_v16  ;;  %v2742_v23 = vadd.f32 %v2741_v37, %v7636_v18  ;;  %v6559_v29 = vld [vmem:[#allocation5 + $0x46c] ss:$28 sps:$4 sm:$0xff]   ;;  %v6554_v31 = vld [vmem:[#allocation5 + $0x460] ss:$28 sps:$4 sm:$0xff]  }
 0x48d   :  { %v7676_v42 = vpack.c.bf16 %v2777_v34, %v2773_v28  ;;  %v7678_v49 = vpack.c.bf16 %v2779_v35, %v2775_v33  ;;  %4333 = vmatpush1.bf16.msra.mxu0 %v6536_v17  ;;  %4479 = vmatpush1.bf16.msra.mxu1 %v6539_v22  ;;  %v2631_v52 = vadd.f32 %v2630_v40, %v7639_v19  ;;  %v6557_v33 = vld [vmem:[#allocation5 + $0x468] ss:$28 sps:$4 sm:$0xff]   ;;  %v6562_v34 = vld [vmem:[#allocation5 + $0x49c] ss:$28 sps:$4 sm:$0xff]  }
 0x48e   :  { %4334 = vmatprep.subr.bf16.mxu0 %v6544_v7  ;;  %v2744_v53 = vadd.f32 %v2743_v41, %v7642_v32  ;;  %4480 = vmatprep.subr.bf16.mxu1 %v6547_v20  ;;  %v2780_v2 = vmax.f32 %v2629_v50, 0.0  ;;  %v2782_v9 = vmax.f32 %v2742_v23, 0.0  ;;  %v6565_v41 = vld [vmem:[#allocation5 + $0x4a4] ss:$28 sps:$4 sm:$0xff]  }
 0x48f   :  { %v2634_v55 = vpop.f32.mrb[42].mxu0  ;;  %v2747_v56 = vpop.f32.mrb[58].mxu1  ;;  %4299 = vmatprep.mubr.bf16.mxu0 %v7676_v42  ;;  %4445 = vmatprep.mubr.bf16.mxu1 %v7676_v42  ;;  %v2781_v11 = vmax.f32 %v2631_v52, 0.0  ;;  %v6560_v52 = vld [vmem:[#allocation5 + $0x498] ss:$28 sps:$4 sm:$0xff]  }
 0x490   :  { %v2635_v58 = vadd.f32 %v2634_v55, %v7633_v16  ;;  %v2748_v48 = vadd.f32 %v2747_v56, %v7636_v18  ;;  %v2636_v47 = vpop.f32.mrb[43].mxu0  ;;  %v2749_v60 = vpop.f32.mrb[59].mxu1  ;;  %4300 = vmatmul.mubr.bf16.gmra.mrb[52].mxu0 %v7672_v38  ;;  %4446 = vmatmul.mubr.bf16.gmra.mrb[68].mxu1 %v7672_v38  ;;  %v2783_v10 = vmax.f32 %v2744_v53, 0.0  ;;  %v6563_v53 = vld [vmem:[#allocation5 + $0x4a0] ss:$28 sps:$4 sm:$0xff]  }
 0x491   :  { %v2637_v26 = vadd.f32 %v2636_v47, %v7639_v19  ;;  %v2750_v62 = vadd.f32 %v2749_v60, %v7642_v32  ;;  %4335 = vmatpush1.bf16.msra.mxu0 %v6542_v21  ;;  %4481 = vmatpush1.bf16.msra.mxu1 %v6545_v51 }
 0x492   :  { %v2784_v3 = vmax.f32 %v2635_v58, 0.0  ;;  %v2786_v4 = vmax.f32 %v2748_v48, 0.0  ;;  %4336 = vmatprep.subr.bf16.mxu0 %v6550_v24  ;;  %4482 = vmatprep.subr.bf16.mxu1 %v6553_v25 }
 0x493   :  { %v2785_v5 = vmax.f32 %v2637_v26, 0.0  ;;  %v2787_v6 = vmax.f32 %v2750_v62, 0.0  ;;  %v2640_v12 = vpop.f32.mrb[44].mxu0  ;;  %v2753_v8 = vpop.f32.mrb[60].mxu1  ;;  %v6571_v26 = vld [vmem:[#allocation5 + $0x4dc] ss:$28 sps:$4 sm:$0xff]  }
 0x494   :  { %v7692_v13 = vpack.c.bf16 %v2784_v3, %v2780_v2  ;;  %v7694_v14 = vpack.c.bf16 %v2786_v4, %v2782_v9  ;;  %v2642_v17 = vpop.f32.mrb[45].mxu0  ;;  %v2755_v22 = vpop.f32.mrb[61].mxu1  ;;  %v2641_v7 = vadd.f32 %v2640_v12, %v7633_v16  ;;  %v2754_v28 = vadd.f32 %v2753_v8, %v7636_v18  ;;  %v6569_v2 = vld [vmem:[#allocation5 + $0x4d8] ss:$28 sps:$4 sm:$0xff]   ;;  %v6574_v9 = vld [vmem:[#allocation5 + $0x50c] ss:$28 sps:$4 sm:$0xff]  }
 0x495   :  { %v7696_v15 = vpack.c.bf16 %v2785_v5, %v2781_v11  ;;  %v7698_v30 = vpack.c.bf16 %v2787_v6, %v2783_v10  ;;  %4337 = vmatpush1.bf16.msra.mxu0 %v6548_v63  ;;  %4483 = vmatpush1.bf16.msra.mxu1 %v6551_v1  ;;  %v2643_v35 = vadd.f32 %v2642_v17, %v7639_v19  ;;  %v6566_v1 = vld [vmem:[#allocation5 + $0x4d0] ss:$28 sps:$4 sm:$0xff]   ;;  %v6572_v4 = vld [vmem:[#allocation5 + $0x508] ss:$28 sps:$4 sm:$0xff]   ;;  %v6578_v5 = vld [vmem:[#allocation5 + $0x540] ss:$28 sps:$4 sm:$0xff]  }
 0x496   :  { %4338 = vmatprep.subr.bf16.mxu0 %v6556_v45  ;;  %v2756_v36 = vadd.f32 %v2755_v22, %v7642_v32  ;;  %4484 = vmatprep.subr.bf16.mxu1 %v6559_v29  ;;  %v2788_v55 = vmax.f32 %v2641_v7, 0.0  ;;  %v2790_v56 = vmax.f32 %v2754_v28, 0.0  ;;  %v6577_v3 = vld [vmem:[#allocation5 + $0x514] ss:$28 sps:$4 sm:$0xff]   ;;  %v6580_v11 = vld [vmem:[#allocation5 + $0x544] ss:$28 sps:$4 sm:$0xff]  }
 0x497   :  { %v2646_v37 = vpop.f32.mrb[46].mxu0  ;;  %v2759_v40 = vpop.f32.mrb[62].mxu1  ;;  %4309 = vmatprep.mubr.bf16.mxu0 %v7696_v15  ;;  %4455 = vmatprep.mubr.bf16.mxu1 %v7696_v15  ;;  %v2789_v58 = vmax.f32 %v2643_v35, 0.0  ;;  %v6575_v45 = vld [vmem:[#allocation5 + $0x510] ss:$28 sps:$4 sm:$0xff]  }
 0x498   :  { %v2647_v20 = vadd.f32 %v2646_v37, %v7633_v16  ;;  %v2760_v21 = vadd.f32 %v2759_v40, %v7636_v18  ;;  %v2648_v50 = vpop.f32.mrb[47].mxu0  ;;  %v2761_v23 = vpop.f32.mrb[63].mxu1  ;;  %4310 = vmatmul.mubr.bf16.gmra.mrb[56].mxu0 %v7692_v13  ;;  %4456 = vmatmul.mubr.bf16.gmra.mrb[72].mxu1 %v7692_v13  ;;  %v6568_v18 = vld [vmem:[#allocation5 + $0x4d4] ss:$28 sps:$4 sm:$0xff]   ;;  %v2791_v48 = vmax.f32 %v2756_v36, 0.0 }
 0x499   :  { %v2649_v51 = vadd.f32 %v2648_v50, %v7639_v19  ;;  %v2762_v24 = vadd.f32 %v2761_v23, %v7642_v32  ;;  %4339 = vmatpush1.bf16.msra.mxu0 %v6554_v31  ;;  %4485 = vmatpush1.bf16.msra.mxu1 %v6557_v33  ;;  %v6583_v10 = vld [vmem:[#allocation5 + $0x54c] ss:$28 sps:$4 sm:$0xff]   ;;  %v6586_v12 = vld [vmem:[#allocation5 + $0x57c] ss:$28 sps:$4 sm:$0xff]   ;;  %v6589_v8 = vld [vmem:[#allocation5 + $0x584] ss:$28 sps:$4 sm:$0xff]  }
 0x49a   :  { %v2792_v25 = vmax.f32 %v2647_v20, 0.0  ;;  %v2794_v16 = vmax.f32 %v2760_v21, 0.0  ;;  %4340 = vmatprep.subr.bf16.mxu0 %v6562_v34  ;;  %4486 = vmatprep.subr.bf16.mxu1 %v6565_v41  ;;  %v6581_v6 = vld [vmem:[#allocation5 + $0x548] ss:$28 sps:$4 sm:$0xff]   ;;  %v6584_v17 = vld [vmem:[#allocation5 + $0x578] ss:$28 sps:$4 sm:$0xff]  }
 0x49b   :  { %v2793_v47 = vmax.f32 %v2649_v51, 0.0  ;;  %v2795_v60 = vmax.f32 %v2762_v24, 0.0  ;;  %v6587_v22 = vld [vmem:[#allocation5 + $0x580] ss:$28 sps:$4 sm:$0xff]   ;;  %v6592_v29 = vld [vmem:[#allocation5 + $0x5b4] ss:$28 sps:$4 sm:$0xff]  }
 0x49c   :  { %v7712_v19 = vpack.c.bf16 %v2792_v25, %v2788_v55  ;;  %v7714_v32 = vpack.c.bf16 %v2794_v16, %v2790_v56  ;;  %v6595_v31 = vld [vmem:[#allocation5 + $0x5bc] ss:$28 sps:$4 sm:$0xff]   ;;  %v6590_v7 = vld [vmem:[#allocation5 + $0x5b0] ss:$28 sps:$4 sm:$0xff]   ;;  %v6596_v35 = vld [vmem:[#allocation5 + $0x5e8] ss:$28 sps:$4 sm:$0xff]  }
 0x49d   :  { %v7716_v62 = vpack.c.bf16 %v2793_v47, %v2789_v58  ;;  %v7718_v63 = vpack.c.bf16 %v2795_v60, %v2791_v48  ;;  %4341 = vmatpush1.bf16.msra.mxu0 %v6560_v52  ;;  %4487 = vmatpush1.bf16.msra.mxu1 %v6563_v53  ;;  %v6593_v28 = vld [vmem:[#allocation5 + $0x5b8] ss:$28 sps:$4 sm:$0xff]   ;;  %v6598_v33 = vld [vmem:[#allocation5 + $0x5ec] ss:$28 sps:$4 sm:$0xff]   ;;  %v6604_v37 = vld [vmem:[#allocation5 + $0x624] ss:$28 sps:$4 sm:$0xff]  }
 0x49e   :  { %4342 = vmatprep.subr.bf16.mxu0 %v6568_v18  ;;  %4488 = vmatprep.subr.bf16.mxu1 %v6571_v26  ;;  %v6601_v34 = vld [vmem:[#allocation5 + $0x5f4] ss:$28 sps:$4 sm:$0xff]   ;;  %v6607_v40 = vld [vmem:[#allocation5 + $0x62c] ss:$28 sps:$4 sm:$0xff]   ;;  %v6602_v41 = vld [vmem:[#allocation5 + $0x620] ss:$28 sps:$4 sm:$0xff]  }
 0x49f   :  { %4319 = vmatprep.mubr.bf16.mxu0 %v7716_v62  ;;  %4465 = vmatprep.mubr.bf16.mxu1 %v7716_v62  ;;  %v6599_v36 = vld [vmem:[#allocation5 + $0x5f0] ss:$28 sps:$4 sm:$0xff]   ;;  %v6605_v20 = vld [vmem:[#allocation5 + $0x628] ss:$28 sps:$4 sm:$0xff]   ;;  %v6610_v21 = vld [vmem:[#allocation5 + $0x65c] ss:$28 sps:$4 sm:$0xff]  }
 0x4a0   :  { %4320 = vmatmul.mubr.bf16.gmra.mrb[60].mxu0 %v7712_v19  ;;  %4466 = vmatmul.mubr.bf16.gmra.mrb[76].mxu1 %v7712_v19  ;;  %v6613_v50 = vld [vmem:[#allocation5 + $0x664] ss:$28 sps:$4 sm:$0xff]   ;;  %v6608_v23 = vld [vmem:[#allocation5 + $0x658] ss:$28 sps:$4 sm:$0xff]   ;;  %v6614_v53 = vld [vmem:[#allocation5 + $0x690] ss:$28 sps:$4 sm:$0xff]  }
 0x4a1   :  { %4343 = vmatpush1.bf16.msra.mxu0 %v6566_v1  ;;  %4489 = vmatpush1.bf16.msra.mxu1 %v6569_v2  ;;  %v6611_v51 = vld [vmem:[#allocation5 + $0x660] ss:$28 sps:$4 sm:$0xff]   ;;  %v6616_v24 = vld [vmem:[#allocation5 + $0x694] ss:$28 sps:$4 sm:$0xff]   ;;  %v6622_v56 = vld [vmem:[#allocation5 + $0x6cc] ss:$28 sps:$4 sm:$0xff]  }
 0x4a2   :  { %4362 = vmatprep.mubr.bf16.mxu0 %v7658_v61  ;;  %4508 = vmatprep.mubr.bf16.mxu1 %v7658_v61  ;;  %v6619_v52 = vld [vmem:[#allocation5 + $0x69c] ss:$28 sps:$4 sm:$0xff]   ;;  %v6625_v25 = vld [vmem:[#allocation5 + $0x6d4] ss:$28 sps:$4 sm:$0xff]   ;;  %v6620_v16 = vld [vmem:[#allocation5 + $0x6c8] ss:$28 sps:$4 sm:$0xff]  }
 0x4a3   :  { %4344 = vmatprep.subr.bf16.mxu0 %v6574_v9  ;;  %4490 = vmatprep.subr.bf16.mxu1 %v6577_v3  ;;  %v6617_v55 = vld [vmem:[#allocation5 + $0x698] ss:$28 sps:$4 sm:$0xff]   ;;  %v6623_v18 = vld [vmem:[#allocation5 + $0x6d0] ss:$28 sps:$4 sm:$0xff]   ;;  %v6631_v2 = vld [vmem:[#allocation5 + $0x48] ss:$28 sps:$4 sm:$0xff]  }
 0x4a4   :  { %v6628_v58 = vld [vmem:[#allocation5 + $0x14] ss:$28 sps:$4 sm:$0xff]   ;;  %v6633_v26 = vld [vmem:[#allocation5 + $0x4c] ss:$28 sps:$4 sm:$0xff]   ;;  %v6638_v3 = vld [vmem:[#allocation5 + $0x84] ss:$28 sps:$4 sm:$0xff]  }
 0x4a5   :  { %4345 = vmatpush1.bf16.msra.mxu0 %v6572_v4  ;;  %4491 = vmatpush1.bf16.msra.mxu1 %v6575_v45  ;;  %v6629_v48 = vld [vmem:[#allocation5 + $0x1d8] ss:$28 sps:$4 sm:$0xff]   ;;  %v6626_v47 = vld [vmem:[#allocation5 + $0x10] ss:$28 sps:$4 sm:$0xff]   ;;  %v6639_v4 = vld [vmem:[#allocation5 + $0x248] ss:$28 sps:$4 sm:$0xff]  }
 0x4a6   :  { %4346 = vmatprep.subr.bf16.mxu0 %v6580_v11  ;;  %4492 = vmatprep.subr.bf16.mxu1 %v6583_v10  ;;  %v6630_v60 = vld [vmem:[#allocation5 + $0x18] ss:$28 sps:$4 sm:$0xff]   ;;  %v6634_v1 = vld [vmem:[#allocation5 + $0x210] ss:$28 sps:$4 sm:$0xff]   ;;  %v6636_v45 = vld [vmem:[#allocation5 + $0x80] ss:$28 sps:$4 sm:$0xff]  }
 0x4a7   :  { %v6635_v9 = vld [vmem:[#allocation5 + $0x50] ss:$28 sps:$4 sm:$0xff]   ;;  %v6640_v11 = vld [vmem:[#allocation5 + $0x88] ss:$28 sps:$4 sm:$0xff]   ;;  %v6643_v10 = vld [vmem:[#allocation5 + $0xbc] ss:$28 sps:$4 sm:$0xff]  }
 0x4a9   :  { %4347 = vmatpush1.bf16.msra.mxu0 %v6578_v5  ;;  %4493 = vmatpush1.bf16.msra.mxu1 %v6581_v6  ;;  %v6644_v5 = vld [vmem:[#allocation5 + $0x280] ss:$28 sps:$4 sm:$0xff]   ;;  %v6641_v6 = vld [vmem:[#allocation5 + $0xb8] ss:$28 sps:$4 sm:$0xff]  }
 0x4aa   :  { %4348 = vmatprep.subr.bf16.mxu0 %v6586_v12  ;;  %4494 = vmatprep.subr.bf16.mxu1 %v6589_v8  ;;  %v6645_v12 = vld [vmem:[#allocation5 + $0xc0] ss:$28 sps:$4 sm:$0xff]   ;;  %v6648_v8 = vld [vmem:[#allocation5 + $0xf4] ss:$28 sps:$4 sm:$0xff]  }
 0x4ad   :  { %4349 = vmatpush1.bf16.msra.mxu0 %v6584_v17  ;;  %4495 = vmatpush1.bf16.msra.mxu1 %v6587_v22  ;;  %v6649_v17 = vld [vmem:[#allocation5 + $0x2b8] ss:$28 sps:$4 sm:$0xff]   ;;  %v6646_v22 = vld [vmem:[#allocation5 + $0xf0] ss:$28 sps:$4 sm:$0xff]  }
 0x4ae   :  { %4350 = vmatprep.subr.bf16.mxu0 %v6592_v29  ;;  %4496 = vmatprep.subr.bf16.mxu1 %v6595_v31  ;;  %v6650_v29 = vld [vmem:[#allocation5 + $0xf8] ss:$28 sps:$4 sm:$0xff]   ;;  %v6653_v31 = vld [vmem:[#allocation5 + $0x12c] ss:$28 sps:$4 sm:$0xff]  }
 0x4b1   :  { %4351 = vmatpush1.bf16.msra.mxu0 %v6590_v7  ;;  %4497 = vmatpush1.bf16.msra.mxu1 %v6593_v28  ;;  %v6654_v7 = vld [vmem:[#allocation5 + $0x2f0] ss:$28 sps:$4 sm:$0xff]   ;;  %v6651_v28 = vld [vmem:[#allocation5 + $0x128] ss:$28 sps:$4 sm:$0xff]  }
 0x4b2   :  { %4352 = vmatprep.subr.bf16.mxu0 %v6598_v33  ;;  %4498 = vmatprep.subr.bf16.mxu1 %v6601_v34  ;;  %v6655_v33 = vld [vmem:[#allocation5 + $0x130] ss:$28 sps:$4 sm:$0xff]   ;;  %v6658_v34 = vld [vmem:[#allocation5 + $0x164] ss:$28 sps:$4 sm:$0xff]  }
 0x4b5   :  { %4353 = vmatpush1.bf16.msra.mxu0 %v6596_v35  ;;  %4499 = vmatpush1.bf16.msra.mxu1 %v6599_v36  ;;  %v6659_v35 = vld [vmem:[#allocation5 + $0x328] ss:$28 sps:$4 sm:$0xff]   ;;  %v6656_v36 = vld [vmem:[#allocation5 + $0x160] ss:$28 sps:$4 sm:$0xff]  }
 0x4b6   :  { %4354 = vmatprep.subr.bf16.mxu0 %v6604_v37  ;;  %4500 = vmatprep.subr.bf16.mxu1 %v6607_v40  ;;  %v6660_v37 = vld [vmem:[#allocation5 + $0x168] ss:$28 sps:$4 sm:$0xff]   ;;  %v6663_v40 = vld [vmem:[#allocation5 + $0x19c] ss:$28 sps:$4 sm:$0xff]  }
 0x4b9   :  { %4355 = vmatpush1.bf16.msra.mxu0 %v6602_v41  ;;  %4501 = vmatpush1.bf16.msra.mxu1 %v6605_v20  ;;  %v6664_v41 = vld [vmem:[#allocation5 + $0x360] ss:$28 sps:$4 sm:$0xff]   ;;  %v6661_v20 = vld [vmem:[#allocation5 + $0x198] ss:$28 sps:$4 sm:$0xff]  }
 0x4ba   :  { %4356 = vmatprep.subr.bf16.mxu0 %v6610_v21  ;;  %4502 = vmatprep.subr.bf16.mxu1 %v6613_v50  ;;  %v6665_v21 = vld [vmem:[#allocation5 + $0x1a0] ss:$28 sps:$4 sm:$0xff]   ;;  %v6668_v50 = vld [vmem:[#allocation5 + $0x1d4] ss:$28 sps:$4 sm:$0xff]  }
 0x4bd   :  { %4357 = vmatpush1.bf16.msra.mxu0 %v6608_v23  ;;  %4503 = vmatpush1.bf16.msra.mxu1 %v6611_v51  ;;  %v6669_v23 = vld [vmem:[#allocation5 + $0x558] ss:$28 sps:$4 sm:$0xff]   ;;  %v6666_v51 = vld [vmem:[#allocation5 + $0x1d0] ss:$28 sps:$4 sm:$0xff]  }
 0x4be   :  { %4358 = vmatprep.subr.bf16.mxu0 %v6616_v24  ;;  %4504 = vmatprep.subr.bf16.mxu1 %v6619_v52  ;;  %v6670_v24 = vld [vmem:[#allocation5 + $0x398] ss:$28 sps:$4 sm:$0xff]   ;;  %v6673_v52 = vld [vmem:[#allocation5 + $0x20c] ss:$28 sps:$4 sm:$0xff]  }
 0x4c1   :  { %4359 = vmatpush1.bf16.msra.mxu0 %v6614_v53  ;;  %4505 = vmatpush1.bf16.msra.mxu1 %v6617_v55  ;;  %v6674_v53 = vld [vmem:[#allocation5 + $0x590] ss:$28 sps:$4 sm:$0xff]   ;;  %v6671_v55 = vld [vmem:[#allocation5 + $0x208] ss:$28 sps:$4 sm:$0xff]  }
 0x4c2   :  { %4360 = vmatprep.subr.bf16.mxu0 %v6622_v56  ;;  %4506 = vmatprep.subr.bf16.mxu1 %v6625_v25  ;;  %v6678_v56 = vld [vmem:[#allocation5 + $0x244] ss:$28 sps:$4 sm:$0xff]  }
 0x4c3   :  { %v6679_v25 = vld [vmem:[#allocation5 + $0x5c8] ss:$28 sps:$4 sm:$0xff]  }
 0x4c5   :  { %4361 = vmatpush1.bf16.msra.mxu0 %v6620_v16  ;;  %4507 = vmatpush1.bf16.msra.mxu1 %v6623_v18  ;;  %v6676_v16 = vld [vmem:[#allocation5 + $0x240] ss:$28 sps:$4 sm:$0xff]   ;;  %v6680_v18 = vld [vmem:[#allocation5 + $0x408] ss:$28 sps:$4 sm:$0xff]  }
 0x4c6   :  { %4549 = vmatprep.subr.bf16.mxu0 %v6628_v58  ;;  %5712 = vmatprep.subr.bf16.mxu1 %v6629_v48  ;;  %v6683_v58 = vld [vmem:[#allocation5 + $0x27c] ss:$28 sps:$4 sm:$0xff]  }
 0x4c7   :  { %v6684_v48 = vld [vmem:[#allocation5 + $0x600] ss:$28 sps:$4 sm:$0xff]  }
 0x4c8   :  { %4363 = vmatmul.mubr.bf16.vlgmr.msra.gmra.mrb[48].mxu0 %v7654_v0  ;;  %4509 = vmatmul.mubr.bf16.vlgmr.msra.gmra.mrb[64].mxu1 %v7654_v0 }
 0x4c9   :  { %4372 = vmatprep.mubr.bf16.mxu0 %v7678_v49  ;;  %4518 = vmatprep.mubr.bf16.mxu1 %v7678_v49 }
 0x4ca   :  { %4550 = vmatpush1.bf16.msra.mxu0 %v6626_v47  ;;  %5713 = vmatpush3.bf16.msra.mxu1 %v6630_v60  ;;  %v6681_v47 = vld [vmem:[#allocation5 + $0x278] ss:$28 sps:$4 sm:$0xff]   ;;  %v6685_v60 = vld [vmem:[#allocation5 + $0x440] ss:$28 sps:$4 sm:$0xff]  }
 0x4cb   :  { %4551 = vmatprep.subr.bf16.mxu0 %v6633_v26  ;;  %5714 = vmatprep.subr.bf16.mxu1 %v6634_v1  ;;  %v6688_v26 = vld [vmem:[#allocation5 + $0x2b4] ss:$28 sps:$4 sm:$0xff]  }
 0x4cc   :  { %v6689_v1 = vld [vmem:[#allocation5 + $0x638] ss:$28 sps:$4 sm:$0xff]  }
 0x4ce   :  { %4552 = vmatpush1.bf16.msra.mxu0 %v6631_v2  ;;  %5715 = vmatpush3.bf16.msra.mxu1 %v6635_v9  ;;  %v6686_v2 = vld [vmem:[#allocation5 + $0x2b0] ss:$28 sps:$4 sm:$0xff]   ;;  %v6690_v9 = vld [vmem:[#allocation5 + $0x478] ss:$28 sps:$4 sm:$0xff]  }
 0x4cf   :  { %4553 = vmatprep.subr.bf16.mxu0 %v6638_v3  ;;  %5716 = vmatprep.subr.bf16.mxu1 %v6639_v4  ;;  %v6693_v3 = vld [vmem:[#allocation5 + $0x2ec] ss:$28 sps:$4 sm:$0xff]  }
 0x4d0   :  { %4373 = vmatmul.mubr.bf16.gmra.mrb[52].mxu0 %v7674_v39  ;;  %4519 = vmatmul.mubr.bf16.gmra.mrb[68].mxu1 %v7674_v39  ;;  %v6694_v4 = vld [vmem:[#allocation5 + $0x670] ss:$28 sps:$4 sm:$0xff]  }
 0x4d1   :  { %4382 = vmatprep.mubr.bf16.mxu0 %v7698_v30  ;;  %4528 = vmatprep.mubr.bf16.mxu1 %v7698_v30 }
 0x4d2   :  { %4554 = vmatpush1.bf16.msra.mxu0 %v6636_v45  ;;  %5717 = vmatpush3.bf16.msra.mxu1 %v6640_v11  ;;  %v6691_v45 = vld [vmem:[#allocation5 + $0x2e8] ss:$28 sps:$4 sm:$0xff]   ;;  %v6695_v11 = vld [vmem:[#allocation5 + $0x4b0] ss:$28 sps:$4 sm:$0xff]  }
 0x4d3   :  { %4555 = vmatprep.subr.bf16.mxu0 %v6643_v10  ;;  %5718 = vmatprep.subr.bf16.mxu1 %v6644_v5  ;;  %v6698_v10 = vld [vmem:[#allocation5 + $0x324] ss:$28 sps:$4 sm:$0xff]  }
 0x4d4   :  { %v6699_v5 = vld [vmem:[#allocation5 + $0x6a8] ss:$28 sps:$4 sm:$0xff]  }
 0x4d6   :  { %4556 = vmatpush1.bf16.msra.mxu0 %v6641_v6  ;;  %5719 = vmatpush3.bf16.msra.mxu1 %v6645_v12  ;;  %v6696_v6 = vld [vmem:[#allocation5 + $0x320] ss:$28 sps:$4 sm:$0xff]   ;;  %v6700_v12 = vld [vmem:[#allocation5 + $0x4e8] ss:$28 sps:$4 sm:$0xff]  }
 0x4d7   :  { %4557 = vmatprep.subr.bf16.mxu0 %v6648_v8  ;;  %5720 = vmatprep.subr.bf16.mxu1 %v6649_v17  ;;  %v6703_v8 = vld [vmem:[#allocation5 + $0x35c] ss:$28 sps:$4 sm:$0xff]  }
 0x4d8   :  { %4383 = vmatmul.mubr.bf16.gmra.mrb[56].mxu0 %v7694_v14  ;;  %4529 = vmatmul.mubr.bf16.gmra.mrb[72].mxu1 %v7694_v14  ;;  %v6704_v17 = vld [vmem:[#allocation5 + $0x6e0] ss:$28 sps:$4 sm:$0xff]  }
 0x4d9   :  { %4392 = vmatprep.mubr.bf16.mxu0 %v7718_v63  ;;  %4538 = vmatprep.mubr.bf16.mxu1 %v7718_v63 }
 0x4da   :  { %4558 = vmatpush1.bf16.msra.mxu0 %v6646_v22  ;;  %5721 = vmatpush3.bf16.msra.mxu1 %v6650_v29  ;;  %v6701_v22 = vld [vmem:[#allocation5 + $0x358] ss:$28 sps:$4 sm:$0xff]   ;;  %v6705_v29 = vld [vmem:[#allocation5 + $0x520] ss:$28 sps:$4 sm:$0xff]  }
 0x4db   :  { %4559 = vmatprep.subr.bf16.mxu0 %v6653_v31  ;;  %5722 = vmatprep.subr.bf16.mxu1 %v6654_v7  ;;  %v6708_v31 = vld [vmem:[#allocation5 + $0x394] ss:$28 sps:$4 sm:$0xff]  }
 0x4dc   :  { %v6706_v7 = vld [vmem:[#allocation5 + $0x390] ss:$28 sps:$4 sm:$0xff]  }
 0x4de   :  { %4560 = vmatpush1.bf16.msra.mxu0 %v6651_v28  ;;  %5723 = vmatpush3.bf16.msra.mxu1 %v6655_v33  ;;  %v6711_v28 = vld [vmem:[#allocation5 + $0x3cc] ss:$28 sps:$4 sm:$0xff]  }
 0x4df   :  { %4561 = vmatprep.subr.bf16.mxu0 %v6658_v34  ;;  %5724 = vmatprep.subr.bf16.mxu1 %v6659_v35  ;;  %v6709_v33 = vld [vmem:[#allocation5 + $0x3c8] ss:$28 sps:$4 sm:$0xff]   ;;  %v6712_v35 = vld [vmem:[#allocation5 + $0x400] ss:$28 sps:$4 sm:$0xff]  }
 0x4e0   :  { %4393 = vmatmul.mubr.bf16.gmra.mrb[60].mxu0 %v7714_v32  ;;  %4539 = vmatmul.mubr.bf16.gmra.mrb[76].mxu1 %v7714_v32  ;;  %v6714_v34 = vld [vmem:[#allocation5 + $0x404] ss:$28 sps:$4 sm:$0xff]  }
 0x4e1   :  { %4581 = vmatprep.mubr.bf16.mxu0 %v7656_v27  ;;  %4727 = vmatprep.mubr.bf16.mxu1 %v7656_v27  ;;  %v6675_v27 = vld [vmem:[#allocation5 + $0x3d0] ss:$28 sps:$4 sm:$0xff]  }
 0x4e2   :  { %4562 = vmatpush1.bf16.msra.mxu0 %v6656_v36  ;;  %5725 = vmatpush3.bf16.msra.mxu1 %v6660_v37  ;;  %v6717_v36 = vld [vmem:[#allocation5 + $0x43c] ss:$28 sps:$4 sm:$0xff]   ;;  %v6718_v37 = vld [vmem:[#allocation5 + $0x470] ss:$28 sps:$4 sm:$0xff]  }
 0x4e3   :  { %4563 = vmatprep.subr.bf16.mxu0 %v6663_v40  ;;  %5726 = vmatprep.subr.bf16.mxu1 %v6664_v41  ;;  %v6723_v40 = vld [vmem:[#allocation5 + $0x4ac] ss:$28 sps:$4 sm:$0xff]   ;;  %v6724_v41 = vld [vmem:[#allocation5 + $0x4e0] ss:$28 sps:$4 sm:$0xff]  }
 0x4e6   :  { %4564 = vmatpush1.bf16.msra.mxu0 %v6661_v20  ;;  %5727 = vmatpush3.bf16.msra.mxu1 %v6665_v21  ;;  %v6729_v20 = vld [vmem:[#allocation5 + $0x51c] ss:$28 sps:$4 sm:$0xff]   ;;  %v6730_v21 = vld [vmem:[#allocation5 + $0x550] ss:$28 sps:$4 sm:$0xff]  }
 0x4e7   :  { %4565 = vmatprep.subr.bf16.mxu0 %v6668_v50  ;;  %5752 = vmatprep.subr.bf16.mxu1 %v6669_v23  ;;  %v6735_v50 = vld [vmem:[#allocation5 + $0x58c] ss:$28 sps:$4 sm:$0xff]  }
 0x4e8   :  { %v6733_v23 = vld [vmem:[#allocation5 + $0x588] ss:$28 sps:$4 sm:$0xff]  }
 0x4e9   :  { %4728 = vmatmul.mubr.bf16.vlgmr.msra.gmra.mrb[80].mxu1 %v7652_v59 }
 0x4ea   :  { %4566 = vmatpush1.bf16.msra.mxu0 %v6666_v51  ;;  %4735 = vmatprep.mubr.bf16.mxu1 %v7676_v42  ;;  %v6738_v51 = vld [vmem:[#allocation5 + $0x5c4] ss:$28 sps:$4 sm:$0xff]  }
 0x4eb   :  { %5753 = vmatpush3.bf16.msra.mxu1 %v6670_v24  ;;  %4567 = vmatprep.subr.bf16.mxu0 %v6673_v52  ;;  %v6736_v24 = vld [vmem:[#allocation5 + $0x5c0] ss:$28 sps:$4 sm:$0xff]   ;;  %v6739_v52 = vld [vmem:[#allocation5 + $0x5f8] ss:$28 sps:$4 sm:$0xff]  }
 0x4ec   :  { %5754 = vmatprep.subr.bf16.mxu1 %v6674_v53  ;;  %v6742_v53 = vld [vmem:[#allocation5 + $0x630] ss:$28 sps:$4 sm:$0xff]  }
 0x4ee   :  { %4568 = vmatpush1.bf16.msra.mxu0 %v6671_v55  ;;  %v6747_v55 = vld [vmem:[#allocation5 + $0x66c] ss:$28 sps:$4 sm:$0xff]  }
 0x4ef   :  { %5755 = vmatpush3.bf16.msra.mxu1 %v6675_v27  ;;  %4569 = vmatprep.subr.bf16.mxu0 %v6678_v56  ;;  %v6745_v27 = vld [vmem:[#allocation5 + $0x668] ss:$28 sps:$4 sm:$0xff]  }
 0x4f0   :  { %5756 = vmatprep.subr.bf16.mxu1 %v6679_v25  ;;  %v6750_v56 = vld [vmem:[#allocation5 + $0x6a4] ss:$28 sps:$4 sm:$0xff]  }
 0x4f1   :  { %4736 = vmatmul.mubr.bf16.gmra.mrb[84].mxu1 %v7672_v38  ;;  %v6748_v25 = vld [vmem:[#allocation5 + $0x6a0] ss:$28 sps:$4 sm:$0xff]  }
 0x4f2   :  { %4570 = vmatpush1.bf16.msra.mxu0 %v6676_v16  ;;  %4743 = vmatprep.mubr.bf16.mxu1 %v7696_v15  ;;  %v6753_v16 = vld [vmem:[#allocation5 + $0x6dc] ss:$28 sps:$4 sm:$0xff]  }
 0x4f3   :  { %5757 = vmatpush3.bf16.msra.mxu1 %v6680_v18  ;;  %4571 = vmatprep.subr.bf16.mxu0 %v6683_v58  ;;  %v6751_v18 = vld [vmem:[#allocation5 + $0x6d8] ss:$28 sps:$4 sm:$0xff]   ;;  %v7775_v58 = vld [vmem:[%s7884_s9] sm:$0xff]  ;;  %s6967_s9 = smov [#allocation7]  }
 0x4f4   :  { %5758 = vmatprep.subr.bf16.mxu1 %v6684_v48  ;;  %s5112_s3 = sshll.u32 %s6967_s9, 4  ;;  %s5113_s3 = int_to_ptr.vmem [resolvable:$true] %s5112_s3 }
 0x4f5   :  { %s6930_s19 = scalar_lea.vmem %s5113_s3, 7168  ;;  %p6935_p3 = scmp.lt.s32.totalorder %s5113_s3, %s5113_s3 }
 0x4f6   :  { %4572 = vmatpush1.bf16.msra.mxu0 %v6681_v47  ;;  %p6931_p2 = scmp.ne.s32.totalorder %s5113_s3, %s6930_s19  ;;  %p6936_p4 = scmp.lt.s32.totalorder %s6930_s19, %s6930_s19 }
 0x4f7   :  { %5759 = vmatpush3.bf16.msra.mxu1 %v6685_v60  ;;  %4573 = vmatprep.subr.bf16.mxu0 %v6688_v26 }
 0x4f8   :  { %5760 = vmatprep.subr.bf16.mxu1 %v6689_v1  ;;  %p6937_p5 = por %p6936_p4, %p6935_p3 }
 0x4f9   :  { %4744 = vmatmul.mubr.bf16.gmra.mrb[88].mxu1 %v7692_v13 }
 0x4fa   :  { %4574 = vmatpush1.bf16.msra.mxu0 %v6686_v2  ;;  %4751 = vmatprep.mubr.bf16.mxu1 %v7716_v62  ;;  %p6938_p6 = pnand %p6937_p5, %p6931_p2 }
 0x4fb   :  { %5761 = vmatpush3.bf16.msra.mxu1 %v6690_v9  ;;  %4575 = vmatprep.subr.bf16.mxu0 %v6693_v3 }
 0x4fc   :  { %5762 = vmatprep.subr.bf16.mxu1 %v6694_v4 }
 0x4fe   :  { %4576 = vmatpush1.bf16.msra.mxu0 %v6691_v45 }
 0x4ff   :  { %5763 = vmatpush3.bf16.msra.mxu1 %v6695_v11  ;;  %4577 = vmatprep.subr.bf16.mxu0 %v6698_v10 }
 0x500   :  { %5764 = vmatprep.subr.bf16.mxu1 %v6699_v5 }
 0x501   :  { %4752 = vmatmul.mubr.bf16.gmra.mrb[92].mxu1 %v7712_v19 }
 0x502   :  { %4578 = vmatpush1.bf16.msra.mxu0 %v6696_v6  ;;  %4792 = vmatprep.mubr.bf16.mxu1 %v7658_v61 }
 0x503   :  { %5765 = vmatpush3.bf16.msra.mxu1 %v6700_v12  ;;  %4579 = vmatprep.subr.bf16.mxu0 %v6703_v8 }
 0x504   :  { %5766 = vmatprep.subr.bf16.mxu1 %v6704_v17 }
 0x506   :  { %4580 = vmatpush1.bf16.msra.mxu0 %v6701_v22 }
 0x507   :  { %5767 = vmatpush3.bf16.msra.mxu1 %v6705_v29  ;;  %4622 = vmatprep.subr.bf16.mxu0 %v6708_v31 }
 0x509   :  { %4582 = vmatmul.mubr.bf16.vlgmr.msra.gmra.mrb[64].mxu0 %v7652_v59  ;;  %v6715_v59 = vld [vmem:[#allocation5 + $0x438] ss:$28 sps:$4 sm:$0xff]  }
 0x50a   :  { %4793 = vmatmul.mubr.bf16.vlgmr.msra.gmra.mrb[96].mxu1 %v7654_v0  ;;  %4591 = vmatprep.mubr.bf16.mxu0 %v7676_v42  ;;  %v6720_v42 = vld [vmem:[#allocation5 + $0x474] ss:$28 sps:$4 sm:$0xff]  }
 0x50b   :  { %4623 = vmatpush1.bf16.msra.mxu0 %v6706_v7  ;;  %4800 = vmatprep.mubr.bf16.mxu1 %v7678_v49 }
 0x50c   :  { %4624 = vmatprep.subr.bf16.mxu0 %v6711_v28 }
 0x50f   :  { %4625 = vmatpush1.bf16.msra.mxu0 %v6709_v33 }
 0x510   :  { %4626 = vmatprep.subr.bf16.mxu0 %v6714_v34 }
 0x511   :  { %4592 = vmatmul.mubr.bf16.gmra.mrb[68].mxu0 %v7672_v38  ;;  %v6721_v38 = vld [vmem:[#allocation5 + $0x4a8] ss:$28 sps:$4 sm:$0xff]  }
 0x512   :  { %4801 = vmatmul.mubr.bf16.gmra.mrb[100].mxu1 %v7674_v39  ;;  %4601 = vmatprep.mubr.bf16.mxu0 %v7696_v15  ;;  %v6726_v15 = vld [vmem:[#allocation5 + $0x4e4] ss:$28 sps:$4 sm:$0xff]  }
 0x513   :  { %4627 = vmatpush1.bf16.msra.mxu0 %v6712_v35  ;;  %4808 = vmatprep.mubr.bf16.mxu1 %v7698_v30 }
 0x514   :  { %4628 = vmatprep.subr.bf16.mxu0 %v6717_v36 }
 0x517   :  { %4629 = vmatpush1.bf16.msra.mxu0 %v6715_v59 }
 0x518   :  { %4630 = vmatprep.subr.bf16.mxu0 %v6720_v42 }
 0x519   :  { %4602 = vmatmul.mubr.bf16.gmra.mrb[72].mxu0 %v7692_v13  ;;  %v6727_v13 = vld [vmem:[#allocation5 + $0x518] ss:$28 sps:$4 sm:$0xff]  }
 0x51a   :  { %4809 = vmatmul.mubr.bf16.gmra.mrb[104].mxu1 %v7694_v14  ;;  %4611 = vmatprep.mubr.bf16.mxu0 %v7716_v62  ;;  %v6732_v62 = vld [vmem:[#allocation5 + $0x554] ss:$28 sps:$4 sm:$0xff]  }
 0x51b   :  { %4631 = vmatpush1.bf16.msra.mxu0 %v6718_v37  ;;  %4816 = vmatprep.mubr.bf16.mxu1 %v7718_v63 }
 0x51c   :  { %4632 = vmatprep.subr.bf16.mxu0 %v6723_v40 }
 0x51f   :  { %4633 = vmatpush1.bf16.msra.mxu0 %v6721_v38 }
 0x520   :  { %4634 = vmatprep.subr.bf16.mxu0 %v6726_v15 }
 0x521   :  { %4612 = vmatmul.mubr.bf16.gmra.mrb[76].mxu0 %v7712_v19  ;;  %v6741_v19 = vld [vmem:[#allocation5 + $0x5fc] ss:$28 sps:$4 sm:$0xff]  }
 0x522   :  { %4817 = vmatmul.mubr.bf16.gmra.mrb[108].mxu1 %v7714_v32  ;;  %4654 = vmatprep.mubr.bf16.mxu0 %v7658_v61  ;;  %v6744_v61 = vld [vmem:[#allocation5 + $0x634] ss:$28 sps:$4 sm:$0xff]  }
 0x523   :  { %4635 = vmatpush1.bf16.msra.mxu0 %v6724_v41 }
 0x524   :  { %4636 = vmatprep.subr.bf16.mxu0 %v6729_v20 }
 0x527   :  { %4637 = vmatpush1.bf16.msra.mxu0 %v6727_v13 }
 0x528   :  { %4638 = vmatprep.subr.bf16.mxu0 %v6732_v62 }
 0x52b   :  { %4639 = vmatpush1.bf16.msra.mxu0 %v6730_v21 }
 0x52c   :  { %4640 = vmatprep.subr.bf16.mxu0 %v6735_v50 }
 0x52f   :  { %4641 = vmatpush1.bf16.msra.mxu0 %v6733_v23 }
 0x530   :  { %4642 = vmatprep.subr.bf16.mxu0 %v6738_v51 }
 0x533   :  { %4643 = vmatpush1.bf16.msra.mxu0 %v6736_v24 }
 0x534   :  { %4644 = vmatprep.subr.bf16.mxu0 %v6741_v19 }
 0x537   :  { %4645 = vmatpush1.bf16.msra.mxu0 %v6739_v52 }
 0x538   :  { %4646 = vmatprep.subr.bf16.mxu0 %v6744_v61 }
 0x53b   :  { %4647 = vmatpush1.bf16.msra.mxu0 %v6742_v53 }
 0x53c   :  { %4648 = vmatprep.subr.bf16.mxu0 %v6747_v55 }
 0x53f   :  { %4649 = vmatpush1.bf16.msra.mxu0 %v6745_v27 }
 0x540   :  { %4650 = vmatprep.subr.bf16.mxu0 %v6750_v56 }
 0x543   :  { %4651 = vmatpush1.bf16.msra.mxu0 %v6748_v25 }
 0x544   :  { %4652 = vmatprep.subr.bf16.mxu0 %v6753_v16 }
 0x547   :  { %4653 = vmatpush1.bf16.msra.mxu0 %v6751_v18 }
 0x54a   :  { %4655 = vmatmul.mubr.bf16.vlgmr.msra.gmra.mrb[64].mxu0 %v7654_v0  ;;  %v7779_v0 = vrot.slane %v7775_v58, %v7402_v44 }
 0x54b   :  { %4664 = vmatprep.mubr.bf16.mxu0 %v7678_v49  ;;  %v7787_v49 = vrot.slane %v7775_v58, %v7410_v46 }
 0x552   :  { %4665 = vmatmul.mubr.bf16.gmra.mrb[68].mxu0 %v7674_v39  ;;  %v7783_v39 = vrot.slane %v7775_v58, %v7452_v54 }
 0x553   :  { %4674 = vmatprep.mubr.bf16.mxu0 %v7698_v30 }
 0x55a   :  { %4675 = vmatmul.mubr.bf16.gmra.mrb[72].mxu0 %v7694_v14  ;;  %v7791_v14 = vrot.slane %v7775_v58, %v7456_v57 }
 0x55b   :  { %4684 = vmatprep.mubr.bf16.mxu0 %v7718_v63 }
 0x562   :  { %4685 = vmatmul.mubr.bf16.gmra.mrb[76].mxu0 %v7714_v32 }
 0x59b   :  { %v4364_v30 = vpop.f32.mrb[48].mxu0  ;;  %v4510_v63 = vpop.f32.mrb[64].mxu1 }
 0x59c   :  { %v5912_v32 = vadd.f32 %v4364_v30, %v7779_v0  ;;  %v4366_v48 = vpop.f32.mrb[49].mxu0  ;;  %v5928_v44 = vadd.f32 %v4510_v63, %v7783_v39  ;;  %v4512_v60 = vpop.f32.mrb[65].mxu1 }
 0x59d   :  { %v5913_v47 = vadd.f32 %v4366_v48, %v7787_v49  ;;  %v4368_v54 = vpop.f32.mrb[50].mxu0  ;;  %v5929_v1 = vadd.f32 %v4512_v60, %v7791_v14  ;;  %v4514_v2 = vpop.f32.mrb[66].mxu1 }
 0x59e   :  { %v4825_v26 = vmul.f32 0.5, %v5912_v32  ;;  %v5914_v46 = vadd.f32 %v4368_v54, %v7779_v0  ;;  %v4370_v9 = vpop.f32.mrb[51].mxu0  ;;  %v4827_v57 = vmul.f32 0.5, %v5928_v44  ;;  %v5930_v4 = vadd.f32 %v4514_v2, %v7783_v39  ;;  %v4516_v11 = vpop.f32.mrb[67].mxu1 }
 0x59f   :  { %v4826_v3 = vmul.f32 0.5, %v5913_v47  ;;  %v5915_v45 = vadd.f32 %v4370_v9, %v7787_v49  ;;  %v4828_v10 = vmul.f32 0.5, %v5929_v1  ;;  %v5931_v6 = vadd.f32 %v4516_v11, %v7791_v14 }
 0x5a0   :  { %6770 = vtanh.f32 %v4825_v26  ;;  %v4832_v5 = vmul.f32 0.5, %v5914_v46  ;;  %v4834_v12 = vmul.f32 0.5, %v5930_v4 }
 0x5a1   :  { %6772 = vtanh.f32 %v4827_v57  ;;  %v4833_v8 = vmul.f32 0.5, %v5915_v45  ;;  %v4835_v17 = vmul.f32 0.5, %v5931_v6 }
 0x5a2   :  { %6774 = vtanh.f32 %v4826_v3 }
 0x5a3   :  { %6776 = vtanh.f32 %v4828_v10  ;;  %v4374_v22 = vpop.f32.mrb[52].mxu0  ;;  %v4520_v31 = vpop.f32.mrb[68].mxu1 }
 0x5a4   :  { %6778 = vtanh.f32 %v4832_v5  ;;  %v5916_v29 = vadd.f32 %v4374_v22, %v7779_v0  ;;  %v4376_v7 = vpop.f32.mrb[53].mxu0  ;;  %v5932_v28 = vadd.f32 %v4520_v31, %v7783_v39  ;;  %v4522_v34 = vpop.f32.mrb[69].mxu1 }
 0x5a5   :  { %6780 = vtanh.f32 %v4834_v12  ;;  %v5917_v33 = vadd.f32 %v4376_v7, %v7787_v49  ;;  %v4378_v35 = vpop.f32.mrb[54].mxu0  ;;  %v5933_v59 = vadd.f32 %v4522_v34, %v7791_v14  ;;  %v4524_v37 = vpop.f32.mrb[70].mxu1 }
 0x5a6   :  { %6782 = vtanh.f32 %v4833_v8  ;;  %v4839_v36 = vmul.f32 0.5, %v5916_v29  ;;  %v5918_v42 = vadd.f32 %v4378_v35, %v7779_v0  ;;  %v4380_v40 = vpop.f32.mrb[55].mxu0  ;;  %v4841_v38 = vmul.f32 0.5, %v5932_v28  ;;  %v4526_v20 = vpop.f32.mrb[71].mxu1 }
 0x5a7   :  { %6784 = vtanh.f32 %v4835_v17  ;;  %v4840_v15 = vmul.f32 0.5, %v5917_v33  ;;  %v5934_v41 = vadd.f32 %v4524_v37, %v7783_v39  ;;  %v4842_v13 = vmul.f32 0.5, %v5933_v59 }
 0x5a8   :  { %6786 = vtanh.f32 %v4839_v36  ;;  %v4846_v62 = vmul.f32 0.5, %v5918_v42  ;;  %v5919_v21 = vadd.f32 %v4380_v40, %v7787_v49  ;;  %v5935_v23 = vadd.f32 %v4526_v20, %v7791_v14 }
 0x5a9   :  { %6788 = vtanh.f32 %v4841_v38  ;;  %v4848_v50 = vmul.f32 0.5, %v5934_v41 }
 0x5aa   :  { %v6771_v51 = vpop.eup %6770  ;;  %6790 = vtanh.f32 %v4840_v15  ;;  %v4847_v24 = vmul.f32 0.5, %v5919_v21  ;;  %v4849_v61 = vmul.f32 0.5, %v5935_v23 }
 0x5ab   :  { %v6773_v19 = vpop.eup %6772  ;;  %v4937_v52 = vadd.f32 1.0, %v6771_v51  ;;  %6792 = vtanh.f32 %v4842_v13  ;;  %v4384_v53 = vpop.f32.mrb[56].mxu0 }
 0x5ac   :  { %v6775_v55 = vpop.eup %6774  ;;  %v4939_v27 = vadd.f32 1.0, %v6773_v19  ;;  %6794 = vtanh.f32 %v4846_v62  ;;  %v5920_v56 = vadd.f32 %v4384_v53, %v7779_v0  ;;  %v4530_v25 = vpop.f32.mrb[72].mxu1 }
 0x5ad   :  { %v4386_v16 = vpop.f32.mrb[57].mxu0  ;;  %v6777_v18 = vpop.eup %6776  ;;  %v4993_v30 = vmul.f32 0.5, %v4937_v52  ;;  %v4938_v32 = vadd.f32 1.0, %v6775_v55  ;;  %6796 = vtanh.f32 %v4848_v50  ;;  %v5936_v63 = vadd.f32 %v4530_v25, %v7783_v39 }
 0x5ae   :  { %v4532_v48 = vpop.f32.mrb[73].mxu1  ;;  %v4388_v44 = vpop.f32.mrb[58].mxu0  ;;  %v4995_v60 = vmul.f32 0.5, %v4939_v27  ;;  %v4940_v54 = vadd.f32 1.0, %v6777_v18  ;;  %6798 = vtanh.f32 %v4847_v24  ;;  %v4853_v26 = vmul.f32 0.5, %v5920_v56 }
 0x5af   :  { %v6779_v47 = vpop.eup %6778  ;;  %v4534_v1 = vpop.f32.mrb[74].mxu1  ;;  %5049 = vst [vmem:[#allocation7] sm:$0xff] %v4993_v30  ;;  %v4994_v9 = vmul.f32 0.5, %v4938_v32  ;;  %6800 = vtanh.f32 %v4849_v61  ;;  %v4855_v3 = vmul.f32 0.5, %v5936_v63  ;;  %v5921_v5 = vadd.f32 %v4386_v16, %v7787_v49 }
 0x5b0   :  { %v4390_v46 = vpop.f32.mrb[59].mxu0  ;;  %v6781_v2 = vpop.eup %6780  ;;  %v4944_v57 = vadd.f32 1.0, %v6779_v47  ;;  %5051 = vst [vmem:[#allocation7 + $0x10] sm:$0xff] %v4995_v60  ;;  %v4996_v11 = vmul.f32 0.5, %v4940_v54  ;;  %6802 = vtanh.f32 %v4853_v26  ;;  %v5937_v17 = vadd.f32 %v4532_v48, %v7791_v14 }
 0x5b1   :  { %v4536_v4 = vpop.f32.mrb[75].mxu1  ;;  %v6783_v45 = vpop.eup %6782  ;;  %v4946_v10 = vadd.f32 1.0, %v6781_v2  ;;  %5050 = vst [vmem:[#allocation7 + $0x8] sm:$0xff] %v4994_v9  ;;  %6804 = vtanh.f32 %v4855_v3  ;;  %v4854_v7 = vmul.f32 0.5, %v5921_v5  ;;  %v5922_v28 = vadd.f32 %v4388_v44, %v7779_v0 }
 0x5b2   :  { %v6785_v6 = vpop.eup %6784  ;;  %v5000_v12 = vmul.f32 0.5, %v4944_v57  ;;  %v4945_v8 = vadd.f32 1.0, %v6783_v45  ;;  %5052 = vst [vmem:[#allocation7 + $0x18] sm:$0xff] %v4996_v11  ;;  %v4856_v36 = vmul.f32 0.5, %v5937_v17  ;;  %v5938_v59 = vadd.f32 %v4534_v1, %v7783_v39 }
 0x5b3   :  { %v6787_v22 = vpop.eup %6786  ;;  %v5002_v29 = vmul.f32 0.5, %v4946_v10  ;;  %v4947_v31 = vadd.f32 1.0, %v6785_v6  ;;  %v4394_v42 = vpop.f32.mrb[60].mxu0  ;;  %6806 = vtanh.f32 %v4854_v7  ;;  %v4860_v15 = vmul.f32 0.5, %v5922_v28 }
 0x5b4   :  { %v6789_v33 = vpop.eup %6788  ;;  %5056 = vst [vmem:[#allocation7 + $0x38] sm:$0xff] %v5000_v12  ;;  %v5001_v34 = vmul.f32 0.5, %v4945_v8  ;;  %v4951_v35 = vadd.f32 1.0, %v6787_v22  ;;  %v4540_v41 = vpop.f32.mrb[76].mxu1  ;;  %6808 = vtanh.f32 %v4856_v36  ;;  %v4862_v50 = vmul.f32 0.5, %v5938_v59 }
 0x5b5   :  { %v6791_v37 = vpop.eup %6790  ;;  %5058 = vst [vmem:[#allocation7 + $0x48] sm:$0xff] %v5002_v29  ;;  %v5003_v40 = vmul.f32 0.5, %v4947_v31  ;;  %v4953_v38 = vadd.f32 1.0, %v6789_v33  ;;  %v4396_v20 = vpop.f32.mrb[61].mxu0  ;;  %6810 = vtanh.f32 %v4860_v15  ;;  %v5923_v61 = vadd.f32 %v4390_v46, %v7787_v49 }
 0x5b6   :  { %v6793_v13 = vpop.eup %6792  ;;  %5057 = vst [vmem:[#allocation7 + $0x40] sm:$0xff] %v5001_v34  ;;  %v5007_v62 = vmul.f32 0.5, %v4951_v35  ;;  %v4952_v21 = vadd.f32 1.0, %v6791_v37  ;;  %v4542_v23 = vpop.f32.mrb[77].mxu1  ;;  %6812 = vtanh.f32 %v4862_v50  ;;  %v5939_v16 = vadd.f32 %v4536_v4, %v7791_v14 }
 0x5b7   :  { %v4398_v51 = vpop.f32.mrb[62].mxu0  ;;  %v6795_v24 = vpop.eup %6794  ;;  %5059 = vst [vmem:[#allocation7 + $0x50] sm:$0xff] %v5003_v40  ;;  %v5009_v19 = vmul.f32 0.5, %v4953_v38  ;;  %v4954_v52 = vadd.f32 1.0, %v6793_v13  ;;  %v4861_v48 = vmul.f32 0.5, %v5923_v61  ;;  %v5924_v44 = vadd.f32 %v4394_v42, %v7779_v0 }
 0x5b8   :  { %v4544_v53 = vpop.f32.mrb[78].mxu1  ;;  %v4400_v55 = vpop.f32.mrb[63].mxu0  ;;  %5063 = vst [vmem:[#allocation7 + $0x70] sm:$0xff] %v5007_v62  ;;  %v5008_v56 = vmul.f32 0.5, %v4952_v21  ;;  %v4958_v25 = vadd.f32 1.0, %v6795_v24  ;;  %v4863_v26 = vmul.f32 0.5, %v5939_v16  ;;  %v5940_v1 = vadd.f32 %v4540_v41, %v7783_v39 }
 0x5b9   :  { %v6797_v27 = vpop.eup %6796  ;;  %v4546_v18 = vpop.f32.mrb[79].mxu1  ;;  %5065 = vst [vmem:[#allocation7 + $0x80] sm:$0xff] %v5009_v19  ;;  %v5010_v32 = vmul.f32 0.5, %v4954_v52  ;;  %6814 = vtanh.f32 %v4861_v48  ;;  %v4867_v57 = vmul.f32 0.5, %v5924_v44  ;;  %v5925_v6 = vadd.f32 %v4396_v20, %v7787_v49 }
 0x5ba   :  { %v6799_v30 = vpop.eup %6798  ;;  %v4960_v63 = vadd.f32 1.0, %v6797_v27  ;;  %5064 = vst [vmem:[#allocation7 + $0x78] sm:$0xff] %v5008_v56  ;;  %v5014_v60 = vmul.f32 0.5, %v4958_v25  ;;  %6816 = vtanh.f32 %v4863_v26  ;;  %v4869_v11 = vmul.f32 0.5, %v5940_v1 }
 0x5bb   :  { %v6801_v47 = vpop.eup %6800  ;;  %v4959_v54 = vadd.f32 1.0, %v6799_v30  ;;  %5066 = vst [vmem:[#allocation7 + $0x88] sm:$0xff] %v5010_v32  ;;  %6818 = vtanh.f32 %v4867_v57  ;;  %v5941_v8 = vadd.f32 %v4542_v23, %v7791_v14  ;;  %v5926_v17 = vadd.f32 %v4398_v51, %v7779_v0 }
 0x5bc   :  { %v6803_v46 = vpop.eup %6802  ;;  %v5016_v2 = vmul.f32 0.5, %v4960_v63  ;;  %v4961_v9 = vadd.f32 1.0, %v6801_v47  ;;  %5070 = vst [vmem:[#allocation7 + $0xa8] sm:$0xff] %v5014_v60  ;;  %6820 = vtanh.f32 %v4869_v11  ;;  %v5728_v22 = vpop.f32.mrb[80].mxu1  ;;  %v4868_v7 = vmul.f32 0.5, %v5925_v6 }
 0x5bd   :  { %v6805_v3 = vpop.eup %6804  ;;  %v5015_v4 = vmul.f32 0.5, %v4959_v54  ;;  %v4965_v45 = vadd.f32 1.0, %v6803_v46  ;;  %v5942_v28 = vadd.f32 %v4544_v53, %v7783_v39  ;;  %v5927_v33 = vadd.f32 %v4400_v55, %v7787_v49  ;;  %v5729_v34 = vpop.f32.mrb[81].mxu1 }
 0x5be   :  { %5072 = vst [vmem:[#allocation7 + $0xb8] sm:$0xff] %v5016_v2  ;;  %v5017_v10 = vmul.f32 0.5, %v4961_v9  ;;  %v4967_v5 = vadd.f32 1.0, %v6805_v3  ;;  %v6807_v29 = vpop.eup %6806  ;;  %v4870_v59 = vmul.f32 0.5, %v5941_v8  ;;  %v4874_v42 = vmul.f32 0.5, %v5926_v17  ;;  %v5731_v40 = vpop.f32.mrb[82].mxu1 }
 0x5bf   :  { %5071 = vst [vmem:[#allocation7 + $0xb0] sm:$0xff] %v5015_v4  ;;  %v5021_v12 = vmul.f32 0.5, %v4965_v45  ;;  %v6809_v35 = vpop.eup %6808  ;;  %v4966_v36 = vadd.f32 1.0, %v6807_v29  ;;  %v5943_v37 = vadd.f32 %v4546_v18, %v7791_v14  ;;  %6822 = vtanh.f32 %v4868_v7  ;;  %v5732_v20 = vpop.f32.mrb[83].mxu1 }
 0x5c0   :  { %5073 = vst [vmem:[#allocation7 + $0xc0] sm:$0xff] %v5017_v10  ;;  %v5023_v31 = vmul.f32 0.5, %v4967_v5  ;;  %v6811_v38 = vpop.eup %6810  ;;  %v4968_v0 = vadd.f32 1.0, %v6809_v35  ;;  %v4876_v15 = vmul.f32 0.5, %v5942_v28  ;;  %v4875_v41 = vmul.f32 0.5, %v5927_v33 }
 0x5c1   :  { %5077 = vst [vmem:[#allocation7 + $0xe0] sm:$0xff] %v5021_v12  ;;  %v6813_v13 = vpop.eup %6812  ;;  %v5022_v39 = vmul.f32 0.5, %v4966_v36  ;;  %v4972_v62 = vadd.f32 1.0, %v6811_v38  ;;  %6824 = vtanh.f32 %v4870_v59  ;;  %v4877_v49 = vmul.f32 0.5, %v5943_v37 }
 0x5c2   :  { %5079 = vst [vmem:[#allocation7 + $0xf0] sm:$0xff] %v5023_v31  ;;  %v5024_v21 = vmul.f32 0.5, %v4968_v0  ;;  %v4974_v50 = vadd.f32 1.0, %v6813_v13  ;;  %6826 = vtanh.f32 %v4874_v42  ;;  %v7825_v23 = vadd.f32 %v5729_v34, %v5728_v22 }
 0x5c3   :  { %5078 = vst [vmem:[#allocation7 + $0xe8] sm:$0xff] %v5022_v39  ;;  %v5028_v14 = vmul.f32 0.5, %v4972_v62  ;;  %6828 = vtanh.f32 %v4876_v15  ;;  %v7827_v51 = vadd.f32 %v5732_v20, %v5731_v40  ;;  %v6815_v24 = vpop.eup %6814  ;;  %v3096_v42 = vsub.s32 6, %v7399_v43 }
 0x5c4   :  { %5080 = vst [vmem:[#allocation7 + $0xf8] sm:$0xff] %v5024_v21  ;;  %v5030_v19 = vmul.f32 0.5, %v4974_v50  ;;  %6830 = vtanh.f32 %v4875_v41  ;;  %v6817_v52 = vpop.eup %6816  ;;  %v4973_v61 = vadd.f32 1.0, %v6815_v24  ;;  %v5734_v53 = vpop.f32.mrb[84].mxu1 }
 0x5c5   :  { %5084 = vst [vmem:[#allocation7 + $0x118] sm:$0xff] %v5028_v14  ;;  %6832 = vtanh.f32 %v4877_v49  ;;  %v6819_v55 = vpop.eup %6818  ;;  %v4975_v27 = vadd.f32 1.0, %v6817_v52  ;;  %v5735_v56 = vpop.f32.mrb[85].mxu1  ;;  %v3097_v15 = vrot.slane %v7775_v58, %v3096_v42 }
 0x5c6   :  { %5086 = vst [vmem:[#allocation7 + $0x128] sm:$0xff] %v5030_v19  ;;  %v6821_v25 = vpop.eup %6820  ;;  %v5029_v16 = vmul.f32 0.5, %v4973_v61  ;;  %v4979_v18 = vadd.f32 1.0, %v6819_v55  ;;  %v7829_v30 = vadd.f32 %v5735_v56, %v5734_v53  ;;  %v5737_v32 = vpop.f32.mrb[86].mxu1 }
 0x5c7   :  { %v5031_v63 = vmul.f32 0.5, %v4975_v27  ;;  %v4981_v48 = vadd.f32 1.0, %v6821_v25  ;;  %v5738_v44 = vpop.f32.mrb[87].mxu1  ;;  %v4730_v13 = vadd.f32 %v7825_v23, %v3097_v15  ;;  %v4733_v21 = vadd.f32 %v7827_v51, %v3097_v15 }
 0x5c8   :  { %5085 = vst [vmem:[#allocation7 + $0x120] sm:$0xff] %v5029_v16  ;;  %v5035_v47 = vmul.f32 0.5, %v4979_v18  ;;  %v7831_v60 = vadd.f32 %v5738_v44, %v5737_v32  ;;  %v4738_v55 = vadd.f32 %v7829_v30, %v3097_v15 }
 0x5c9   :  { %v6823_v54 = vpop.eup %6822  ;;  %5087 = vst [vmem:[#allocation7 + $0x130] sm:$0xff] %v5031_v63  ;;  %v5037_v26 = vmul.f32 0.5, %v4981_v48 }
 0x5ca   :  { %5091 = vst [vmem:[#allocation7 + $0x150] sm:$0xff] %v5035_v47  ;;  %v4980_v46 = vadd.f32 1.0, %v6823_v54  ;;  %v4741_v23 = vadd.f32 %v7831_v60, %v3097_v15 }
 0x5cb   :  { %v6825_v1 = vpop.eup %6824  ;;  %5093 = vst [vmem:[#allocation7 + $0x160] sm:$0xff] %v5037_v26 }
 0x5cc   :  { %v6827_v2 = vpop.eup %6826  ;;  %v4982_v9 = vadd.f32 1.0, %v6825_v1  ;;  %v5036_v3 = vmul.f32 0.5, %v4980_v46  ;;  %v5740_v45 = vpop.f32.mrb[88].mxu1 }
 0x5cd   :  { %v6829_v57 = vpop.eup %6828  ;;  %v4986_v4 = vadd.f32 1.0, %v6827_v2  ;;  %v5741_v6 = vpop.f32.mrb[89].mxu1 }
 0x5ce   :  { %v6831_v11 = vpop.eup %6830  ;;  %v5038_v10 = vmul.f32 0.5, %v4982_v9  ;;  %v4988_v5 = vadd.f32 1.0, %v6829_v57  ;;  %5092 = vst [vmem:[#allocation7 + $0x158] sm:$0xff] %v5036_v3  ;;  %v5742_v22 = vadd.f32 %v5741_v6, %v5740_v45  ;;  %v5743_v29 = vpop.f32.mrb[90].mxu1 }
 0x5cf   :  { %v6833_v12 = vpop.eup %6832  ;;  %v5042_v8 = vmul.f32 0.5, %v4986_v4  ;;  %v4987_v17 = vadd.f32 1.0, %v6831_v11  ;;  %v5744_v28 = vpop.f32.mrb[91].mxu1 }
 0x5d0   :  { %5094 = vst [vmem:[#allocation7 + $0x168] sm:$0xff] %v5038_v10  ;;  %v5044_v31 = vmul.f32 0.5, %v4988_v5  ;;  %v4989_v7 = vadd.f32 1.0, %v6833_v12  ;;  %v5745_v34 = vadd.f32 %v5744_v28, %v5743_v29  ;;  %v4746_v54 = vadd.f32 %v5742_v22, %v3097_v15 }
 0x5d1   :  { %5098 = vst [vmem:[#allocation7 + $0x188] sm:$0xff] %v5042_v8  ;;  %v5043_v33 = vmul.f32 0.5, %v4987_v17 }
 0x5d2   :  { %5100 = vst [vmem:[#allocation7 + $0x198] sm:$0xff] %v5044_v31  ;;  %v5045_v35 = vmul.f32 0.5, %v4989_v7  ;;  %v4749_v9 = vadd.f32 %v5745_v34, %v3097_v15 }
 0x5d3   :  { %5099 = vst [vmem:[#allocation7 + $0x190] sm:$0xff] %v5043_v33 }
 0x5d4   :  { %5101 = vst [vmem:[#allocation7 + $0x1a0] sm:$0xff] %v5045_v35  ;;  %v5746_v36 = vpop.f32.mrb[92].mxu1 }
 0x5d5   :  { %v5747_v59 = vpop.f32.mrb[93].mxu1 }
 0x5d6   :  { %v5748_v37 = vadd.f32 %v5747_v59, %v5746_v36  ;;  %v5749_v40 = vpop.f32.mrb[94].mxu1 }
 0x5d7   :  { %v5750_v38 = vpop.f32.mrb[95].mxu1 }
 0x5d8   :  { %v5751_v0 = vadd.f32 %v5750_v38, %v5749_v40  ;;  %v4754_v17 = vadd.f32 %v5748_v37, %v3097_v15 }
 0x5da   :  { %v4757_v33 = vadd.f32 %v5751_v0, %v3097_v15 }
 0x5dd   :  { %v5768_v41 = vpop.f32.mrb[96].mxu1 }
 0x5de   :  { %v5769_v20 = vpop.f32.mrb[97].mxu1 }
 0x5df   :  { %v5770_v39 = vadd.f32 %v5769_v20, %v5768_v41  ;;  %v5771_v62 = vpop.f32.mrb[98].mxu1 }
 0x5e0   :  { %v5772_v49 = vpop.f32.mrb[99].mxu1 }
 0x5e1   :  { %v4795_v50 = vadd.f32 %v5770_v39, %v4730_v13  ;;  %v5773_v14 = vadd.f32 %v5772_v49, %v5771_v62 }
 0x5e3   :  { %v4831_v24 = vmul.f32 0.5, %v4795_v50  ;;  %v4798_v19 = vadd.f32 %v5773_v14, %v4733_v21 }
 0x5e5   :  { %6834 = vtanh.f32 %v4831_v24  ;;  %v4838_v52 = vmul.f32 0.5, %v4798_v19  ;;  %v5774_v61 = vpop.f32.mrb[100].mxu1  ;;  %v3088_v19 = vsub.s32 4, %v7399_v43 }
 0x5e6   :  { %v5775_v53 = vpop.f32.mrb[101].mxu1 }
 0x5e7   :  { %6836 = vtanh.f32 %v4838_v52  ;;  %v5776_v27 = vadd.f32 %v5775_v53, %v5774_v61  ;;  %v5777_v56 = vpop.f32.mrb[102].mxu1  ;;  %v3092_v52 = vsub.s32 5, %v7399_v43  ;;  %v7842_v61 = vrot.slane %v7775_v58, %v3088_v19 }
 0x5e8   :  { %v5778_v25 = vpop.f32.mrb[103].mxu1 }
 0x5e9   :  { %v4803_v16 = vadd.f32 %v5776_v27, %v4738_v55  ;;  %v5779_v18 = vadd.f32 %v5778_v25, %v5777_v56  ;;  %v7845_v53 = vrot.slane %v7775_v58, %v3092_v52 }
 0x5eb   :  { %v4845_v32 = vmul.f32 0.5, %v4803_v16  ;;  %v4806_v51 = vadd.f32 %v5779_v18, %v4741_v23 }
 0x5ed   :  { %6838 = vtanh.f32 %v4845_v32  ;;  %v4852_v63 = vmul.f32 0.5, %v4806_v51  ;;  %v5780_v48 = vpop.f32.mrb[104].mxu1 }
 0x5ee   :  { %v5781_v44 = vpop.f32.mrb[105].mxu1 }
 0x5ef   :  { %v6835_v47 = vpop.eup %6834  ;;  %6840 = vtanh.f32 %v4852_v63  ;;  %v5782_v26 = vadd.f32 %v5781_v44, %v5780_v48  ;;  %v5783_v1 = vpop.f32.mrb[106].mxu1 }
 0x5f0   :  { %v4943_v30 = vadd.f32 1.0, %v6835_v47  ;;  %v5784_v46 = vpop.f32.mrb[107].mxu1 }
 0x5f1   :  { %v6837_v2 = vpop.eup %6836  ;;  %v4811_v57 = vadd.f32 %v5782_v26, %v4746_v54  ;;  %v5785_v3 = vadd.f32 %v5784_v46, %v5783_v1 }
 0x5f2   :  { %v4999_v60 = vmul.f32 0.5, %v4943_v30  ;;  %v4950_v4 = vadd.f32 1.0, %v6837_v2 }
 0x5f3   :  { %v4859_v45 = vmul.f32 0.5, %v4811_v57  ;;  %v4814_v11 = vadd.f32 %v5785_v3, %v4749_v9 }
 0x5f4   :  { %5055 = vst [vmem:[#allocation7 + $0x30] sm:$0xff] %v4999_v60  ;;  %v5006_v10 = vmul.f32 0.5, %v4950_v4 }
 0x5f5   :  { %6842 = vtanh.f32 %v4859_v45  ;;  %v4866_v5 = vmul.f32 0.5, %v4814_v11  ;;  %v5786_v6 = vpop.f32.mrb[108].mxu1 }
 0x5f6   :  { %5062 = vst [vmem:[#allocation7 + $0x68] sm:$0xff] %v5006_v10  ;;  %v5787_v12 = vpop.f32.mrb[109].mxu1 }
 0x5f7   :  { %v6839_v8 = vpop.eup %6838  ;;  %6844 = vtanh.f32 %v4866_v5  ;;  %v5788_v22 = vadd.f32 %v5787_v12, %v5786_v6  ;;  %v5789_v29 = vpop.f32.mrb[110].mxu1 }
 0x5f8   :  { %v4957_v31 = vadd.f32 1.0, %v6839_v8  ;;  %v5790_v7 = vpop.f32.mrb[111].mxu1 }
 0x5f9   :  { %v6841_v28 = vpop.eup %6840  ;;  %v4819_v34 = vadd.f32 %v5788_v22, %v4754_v17  ;;  %v5791_v35 = vadd.f32 %v5790_v7, %v5789_v29 }
 0x5fa   :  { %v5013_v36 = vmul.f32 0.5, %v4957_v31  ;;  %v4964_v59 = vadd.f32 1.0, %v6841_v28 }
 0x5fb   :  { %v4873_v42 = vmul.f32 0.5, %v4819_v34  ;;  %v4822_v40 = vadd.f32 %v5791_v35, %v4757_v33 }
 0x5fc   :  { %5069 = vst [vmem:[#allocation7 + $0xa0] sm:$0xff] %v5013_v36  ;;  %v5020_v38 = vmul.f32 0.5, %v4964_v59 }
 0x5fd   :  { %6846 = vtanh.f32 %v4873_v42  ;;  %v4880_v41 = vmul.f32 0.5, %v4822_v40 }
 0x5fe   :  { %5076 = vst [vmem:[#allocation7 + $0xd8] sm:$0xff] %v5020_v38 }
 0x5ff   :  { %v6843_v20 = vpop.eup %6842  ;;  %6848 = vtanh.f32 %v4880_v41 }
 0x600   :  { %v4971_v37 = vadd.f32 1.0, %v6843_v20 }
 0x601   :  { %v6845_v13 = vpop.eup %6844 }
 0x602   :  { %v5027_v39 = vmul.f32 0.5, %v4971_v37  ;;  %v4978_v62 = vadd.f32 1.0, %v6845_v13 }
 0x604   :  { %5083 = vst [vmem:[#allocation7 + $0x110] sm:$0xff] %v5027_v39  ;;  %v5034_v49 = vmul.f32 0.5, %v4978_v62 }
 0x606   :  { %5090 = vst [vmem:[#allocation7 + $0x148] sm:$0xff] %v5034_v49 }
 0x607   :  { %v6847_v0 = vpop.eup %6846 }
 0x608   :  { %v4985_v15 = vadd.f32 1.0, %v6847_v0 }
 0x609   :  { %v6849_v21 = vpop.eup %6848 }
 0x60a   :  { %v5041_v50 = vmul.f32 0.5, %v4985_v15  ;;  %v4992_v14 = vadd.f32 1.0, %v6849_v21 }
 0x60c   :  { %5097 = vst [vmem:[#allocation7 + $0x180] sm:$0xff] %v5041_v50  ;;  %v5048_v24 = vmul.f32 0.5, %v4992_v14 }
 0x60e   :  { %5104 = vst [vmem:[#allocation7 + $0x1b8] sm:$0xff] %v5048_v24 }
 0x61d   :  { %v4656_v55 = vpop.f32.mrb[64].mxu0 }
 0x61e   :  { %v5944_v27 = vadd.f32 %v4656_v55, %v7842_v61  ;;  %v4658_v56 = vpop.f32.mrb[65].mxu0 }
 0x61f   :  { %v5945_v25 = vadd.f32 %v4658_v56, %v7845_v53  ;;  %v4660_v23 = vpop.f32.mrb[66].mxu0 }
 0x620   :  { %v4829_v16 = vmul.f32 0.5, %v5944_v27  ;;  %v5946_v18 = vadd.f32 %v4660_v23, %v7842_v61  ;;  %v4662_v32 = vpop.f32.mrb[67].mxu0 }
 0x621   :  { %v4830_v51 = vmul.f32 0.5, %v5945_v25  ;;  %v5947_v43 = vadd.f32 %v4662_v32, %v7845_v53 }
 0x622   :  { %6850 = vtanh.f32 %v4829_v16  ;;  %v4836_v63 = vmul.f32 0.5, %v5946_v18 }
 0x623   :  { %6852 = vtanh.f32 %v4830_v51  ;;  %v4837_v48 = vmul.f32 0.5, %v5947_v43 }
 0x624   :  { %6854 = vtanh.f32 %v4836_v63 }
 0x625   :  { %6856 = vtanh.f32 %v4837_v48  ;;  %v4666_v58 = vpop.f32.mrb[68].mxu0 }
 0x626   :  { %v5948_v44 = vadd.f32 %v4666_v58, %v7842_v61  ;;  %v4668_v47 = vpop.f32.mrb[69].mxu0 }
 0x627   :  { %v5949_v54 = vadd.f32 %v4668_v47, %v7845_v53  ;;  %v4670_v26 = vpop.f32.mrb[70].mxu0 }
 0x628   :  { %v4843_v1 = vmul.f32 0.5, %v5948_v44  ;;  %v5950_v30 = vadd.f32 %v4670_v26, %v7842_v61  ;;  %v4672_v46 = vpop.f32.mrb[71].mxu0 }
 0x629   :  { %v4844_v2 = vmul.f32 0.5, %v5949_v54  ;;  %v5951_v9 = vadd.f32 %v4672_v46, %v7845_v53 }
 0x62a   :  { %6858 = vtanh.f32 %v4843_v1  ;;  %v4850_v57 = vmul.f32 0.5, %v5950_v30 }
 0x62b   :  { %6860 = vtanh.f32 %v4844_v2  ;;  %v4851_v3 = vmul.f32 0.5, %v5951_v9 }
 0x62c   :  { %v6851_v60 = vpop.eup %6850  ;;  %6862 = vtanh.f32 %v4850_v57 }
 0x62d   :  { %v6853_v4 = vpop.eup %6852  ;;  %v4941_v45 = vadd.f32 1.0, %v6851_v60  ;;  %6864 = vtanh.f32 %v4851_v3  ;;  %v4676_v11 = vpop.f32.mrb[72].mxu0 }
 0x62e   :  { %v6855_v10 = vpop.eup %6854  ;;  %v4942_v5 = vadd.f32 1.0, %v6853_v4  ;;  %v5952_v6 = vadd.f32 %v4676_v11, %v7842_v61  ;;  %v4678_v12 = vpop.f32.mrb[73].mxu0 }
 0x62f   :  { %v6857_v8 = vpop.eup %6856  ;;  %v4997_v17 = vmul.f32 0.5, %v4941_v45  ;;  %v4948_v22 = vadd.f32 1.0, %v6855_v10  ;;  %v5953_v29 = vadd.f32 %v4678_v12, %v7845_v53  ;;  %v4680_v31 = vpop.f32.mrb[74].mxu0 }
 0x630   :  { %v4998_v7 = vmul.f32 0.5, %v4942_v5  ;;  %v4949_v28 = vadd.f32 1.0, %v6857_v8  ;;  %v4857_v33 = vmul.f32 0.5, %v5952_v6  ;;  %v5954_v34 = vadd.f32 %v4680_v31, %v7842_v61  ;;  %v4682_v35 = vpop.f32.mrb[75].mxu0 }
 0x631   :  { %5053 = vst [vmem:[#allocation7 + $0x20] sm:$0xff] %v4997_v17  ;;  %v5004_v36 = vmul.f32 0.5, %v4948_v22  ;;  %v4858_v59 = vmul.f32 0.5, %v5953_v29  ;;  %v5955_v42 = vadd.f32 %v4682_v35, %v7845_v53 }
 0x632   :  { %5054 = vst [vmem:[#allocation7 + $0x28] sm:$0xff] %v4998_v7  ;;  %v5005_v40 = vmul.f32 0.5, %v4949_v28  ;;  %6866 = vtanh.f32 %v4857_v33  ;;  %v4864_v38 = vmul.f32 0.5, %v5954_v34 }
 0x633   :  { %5060 = vst [vmem:[#allocation7 + $0x58] sm:$0xff] %v5004_v36  ;;  %6868 = vtanh.f32 %v4858_v59  ;;  %v4865_v41 = vmul.f32 0.5, %v5955_v42 }
 0x634   :  { %v6859_v20 = vpop.eup %6858  ;;  %5061 = vst [vmem:[#allocation7 + $0x60] sm:$0xff] %v5005_v40  ;;  %6870 = vtanh.f32 %v4864_v38 }
 0x635   :  { %v6861_v37 = vpop.eup %6860  ;;  %v4955_v13 = vadd.f32 1.0, %v6859_v20  ;;  %6872 = vtanh.f32 %v4865_v41  ;;  %v4686_v39 = vpop.f32.mrb[76].mxu0 }
 0x636   :  { %v6863_v62 = vpop.eup %6862  ;;  %v4956_v49 = vadd.f32 1.0, %v6861_v37  ;;  %v5956_v0 = vadd.f32 %v4686_v39, %v7842_v61  ;;  %v4688_v15 = vpop.f32.mrb[77].mxu0 }
 0x637   :  { %v6865_v21 = vpop.eup %6864  ;;  %v5011_v50 = vmul.f32 0.5, %v4955_v13  ;;  %v4962_v14 = vadd.f32 1.0, %v6863_v62  ;;  %v5957_v24 = vadd.f32 %v4688_v15, %v7845_v53  ;;  %v4690_v19 = vpop.f32.mrb[78].mxu0 }
 0x638   :  { %v5012_v52 = vmul.f32 0.5, %v4956_v49  ;;  %v4963_v55 = vadd.f32 1.0, %v6865_v21  ;;  %v4871_v27 = vmul.f32 0.5, %v5956_v0  ;;  %v5958_v56 = vadd.f32 %v4690_v19, %v7842_v61  ;;  %v4692_v25 = vpop.f32.mrb[79].mxu0 }
 0x639   :  { %5067 = vst [vmem:[#allocation7 + $0x90] sm:$0xff] %v5011_v50  ;;  %v5018_v23 = vmul.f32 0.5, %v4962_v14  ;;  %v4872_v16 = vmul.f32 0.5, %v5957_v24  ;;  %v5959_v18 = vadd.f32 %v4692_v25, %v7845_v53 }
 0x63a   :  { %5068 = vst [vmem:[#allocation7 + $0x98] sm:$0xff] %v5012_v52  ;;  %v5019_v32 = vmul.f32 0.5, %v4963_v55  ;;  %6874 = vtanh.f32 %v4871_v27  ;;  %v4878_v51 = vmul.f32 0.5, %v5958_v56 }
 0x63b   :  { %5074 = vst [vmem:[#allocation7 + $0xc8] sm:$0xff] %v5018_v23  ;;  %6876 = vtanh.f32 %v4872_v16  ;;  %v4879_v43 = vmul.f32 0.5, %v5959_v18 }
 0x63c   :  { %v6867_v63 = vpop.eup %6866  ;;  %5075 = vst [vmem:[#allocation7 + $0xd0] sm:$0xff] %v5019_v32  ;;  %6878 = vtanh.f32 %v4878_v51 }
 0x63d   :  { %v6869_v48 = vpop.eup %6868  ;;  %v4969_v58 = vadd.f32 1.0, %v6867_v63  ;;  %6880 = vtanh.f32 %v4879_v43 }
 0x63e   :  { %v6871_v61 = vpop.eup %6870  ;;  %v4970_v44 = vadd.f32 1.0, %v6869_v48 }
 0x63f   :  { %v6873_v47 = vpop.eup %6872  ;;  %v5025_v54 = vmul.f32 0.5, %v4969_v58  ;;  %v4976_v26 = vadd.f32 1.0, %v6871_v61 }
 0x640   :  { %v5026_v1 = vmul.f32 0.5, %v4970_v44  ;;  %v4977_v53 = vadd.f32 1.0, %v6873_v47 }
 0x641   :  { %5081 = vst [vmem:[#allocation7 + $0x100] sm:$0xff] %v5025_v54  ;;  %v5032_v30 = vmul.f32 0.5, %v4976_v26 }
 0x642   :  { %5082 = vst [vmem:[#allocation7 + $0x108] sm:$0xff] %v5026_v1  ;;  %v5033_v46 = vmul.f32 0.5, %v4977_v53 }
 0x643   :  { %5088 = vst [vmem:[#allocation7 + $0x138] sm:$0xff] %v5032_v30 }
 0x644   :  { %v6875_v2 = vpop.eup %6874  ;;  %5089 = vst [vmem:[#allocation7 + $0x140] sm:$0xff] %v5033_v46 }
 0x645   :  { %v6877_v9 = vpop.eup %6876  ;;  %v4983_v57 = vadd.f32 1.0, %v6875_v2 }
 0x646   :  { %v6879_v3 = vpop.eup %6878  ;;  %v4984_v60 = vadd.f32 1.0, %v6877_v9 }
 0x647   :  { %v6881_v4 = vpop.eup %6880  ;;  %v5039_v45 = vmul.f32 0.5, %v4983_v57  ;;  %v4990_v11 = vadd.f32 1.0, %v6879_v3 }
 0x648   :  { %v5040_v10 = vmul.f32 0.5, %v4984_v60  ;;  %v4991_v5 = vadd.f32 1.0, %v6881_v4 }
 0x649   :  { %5095 = vst [vmem:[#allocation7 + $0x170] sm:$0xff] %v5039_v45  ;;  %v5046_v6 = vmul.f32 0.5, %v4990_v11 }
 0x64a   :  { %5096 = vst [vmem:[#allocation7 + $0x178] sm:$0xff] %v5040_v10  ;;  %v5047_v12 = vmul.f32 0.5, %v4991_v5 }
 0x64b   :  { %5102 = vst [vmem:[#allocation7 + $0x1a8] sm:$0xff] %v5046_v6 }
 0x64c   :  { %5103 = vst [vmem:[#allocation7 + $0x1b0] sm:$0xff] %v5047_v12 }
 0x64d   :  { %6941 = shalt.err (!%p6938_p6)
}
 0x64e   :  { %s6942_s21 = scalar_lea.hbm %s7886_s11, 7168 }
 0x64f   :  { %p6943_p7 = scmp.ne.s32.totalorder %s7886_s11, %s6942_s21  ;;  %p6946_p8 = scmp.lt.u32.totalorder %s6942_s21, %s7886_s11 }
 0x651   :  { %p6948_p9 = pnand %p6946_p8, %p6943_p7 }
 0x653   :  { %6951 = shalt.err (!%p6948_p9)
}
 0x654   :  { %s6968_s18 = smov 896   ;;  %s6969_s23 = smov 56  }
 0x655   :  { %5118 = dma.vmem_to_hbm [thread:$0]  %s5113_s3, 7168, %s7886_s11, [#allocation4], %s6968_s18, %s6968_s18, %s6969_s23  }
 0x656   :  { %6956 = dma.done.wait [#allocation4], 7168  }
 0x657   :  { %6957 = vsyncadd [#allocation4], 4294960128 }
 0x658   :  { %5124 = vsyncpa [#allocation3], 1 }
 0x659   :  { %5125 = vsyncpa [#allocation6], 1 }
 0x65a   :  { %5126 = vsyncpa [#allocation4], 1 }

</bundles_post_ra>
